<compile_context>
chip_gen: v5e
topology: v5e:2x2
jax: 0.10.0
libtpu: 0.0.40
codegen_flags: <defaults>
</compile_context>

<pallas_src>
import math
import functools

import jax
import jax.numpy as jnp
from jax import lax
from jax.experimental import pallas as pl
from jax.experimental.pallas import tpu as pltpu

# ----------------------------- configuration --------------------------------
IN_DIM = 16          # mel dim (small synthetic)
R = 4                # reduction factor
IN_CH = IN_DIM * R   # 64
EMBED_DIM = 128      # encoder embedding dim
CONV_CH = 128        # decoder conv channels
KSIZE = 5
DILATION = 1
N_PRE = 2            # preattention Conv1dGLU layers
N_CONV = 2           # attention-bearing Conv1dGLU layers
KEY_POSITION_RATE = 1.29
QUERY_POSITION_RATE = 1.0

SQRT_HALF = math.sqrt(0.5)
PAD = (KSIZE - 1) * DILATION                  # causal left pad (4)
OFF = ((PAD + 7) // 8) * 8                    # sublane-aligned start of valid rows (8)
OUT_LANES = max(128, ((IN_CH + 1 + 127) // 128) * 128)   # packed last_conv|done lanes
NEG_INF = -1e30


def _bf16(x):
    return x.astype(jnp.bfloat16)


def _mm(a, b):
    # bf16 MXU matmul with f32 accumulation.
    return jnp.dot(a.astype(jnp.bfloat16), b.astype(jnp.bfloat16),
                   preferred_element_type=jnp.float32)


# ------------------------------ fused kernel ---------------------------------
def _decoder_kernel(
    # per-batch inputs (grid axis = batch)
    x_in_ref,      # (T, IN_CH)            f32   decoder inputs for batch b
    fpos_ref,      # (T, C)                f32   frame positional embedding
    kT_ref,        # (N_CONV, E, Tkp)      bf16  projected keys (transposed, padded)
    v_ref,         # (N_CONV, Tkp, E)      bf16  projected values * sqrt(Tk)
    # resident weights (constant index_map)
    pre_w_ref,     # (IN_CH, C)            bf16
    pre_b_ref,     # (1, C)                f32
    pglu_w_ref,    # (N_PRE, K, C, 2C)     bf16
    pglu_b_ref,    # (N_PRE, 1, 2C)        f32
    cglu_w_ref,    # (N_CONV, K, C, 2C)    bf16
    cglu_b_ref,    # (N_CONV, 1, 2C)       f32
    wq_ref,        # (N_CONV, C, E)        bf16
    bq_ref,        # (N_CONV, 1, E)        f32
    wo_ref,        # (N_CONV, E, C)        bf16
    bo_ref,        # (N_CONV, 1, C)        f32
    wpack_ref,     # (C, OUT_LANES)        bf16  last_conv | last_conv@fc packed
    bpack_ref,     # (1, OUT_LANES)        f32
    # per-batch outputs
    dstate_ref,    # (T, C)                f32   decoder_states
    packed_ref,    # (T, OUT_LANES)        f32   sigmoid(last_conv) | sigmoid(done)
    align_ref,     # (N_CONV, T, Tkp)      bf16  alignments (lane-dense)
    # scratch
    xpad_ref,      # (OFF + T, C)          f32   causal-padded conv input
    *, T, Tk, Tkp,
):
    C = CONV_CH

    # Zero the causal-pad rows every grid step (each megacore's scratch copy
    # must be initialized; only rows [OFF:] are rewritten per layer). Cheap.
    xpad_ref[:OFF, :] = jnp.zeros((OFF, C), jnp.float32)

    # --- preattention 1x1 conv + ReLU ------------------------------------
    x = _mm(x_in_ref[...], pre_w_ref[...]) + pre_b_ref[...]
    x = jnp.maximum(x, 0.0)                                     # (T, C) f32

    # --- causal Conv1dGLU: KSIZE accumulated (T,C)@(C,2C) matmuls ----------
    # y[t] = sum_j x[t - PAD + j*dil] @ W_j  with x[<0] = 0 ; GLU gate in f32.
    # NOTE: the GLU residual (added by the caller) requires Cin == Cout == C,
    # as asserted by the original module for the conv stack.
    def conv_glu(x2d, w_ref, b_ref, l):
        xpad_ref[OFF:, :] = x2d
        acc = _mm(x2d, w_ref[l, KSIZE - 1]) + b_ref[l]          # zero-shift tap
        for j in range(KSIZE - 1):
            start = OFF - PAD + j * DILATION                    # shifted taps
            acc = acc + _mm(xpad_ref[start:start + T, :], w_ref[l, j])
        return acc[:, :C] * jax.nn.sigmoid(acc[:, C:])          # (T, C)

    for l in range(N_PRE):
        x = (conv_glu(x, pglu_w_ref, pglu_b_ref, l) + x) * SQRT_HALF

    # --- conv + attention stack -------------------------------------------
    fpos = fpos_ref[...]                                        # (T, C)
    lane = lax.broadcasted_iota(jnp.int32, (T, Tkp), 1)
    valid = lane < Tk                                           # mask padded text cols

    for l in range(N_CONV):
        residual = x
        xc = conv_glu(x, cglu_w_ref, cglu_b_ref, l)
        query = xc + fpos                                       # (T, C) f32

        q = _mm(query, wq_ref[l]) + bq_ref[l]                   # (T, E)
        s = _mm(q, kT_ref[l])                                   # (T, Tkp)
        s = jnp.where(valid, s, NEG_INF)                        # masked softmax
        m = jnp.max(s, axis=-1, keepdims=True)
        e = jnp.exp(s - m)
        denom = jnp.sum(e, axis=-1, keepdims=True)
        p = e * pl.reciprocal(denom, approx=True)               # (T, Tkp)
        align_ref[l] = p.astype(jnp.bfloat16)                   # lane-dense store

        ctx = _mm(p, v_ref[l])                                  # (T, E); sqrt(Tk) folded in v
        proj = _mm(ctx, wo_ref[l]) + bo_ref[l]                  # (T, C)
        x = ((proj + query) * SQRT_HALF + residual) * SQRT_HALF # attn + outer residual

    # --- outputs ------------------------------------------------------------
    dstate_ref[...] = x
    z = _mm(x, wpack_ref[...]) + bpack_ref[...]                 # (T, OUT_LANES)
    packed_ref[...] = jax.nn.sigmoid(z)


# ------------------------------ glue (plain JAX) ------------------------------
def positional_encoding(positions, dim, w):
    """DeepVoice3 SinusoidalEncoding: angle = w * pos / 10000^(2*(i//2)/dim),
    sin on even dims, cos on odd dims, zero vector for padding position 0."""
    pos = positions.astype(jnp.float32)                         # (B, T)
    i = jnp.arange(dim)
    denom = jnp.power(10000.0, (2.0 * (i // 2).astype(jnp.float32)) / dim)
    angles = w * pos[..., None] / denom                         # (B, T, dim)
    pe = jnp.where(i % 2 == 0, jnp.sin(angles), jnp.cos(angles))
    pe = jnp.where(pos[..., None] == 0.0, 0.0, pe)
    return pe.astype(jnp.float32)


def init_params(key):
    ks = list(jax.random.split(key, 64))
    it = iter(ks)

    def nrm(shape, scale=0.05):
        return jax.random.normal(next(it), shape, jnp.float32) * scale

    params = {
        "pre_proj_w": nrm((IN_CH, CONV_CH)),
        "pre_proj_b": nrm((CONV_CH,), 0.01),
        "pre_glu": [],
        "conv_glu": [],
        "attn": [],
        "last_w": nrm((CONV_CH, IN_CH)),
        "last_b": nrm((IN_CH,), 0.01),
        "fc_w": nrm((IN_CH, 1)),
        "fc_b": nrm((1,), 0.01),
    }
    for _ in range(N_PRE):
        params["pre_glu"].append({
            "w": nrm((KSIZE, CONV_CH, 2 * CONV_CH)),
            "b": nrm((2 * CONV_CH,), 0.01),
        })
    for _ in range(N_CONV):
        params["conv_glu"].append({
            "w": nrm((KSIZE, CONV_CH, 2 * CONV_CH)),
            "b": nrm((2 * CONV_CH,), 0.01),
        })
        wq = nrm((CONV_CH, EMBED_DIM))
        params["attn"].append({
            "wq": wq,
            "bq": nrm((EMBED_DIM,), 0.01),
            # key_projection weight initialized from query_projection when
            # conv_channels == embed_dim (as in the original AttentionLayer)
            "wk": wq.copy(),
            "bk": nrm((EMBED_DIM,), 0.01),
            "wv": nrm((EMBED_DIM, EMBED_DIM)),
            "bv": nrm((EMBED_DIM,), 0.01),
            "wo": nrm((EMBED_DIM, CONV_CH)),
            "bo": nrm((CONV_CH,), 0.01),
        })
    return params


def prepare_params(params):
    """One-time weight packing (hoisted out of the per-call jitted forward):
    bf16 casts for MXU operands, per-layer stacking, last_conv+fc lane pack."""
    C, E = CONV_CH, EMBED_DIM
    packed = {
        "pre_w": _bf16(params["pre_proj_w"]),
        "pre_b": params["pre_proj_b"].reshape(1, C),
        "pglu_w": _bf16(jnp.stack([p["w"] for p in params["pre_glu"]])),
        "pglu_b": jnp.stack([p["b"].reshape(1, 2 * C) for p in params["pre_glu"]]),
        "cglu_w": _bf16(jnp.stack([p["w"] for p in params["conv_glu"]])),
        "cglu_b": jnp.stack([p["b"].reshape(1, 2 * C) for p in params["conv_glu"]]),
        "wq": _bf16(jnp.stack([a["wq"] for a in params["attn"]])),
        "bq": jnp.stack([a["bq"].reshape(1, E) for a in params["attn"]]),
        # key/value projections are applied wrapper-side (f32, XLA):
        "wk": jnp.stack([a["wk"] for a in params["attn"]]),
        "bk": jnp.stack([a["bk"].reshape(1, E) for a in params["attn"]]),
        "wv": jnp.stack([a["wv"] for a in params["attn"]]),
        "bv": jnp.stack([a["bv"].reshape(1, E) for a in params["attn"]]),
        "wo": _bf16(jnp.stack([a["wo"] for a in params["attn"]])),
        "bo": jnp.stack([a["bo"].reshape(1, C) for a in params["attn"]]),
    }
    # fold last_conv (1x1) + fc into one lane-dense (C, 128) projection:
    #   lanes [0, IN_CH)  -> pre-sigmoid last_conv output
    #   lane  IN_CH       -> pre-sigmoid done (fc on pre-sigmoid last_conv)
    w_done = params["last_w"] @ params["fc_w"]                    # (C, 1)
    b_done = params["last_b"] @ params["fc_w"] + params["fc_b"]   # (1,)
    wpack = jnp.zeros((C, OUT_LANES), jnp.float32)
    wpack = wpack.at[:, :IN_CH].set(params["last_w"])
    wpack = wpack.at[:, IN_CH:IN_CH + 1].set(w_done)
    bpack = jnp.zeros((1, OUT_LANES), jnp.float32)
    bpack = bpack.at[0, :IN_CH].set(params["last_b"])
    bpack = bpack.at[0, IN_CH].set(b_done[0])
    packed["wpack"] = _bf16(wpack)
    packed["bpack"] = bpack
    return packed


@jax.jit
def decoder_forward(packed, encoder_keys, encoder_values, inputs,
                    text_positions, frame_positions):
    """Teacher-forced forward. inputs: (B, T_dec, in_dim*r),
    encoder_keys/values: (B, T_text, embed_dim)."""
    B, T, _ = inputs.shape
    Tk = encoder_keys.shape[1]
    Tkp = max(128, ((Tk + 127) // 128) * 128)   # lane-dense padded text length
    C, E = CONV_CH, EMBED_DIM
    BT = B * T

    # positional embeddings + key addition (per-call XLA ops)
    text_pos_embed = positional_encoding(text_positions, E, KEY_POSITION_RATE)
    frame_pos_embed = positional_encoding(frame_positions, C, QUERY_POSITION_RATE)
    keys = encoder_keys + text_pos_embed

    keys_p = jnp.pad(keys, ((0, 0), (0, Tkp - Tk), (0, 0)))
    vals_p = jnp.pad(encoder_values, ((0, 0), (0, Tkp - Tk), (0, 0)))

    # Precompute per-layer key / value projections (depend only on encoder
    # outputs, not decoder state).  Attention scale sqrt(Tk) is folded into
    # the value projection so no in-kernel ctx multiply is needed; padded
    # columns pick up only the bias and are masked in the kernel softmax.
    kproj = jnp.einsum("bke,lef->lbkf", keys_p, packed["wk"]) + packed["bk"][:, None]
    kT_all = _bf16(jnp.transpose(kproj, (0, 1, 3, 2)))          # (L, B, E, Tkp)
    scale = float(Tk) * math.sqrt(1.0 / Tk)
    vproj = jnp.einsum("bke,lef->lbkf", vals_p, packed["wv"]) + packed["bv"][:, None]
    v_all = _bf16(vproj * scale)                                # (L, B, Tkp, E)

    x_in2d = inputs.reshape(BT, IN_CH)
    fpos2d = frame_pos_embed.reshape(BT, C)

    operands = (x_in2d, fpos2d, kT_all, v_all,
                packed["pre_w"], packed["pre_b"],
                packed["pglu_w"], packed["pglu_b"],
                packed["cglu_w"], packed["cglu_b"],
                packed["wq"], packed["bq"], packed["wo"], packed["bo"],
                packed["wpack"], packed["bpack"])

    def resident(arr):
        nd = arr.ndim
        return pl.BlockSpec(arr.shape, lambda b, _nd=nd: (0,) * _nd)

    in_specs = [
        pl.BlockSpec((T, IN_CH), lambda b: (b, 0)),             # x_in per batch
        pl.BlockSpec((T, C), lambda b: (b, 0)),                 # fpos per batch
        pl.BlockSpec((N_CONV, None, E, Tkp), lambda b: (0, b, 0, 0)),
        pl.BlockSpec((N_CONV, None, Tkp, E), lambda b: (0, b, 0, 0)),
    ] + [resident(a) for a in operands[4:]]

    out_shape = (jax.ShapeDtypeStruct((BT, C), jnp.float32),
                 jax.ShapeDtypeStruct((BT, OUT_LANES), jnp.float32),
                 jax.ShapeDtypeStruct((B, N_CONV, T, Tkp), jnp.bfloat16))
    out_specs = (pl.BlockSpec((T, C), lambda b: (b, 0)),
                 pl.BlockSpec((T, OUT_LANES), lambda b: (b, 0)),
                 pl.BlockSpec((None, N_CONV, T, Tkp), lambda b: (b, 0, 0, 0)))

    kernel = functools.partial(_decoder_kernel, T=T, Tk=Tk, Tkp=Tkp)

    # grid over batch: "parallel" lets v7x's two TensorCores each take a
    # batch element; on v5e/v6e it is a cheap sequential loop.
    # TODO(synk): at production T/Tk sizes, tile T (carrying PAD rows across
    # tile boundaries) and Tk with an explicit VMEM budget instead of keeping
    # everything resident per batch element.
    dstate2d, packed2d, align = pl.pallas_call(
        kernel,
        out_shape=out_shape,
        grid=(B,),
        in_specs=in_specs,
        out_specs=out_specs,
        scratch_shapes=[pltpu.VMEM((OFF + T, C), jnp.float32)],
        compiler_params=pltpu.CompilerParams(
            dimension_semantics=("parallel",)),
    )(*operands)

    outputs = packed2d[:, :IN_CH].reshape(B, T, IN_CH)
    done = packed2d[:, IN_CH:IN_CH + 1].reshape(B, T, 1)
    decoder_states = dstate2d.reshape(B, T, C)
    alignments = jnp.transpose(align, (1, 0, 2, 3))[..., :Tk].astype(jnp.float32)
    return outputs, alignments, done, decoder_states


# TODO(synk): incremental_forward (autoregressive inference loop with dynamic
# stopping and monotonic-attention windowing), multi-speaker projections and
# use_memory_mask are not implemented; only the teacher-forced forward is
# mapped to the fused Pallas kernel.


if __name__ == "__main__":
    B = 2
    T_DEC = 16    # decoder frames (inputs already grouped by r)
    T_TEXT = 8    # encoder text length

    key = jax.random.PRNGKey(0)
    kp, k1, k2, k3 = jax.random.split(key, 4)
    params = init_params(kp)
    packed = prepare_params(params)   # one-time weight packing (hoisted)

    inputs = jax.random.normal(k1, (B, T_DEC, IN_CH), jnp.float32) * 0.1
    encoder_keys = jax.random.normal(k2, (B, T_TEXT, EMBED_DIM), jnp.float32) * 0.1
    encoder_values = jax.random.normal(k3, (B, T_TEXT, EMBED_DIM), jnp.float32) * 0.1
    text_positions = jnp.broadcast_to(jnp.arange(1, T_TEXT + 1, dtype=jnp.int32),
                                      (B, T_TEXT))
    frame_positions = jnp.broadcast_to(jnp.arange(1, T_DEC + 1, dtype=jnp.int32),
                                       (B, T_DEC))

    outputs, alignments, done, decoder_states = decoder_forward(
        packed, encoder_keys, encoder_values, inputs,
        text_positions, frame_positions)

    jax.block_until_ready((outputs, alignments, done, decoder_states))
    assert outputs.shape == (B, T_DEC, IN_CH)
    assert alignments.shape == (N_CONV, B, T_DEC, T_TEXT)
    assert done.shape == (B, T_DEC, 1)
    assert decoder_states.shape == (B, T_DEC, CONV_CH)
    assert bool(jnp.all(jnp.isfinite(outputs)))
    assert bool(jnp.all(jnp.isfinite(decoder_states)))
    # softmax rows sum to ~1 (bf16-stored alignments + approx reciprocal)
    assert bool(jnp.all(jnp.abs(jnp.sum(alignments, axis=-1) - 1.0) < 2e-2))
    print("KERNEL_OK")
</pallas_src>

<mosaic_0001>
module attributes {stable_mosaic.version = 11 : i64} {
  func.func @_decoder_kernel(%arg0: i32, %arg1: memref<16x64xf32, #tpu.memory_space<vmem>>, %arg2: memref<16x128xf32, #tpu.memory_space<vmem>>, %arg3: memref<2x1x128x128xbf16, #tpu.memory_space<vmem>>, %arg4: memref<2x1x128x128xbf16, #tpu.memory_space<vmem>>, %arg5: memref<64x128xbf16, #tpu.memory_space<vmem>>, %arg6: memref<1x128xf32, #tpu.memory_space<vmem>>, %arg7: memref<2x5x128x256xbf16, #tpu.memory_space<vmem>>, %arg8: memref<2x1x256xf32, #tpu.memory_space<vmem>>, %arg9: memref<2x5x128x256xbf16, #tpu.memory_space<vmem>>, %arg10: memref<2x1x256xf32, #tpu.memory_space<vmem>>, %arg11: memref<2x128x128xbf16, #tpu.memory_space<vmem>>, %arg12: memref<2x1x128xf32, #tpu.memory_space<vmem>>, %arg13: memref<2x128x128xbf16, #tpu.memory_space<vmem>>, %arg14: memref<2x1x128xf32, #tpu.memory_space<vmem>>, %arg15: memref<128x128xbf16, #tpu.memory_space<vmem>>, %arg16: memref<1x128xf32, #tpu.memory_space<vmem>>, %arg17: memref<16x128xf32, #tpu.memory_space<vmem>>, %arg18: memref<16x128xf32, #tpu.memory_space<vmem>>, %arg19: memref<1x2x16x128xbf16, #tpu.memory_space<vmem>>, %arg20: memref<24x128xf32, #tpu.memory_space<vmem>>) attributes {dimension_semantics = [#tpu.dimension_semantics<parallel>], iteration_bounds = array<i64: 2>, scalar_prefetch = 0 : i64, scratch_operands = 1 : i64, tpu.core_type = #tpu.core_type<tc>, window_params = [{transform_indices = @transform_0, window_bounds = array<i64: 16, 64>}, {transform_indices = @transform_1, window_bounds = array<i64: 16, 128>}, {transform_indices = @transform_2, window_bounds = array<i64: 2, 1, 128, 128>}, {transform_indices = @transform_3, window_bounds = array<i64: 2, 1, 128, 128>}, {pipeline_mode = #tpu.pipeline_mode<synchronous>, transform_indices = @transform_4, window_bounds = array<i64: 64, 128>}, {pipeline_mode = #tpu.pipeline_mode<synchronous>, transform_indices = @transform_5, window_bounds = array<i64: 1, 128>}, {pipeline_mode = #tpu.pipeline_mode<synchronous>, transform_indices = @transform_6, window_bounds = array<i64: 2, 5, 128, 256>}, {pipeline_mode = #tpu.pipeline_mode<synchronous>, transform_indices = @transform_7, window_bounds = array<i64: 2, 1, 256>}, {pipeline_mode = #tpu.pipeline_mode<synchronous>, transform_indices = @transform_8, window_bounds = array<i64: 2, 5, 128, 256>}, {pipeline_mode = #tpu.pipeline_mode<synchronous>, transform_indices = @transform_9, window_bounds = array<i64: 2, 1, 256>}, {pipeline_mode = #tpu.pipeline_mode<synchronous>, transform_indices = @transform_10, window_bounds = array<i64: 2, 128, 128>}, {pipeline_mode = #tpu.pipeline_mode<synchronous>, transform_indices = @transform_11, window_bounds = array<i64: 2, 1, 128>}, {pipeline_mode = #tpu.pipeline_mode<synchronous>, transform_indices = @transform_12, window_bounds = array<i64: 2, 128, 128>}, {pipeline_mode = #tpu.pipeline_mode<synchronous>, transform_indices = @transform_13, window_bounds = array<i64: 2, 1, 128>}, {pipeline_mode = #tpu.pipeline_mode<synchronous>, transform_indices = @transform_14, window_bounds = array<i64: 128, 128>}, {pipeline_mode = #tpu.pipeline_mode<synchronous>, transform_indices = @transform_15, window_bounds = array<i64: 1, 128>}, {transform_indices = @transform_16, window_bounds = array<i64: 16, 128>}, {transform_indices = @transform_17, window_bounds = array<i64: 16, 128>}, {transform_indices = @transform_18, window_bounds = array<i64: 1, 2, 16, 128>}]} {
    %cst = arith.constant 0.000000e+00 : f32
    %0 = vector.broadcast %cst : f32 to vector<8x128xf32>
    %c0 = arith.constant 0 : index
    %c0_0 = arith.constant 0 : index
    %1 = vector.load %arg20[%c0, %c0_0] : memref<24x128xf32, #tpu.memory_space<vmem>>, vector<8x128xf32>
    tpu.vector_store %arg20[%c0, %c0_0], %0 {strides = array<i32>} : memref<24x128xf32, #tpu.memory_space<vmem>>, vector<8x128xf32>,
    %c0_1 = arith.constant 0 : index
    %c0_2 = arith.constant 0 : index
    %2 = vector.load %arg1[%c0_1, %c0_2] : memref<16x64xf32, #tpu.memory_space<vmem>>, vector<16x64xf32>
    %c0_3 = arith.constant 0 : index
    %c0_4 = arith.constant 0 : index
    %3 = vector.load %arg5[%c0_3, %c0_4] : memref<64x128xbf16, #tpu.memory_space<vmem>>, vector<64x128xbf16>
    %4 = arith.truncf %2 : vector<16x64xf32> to vector<16x64xbf16>
    %cst_5 = arith.constant dense<0.000000e+00> : vector<16x128xf32>
    %5 = tpu.matmul %4, %3, %cst_5 {dimension_numbers = #tpu.dot_dimension_numbers<[1], [0], [0], [1], [0, 0, 1, 1], [], []>} : vector<16x64xbf16>, vector<64x128xbf16>, vector<16x128xf32> -> vector<16x128xf32>
    %c0_6 = arith.constant 0 : index
    %c0_7 = arith.constant 0 : index
    %6 = vector.load %arg6[%c0_6, %c0_7] : memref<1x128xf32, #tpu.memory_space<vmem>>, vector<1x128xf32>
    %7 = vector.broadcast %6 : vector<1x128xf32> to vector<16x128xf32>
    %8 = arith.addf %5, %7 : vector<16x128xf32>
    %cst_8 = arith.constant 0.000000e+00 : f32
    %9 = vector.broadcast %cst_8 : f32 to vector<16x128xf32>
    %10 = arith.maximumf %8, %9 : vector<16x128xf32>
    %c8 = arith.constant 8 : index
    %c0_9 = arith.constant 0 : index
    %11 = vector.load %arg20[%c8, %c0_9] : memref<24x128xf32, #tpu.memory_space<vmem>>, vector<16x128xf32>
    tpu.vector_store %arg20[%c8, %c0_9], %10 {strides = array<i32>} : memref<24x128xf32, #tpu.memory_space<vmem>>, vector<16x128xf32>,
    %c0_10 = arith.constant 0 : index
    %c4 = arith.constant 4 : index
    %c0_11 = arith.constant 0 : index
    %c0_12 = arith.constant 0 : index
    %12 = vector.load %arg7[%c0_10, %c4, %c0_11, %c0_12] : memref<2x5x128x256xbf16, #tpu.memory_space<vmem>>, vector<1x1x128x256xbf16>
    %13 = vector.shape_cast %12 : vector<1x1x128x256xbf16> to vector<128x256xbf16>
    %14 = arith.truncf %10 : vector<16x128xf32> to vector<16x128xbf16>
    %cst_13 = arith.constant dense<0.000000e+00> : vector<16x256xf32>
    %15 = tpu.matmul %14, %13, %cst_13 {dimension_numbers = #tpu.dot_dimension_numbers<[1], [0], [0], [1], [0, 0, 1, 1], [], []>} : vector<16x128xbf16>, vector<128x256xbf16>, vector<16x256xf32> -> vector<16x256xf32>
    %c0_14 = arith.constant 0 : index
    %c0_15 = arith.constant 0 : index
    %c0_16 = arith.constant 0 : index
    %16 = vector.load %arg8[%c0_14, %c0_15, %c0_16] : memref<2x1x256xf32, #tpu.memory_space<vmem>>, vector<1x1x256xf32>
    %17 = vector.shape_cast %16 : vector<1x1x256xf32> to vector<1x256xf32>
    %18 = vector.broadcast %17 : vector<1x256xf32> to vector<16x256xf32>
    %19 = arith.addf %15, %18 : vector<16x256xf32>
    %c4_17 = arith.constant 4 : index
    %c0_18 = arith.constant 0 : index
    %20 = vector.load %arg20[%c4_17, %c0_18] : memref<24x128xf32, #tpu.memory_space<vmem>>, vector<16x128xf32>
    %c0_19 = arith.constant 0 : index
    %c0_20 = arith.constant 0 : index
    %c0_21 = arith.constant 0 : index
    %c0_22 = arith.constant 0 : index
    %21 = vector.load %arg7[%c0_19, %c0_20, %c0_21, %c0_22] : memref<2x5x128x256xbf16, #tpu.memory_space<vmem>>, vector<1x1x128x256xbf16>
    %22 = vector.shape_cast %21 : vector<1x1x128x256xbf16> to vector<128x256xbf16>
    %23 = arith.truncf %20 : vector<16x128xf32> to vector<16x128xbf16>
    %cst_23 = arith.constant dense<0.000000e+00> : vector<16x256xf32>
    %24 = tpu.matmul %23, %22, %cst_23 {dimension_numbers = #tpu.dot_dimension_numbers<[1], [0], [0], [1], [0, 0, 1, 1], [], []>} : vector<16x128xbf16>, vector<128x256xbf16>, vector<16x256xf32> -> vector<16x256xf32>
    %25 = arith.addf %19, %24 : vector<16x256xf32>
    %c5 = arith.constant 5 : index
    %c0_24 = arith.constant 0 : index
    %26 = vector.load %arg20[%c5, %c0_24] : memref<24x128xf32, #tpu.memory_space<vmem>>, vector<16x128xf32>
    %c0_25 = arith.constant 0 : index
    %c1 = arith.constant 1 : index
    %c0_26 = arith.constant 0 : index
    %c0_27 = arith.constant 0 : index
    %27 = vector.load %arg7[%c0_25, %c1, %c0_26, %c0_27] : memref<2x5x128x256xbf16, #tpu.memory_space<vmem>>, vector<1x1x128x256xbf16>
    %28 = vector.shape_cast %27 : vector<1x1x128x256xbf16> to vector<128x256xbf16>
    %29 = arith.truncf %26 : vector<16x128xf32> to vector<16x128xbf16>
    %cst_28 = arith.constant dense<0.000000e+00> : vector<16x256xf32>
    %30 = tpu.matmul %29, %28, %cst_28 {dimension_numbers = #tpu.dot_dimension_numbers<[1], [0], [0], [1], [0, 0, 1, 1], [], []>} : vector<16x128xbf16>, vector<128x256xbf16>, vector<16x256xf32> -> vector<16x256xf32>
    %31 = arith.addf %25, %30 : vector<16x256xf32>
    %c6 = arith.constant 6 : index
    %c0_29 = arith.constant 0 : index
    %32 = vector.load %arg20[%c6, %c0_29] : memref<24x128xf32, #tpu.memory_space<vmem>>, vector<16x128xf32>
    %c0_30 = arith.constant 0 : index
    %c2 = arith.constant 2 : index
    %c0_31 = arith.constant 0 : index
    %c0_32 = arith.constant 0 : index
    %33 = vector.load %arg7[%c0_30, %c2, %c0_31, %c0_32] : memref<2x5x128x256xbf16, #tpu.memory_space<vmem>>, vector<1x1x128x256xbf16>
    %34 = vector.shape_cast %33 : vector<1x1x128x256xbf16> to vector<128x256xbf16>
    %35 = arith.truncf %32 : vector<16x128xf32> to vector<16x128xbf16>
    %cst_33 = arith.constant dense<0.000000e+00> : vector<16x256xf32>
    %36 = tpu.matmul %35, %34, %cst_33 {dimension_numbers = #tpu.dot_dimension_numbers<[1], [0], [0], [1], [0, 0, 1, 1], [], []>} : vector<16x128xbf16>, vector<128x256xbf16>, vector<16x256xf32> -> vector<16x256xf32>
    %37 = arith.addf %31, %36 : vector<16x256xf32>
    %c7 = arith.constant 7 : index
    %c0_34 = arith.constant 0 : index
    %38 = vector.load %arg20[%c7, %c0_34] : memref<24x128xf32, #tpu.memory_space<vmem>>, vector<16x128xf32>
    %c0_35 = arith.constant 0 : index
    %c3 = arith.constant 3 : index
    %c0_36 = arith.constant 0 : index
    %c0_37 = arith.constant 0 : index
    %39 = vector.load %arg7[%c0_35, %c3, %c0_36, %c0_37] : memref<2x5x128x256xbf16, #tpu.memory_space<vmem>>, vector<1x1x128x256xbf16>
    %40 = vector.shape_cast %39 : vector<1x1x128x256xbf16> to vector<128x256xbf16>
    %41 = arith.truncf %38 : vector<16x128xf32> to vector<16x128xbf16>
    %cst_38 = arith.constant dense<0.000000e+00> : vector<16x256xf32>
    %42 = tpu.matmul %41, %40, %cst_38 {dimension_numbers = #tpu.dot_dimension_numbers<[1], [0], [0], [1], [0, 0, 1, 1], [], []>} : vector<16x128xbf16>, vector<128x256xbf16>, vector<16x256xf32> -> vector<16x256xf32>
    %43 = arith.addf %37, %42 : vector<16x256xf32>
    %44 = vector.extract_strided_slice %43 {offsets = [0, 0], sizes = [16, 128], strides = [1, 1]} : vector<16x256xf32> to vector<16x128xf32>
    %45 = vector.extract_strided_slice %43 {offsets = [0, 128], sizes = [16, 128], strides = [1, 1]} : vector<16x256xf32> to vector<16x128xf32>
    %46 = arith.negf %45 : vector<16x128xf32>
    %47 = math.exp %46 : vector<16x128xf32>
    %cst_39 = arith.constant 1.000000e+00 : f32
    %48 = vector.broadcast %cst_39 : f32 to vector<16x128xf32>
    %49 = arith.addf %48, %47 : vector<16x128xf32>
    %50 = arith.divf %48, %49 : vector<16x128xf32>
    %51 = arith.mulf %44, %50 : vector<16x128xf32>
    %52 = arith.addf %51, %10 : vector<16x128xf32>
    %cst_40 = arith.constant 0.707106769 : f32
    %53 = vector.broadcast %cst_40 : f32 to vector<16x128xf32>
    %54 = arith.mulf %52, %53 : vector<16x128xf32>
    %c8_41 = arith.constant 8 : index
    %c0_42 = arith.constant 0 : index
    %55 = vector.load %arg20[%c8_41, %c0_42] : memref<24x128xf32, #tpu.memory_space<vmem>>, vector<16x128xf32>
    tpu.vector_store %arg20[%c8_41, %c0_42], %54 {strides = array<i32>} : memref<24x128xf32, #tpu.memory_space<vmem>>, vector<16x128xf32>,
    %c1_43 = arith.constant 1 : index
    %c4_44 = arith.constant 4 : index
    %c0_45 = arith.constant 0 : index
    %c0_46 = arith.constant 0 : index
    %56 = vector.load %arg7[%c1_43, %c4_44, %c0_45, %c0_46] : memref<2x5x128x256xbf16, #tpu.memory_space<vmem>>, vector<1x1x128x256xbf16>
    %57 = vector.shape_cast %56 : vector<1x1x128x256xbf16> to vector<128x256xbf16>
    %58 = arith.truncf %54 : vector<16x128xf32> to vector<16x128xbf16>
    %cst_47 = arith.constant dense<0.000000e+00> : vector<16x256xf32>
    %59 = tpu.matmul %58, %57, %cst_47 {dimension_numbers = #tpu.dot_dimension_numbers<[1], [0], [0], [1], [0, 0, 1, 1], [], []>} : vector<16x128xbf16>, vector<128x256xbf16>, vector<16x256xf32> -> vector<16x256xf32>
    %c1_48 = arith.constant 1 : index
    %c0_49 = arith.constant 0 : index
    %c0_50 = arith.constant 0 : index
    %60 = vector.load %arg8[%c1_48, %c0_49, %c0_50] : memref<2x1x256xf32, #tpu.memory_space<vmem>>, vector<1x1x256xf32>
    %61 = vector.shape_cast %60 : vector<1x1x256xf32> to vector<1x256xf32>
    %62 = vector.broadcast %61 : vector<1x256xf32> to vector<16x256xf32>
    %63 = arith.addf %59, %62 : vector<16x256xf32>
    %c4_51 = arith.constant 4 : index
    %c0_52 = arith.constant 0 : index
    %64 = vector.load %arg20[%c4_51, %c0_52] : memref<24x128xf32, #tpu.memory_space<vmem>>, vector<16x128xf32>
    %c1_53 = arith.constant 1 : index
    %c0_54 = arith.constant 0 : index
    %c0_55 = arith.constant 0 : index
    %c0_56 = arith.constant 0 : index
    %65 = vector.load %arg7[%c1_53, %c0_54, %c0_55, %c0_56] : memref<2x5x128x256xbf16, #tpu.memory_space<vmem>>, vector<1x1x128x256xbf16>
    %66 = vector.shape_cast %65 : vector<1x1x128x256xbf16> to vector<128x256xbf16>
    %67 = arith.truncf %64 : vector<16x128xf32> to vector<16x128xbf16>
    %cst_57 = arith.constant dense<0.000000e+00> : vector<16x256xf32>
    %68 = tpu.matmul %67, %66, %cst_57 {dimension_numbers = #tpu.dot_dimension_numbers<[1], [0], [0], [1], [0, 0, 1, 1], [], []>} : vector<16x128xbf16>, vector<128x256xbf16>, vector<16x256xf32> -> vector<16x256xf32>
    %69 = arith.addf %63, %68 : vector<16x256xf32>
    %c5_58 = arith.constant 5 : index
    %c0_59 = arith.constant 0 : index
    %70 = vector.load %arg20[%c5_58, %c0_59] : memref<24x128xf32, #tpu.memory_space<vmem>>, vector<16x128xf32>
    %c1_60 = arith.constant 1 : index
    %c1_61 = arith.constant 1 : index
    %c0_62 = arith.constant 0 : index
    %c0_63 = arith.constant 0 : index
    %71 = vector.load %arg7[%c1_60, %c1_61, %c0_62, %c0_63] : memref<2x5x128x256xbf16, #tpu.memory_space<vmem>>, vector<1x1x128x256xbf16>
    %72 = vector.shape_cast %71 : vector<1x1x128x256xbf16> to vector<128x256xbf16>
    %73 = arith.truncf %70 : vector<16x128xf32> to vector<16x128xbf16>
    %cst_64 = arith.constant dense<0.000000e+00> : vector<16x256xf32>
    %74 = tpu.matmul %73, %72, %cst_64 {dimension_numbers = #tpu.dot_dimension_numbers<[1], [0], [0], [1], [0, 0, 1, 1], [], []>} : vector<16x128xbf16>, vector<128x256xbf16>, vector<16x256xf32> -> vector<16x256xf32>
    %75 = arith.addf %69, %74 : vector<16x256xf32>
    %c6_65 = arith.constant 6 : index
    %c0_66 = arith.constant 0 : index
    %76 = vector.load %arg20[%c6_65, %c0_66] : memref<24x128xf32, #tpu.memory_space<vmem>>, vector<16x128xf32>
    %c1_67 = arith.constant 1 : index
    %c2_68 = arith.constant 2 : index
    %c0_69 = arith.constant 0 : index
    %c0_70 = arith.constant 0 : index
    %77 = vector.load %arg7[%c1_67, %c2_68, %c0_69, %c0_70] : memref<2x5x128x256xbf16, #tpu.memory_space<vmem>>, vector<1x1x128x256xbf16>
    %78 = vector.shape_cast %77 : vector<1x1x128x256xbf16> to vector<128x256xbf16>
    %79 = arith.truncf %76 : vector<16x128xf32> to vector<16x128xbf16>
    %cst_71 = arith.constant dense<0.000000e+00> : vector<16x256xf32>
    %80 = tpu.matmul %79, %78, %cst_71 {dimension_numbers = #tpu.dot_dimension_numbers<[1], [0], [0], [1], [0, 0, 1, 1], [], []>} : vector<16x128xbf16>, vector<128x256xbf16>, vector<16x256xf32> -> vector<16x256xf32>
    %81 = arith.addf %75, %80 : vector<16x256xf32>
    %c7_72 = arith.constant 7 : index
    %c0_73 = arith.constant 0 : index
    %82 = vector.load %arg20[%c7_72, %c0_73] : memref<24x128xf32, #tpu.memory_space<vmem>>, vector<16x128xf32>
    %c1_74 = arith.constant 1 : index
    %c3_75 = arith.constant 3 : index
    %c0_76 = arith.constant 0 : index
    %c0_77 = arith.constant 0 : index
    %83 = vector.load %arg7[%c1_74, %c3_75, %c0_76, %c0_77] : memref<2x5x128x256xbf16, #tpu.memory_space<vmem>>, vector<1x1x128x256xbf16>
    %84 = vector.shape_cast %83 : vector<1x1x128x256xbf16> to vector<128x256xbf16>
    %85 = arith.truncf %82 : vector<16x128xf32> to vector<16x128xbf16>
    %cst_78 = arith.constant dense<0.000000e+00> : vector<16x256xf32>
    %86 = tpu.matmul %85, %84, %cst_78 {dimension_numbers = #tpu.dot_dimension_numbers<[1], [0], [0], [1], [0, 0, 1, 1], [], []>} : vector<16x128xbf16>, vector<128x256xbf16>, vector<16x256xf32> -> vector<16x256xf32>
    %87 = arith.addf %81, %86 : vector<16x256xf32>
    %88 = vector.extract_strided_slice %87 {offsets = [0, 0], sizes = [16, 128], strides = [1, 1]} : vector<16x256xf32> to vector<16x128xf32>
    %89 = vector.extract_strided_slice %87 {offsets = [0, 128], sizes = [16, 128], strides = [1, 1]} : vector<16x256xf32> to vector<16x128xf32>
    %90 = arith.negf %89 : vector<16x128xf32>
    %91 = math.exp %90 : vector<16x128xf32>
    %cst_79 = arith.constant 1.000000e+00 : f32
    %92 = vector.broadcast %cst_79 : f32 to vector<16x128xf32>
    %93 = arith.addf %92, %91 : vector<16x128xf32>
    %94 = arith.divf %92, %93 : vector<16x128xf32>
    %95 = arith.mulf %88, %94 : vector<16x128xf32>
    %96 = arith.addf %95, %54 : vector<16x128xf32>
    %cst_80 = arith.constant 0.707106769 : f32
    %97 = vector.broadcast %cst_80 : f32 to vector<16x128xf32>
    %98 = arith.mulf %96, %97 : vector<16x128xf32>
    %c0_81 = arith.constant 0 : index
    %c0_82 = arith.constant 0 : index
    %99 = vector.load %arg2[%c0_81, %c0_82] : memref<16x128xf32, #tpu.memory_space<vmem>>, vector<16x128xf32>
    %100 = tpu.iota {dimensions = array<i32: 1>} : vector<16x128xi32>
    %c8_i32 = arith.constant 8 : i32
    %101 = vector.broadcast %c8_i32 : i32 to vector<16x128xi32>
    %102 = arith.cmpi slt, %100, %101 : vector<16x128xi32>
    %c8_83 = arith.constant 8 : index
    %c0_84 = arith.constant 0 : index
    %103 = vector.load %arg20[%c8_83, %c0_84] : memref<24x128xf32, #tpu.memory_space<vmem>>, vector<16x128xf32>
    tpu.vector_store %arg20[%c8_83, %c0_84], %98 {strides = array<i32>} : memref<24x128xf32, #tpu.memory_space<vmem>>, vector<16x128xf32>,
    %c0_85 = arith.constant 0 : index
    %c4_86 = arith.constant 4 : index
    %c0_87 = arith.constant 0 : index
    %c0_88 = arith.constant 0 : index
    %104 = vector.load %arg9[%c0_85, %c4_86, %c0_87, %c0_88] : memref<2x5x128x256xbf16, #tpu.memory_space<vmem>>, vector<1x1x128x256xbf16>
    %105 = vector.shape_cast %104 : vector<1x1x128x256xbf16> to vector<128x256xbf16>
    %106 = arith.truncf %98 : vector<16x128xf32> to vector<16x128xbf16>
    %cst_89 = arith.constant dense<0.000000e+00> : vector<16x256xf32>
    %107 = tpu.matmul %106, %105, %cst_89 {dimension_numbers = #tpu.dot_dimension_numbers<[1], [0], [0], [1], [0, 0, 1, 1], [], []>} : vector<16x128xbf16>, vector<128x256xbf16>, vector<16x256xf32> -> vector<16x256xf32>
    %c0_90 = arith.constant 0 : index
    %c0_91 = arith.constant 0 : index
    %c0_92 = arith.constant 0 : index
    %108 = vector.load %arg10[%c0_90, %c0_91, %c0_92] : memref<2x1x256xf32, #tpu.memory_space<vmem>>, vector<1x1x256xf32>
    %109 = vector.shape_cast %108 : vector<1x1x256xf32> to vector<1x256xf32>
    %110 = vector.broadcast %109 : vector<1x256xf32> to vector<16x256xf32>
    %111 = arith.addf %107, %110 : vector<16x256xf32>
    %c4_93 = arith.constant 4 : index
    %c0_94 = arith.constant 0 : index
    %112 = vector.load %arg20[%c4_93, %c0_94] : memref<24x128xf32, #tpu.memory_space<vmem>>, vector<16x128xf32>
    %c0_95 = arith.constant 0 : index
    %c0_96 = arith.constant 0 : index
    %c0_97 = arith.constant 0 : index
    %c0_98 = arith.constant 0 : index
    %113 = vector.load %arg9[%c0_95, %c0_96, %c0_97, %c0_98] : memref<2x5x128x256xbf16, #tpu.memory_space<vmem>>, vector<1x1x128x256xbf16>
    %114 = vector.shape_cast %113 : vector<1x1x128x256xbf16> to vector<128x256xbf16>
    %115 = arith.truncf %112 : vector<16x128xf32> to vector<16x128xbf16>
    %cst_99 = arith.constant dense<0.000000e+00> : vector<16x256xf32>
    %116 = tpu.matmul %115, %114, %cst_99 {dimension_numbers = #tpu.dot_dimension_numbers<[1], [0], [0], [1], [0, 0, 1, 1], [], []>} : vector<16x128xbf16>, vector<128x256xbf16>, vector<16x256xf32> -> vector<16x256xf32>
    %117 = arith.addf %111, %116 : vector<16x256xf32>
    %c5_100 = arith.constant 5 : index
    %c0_101 = arith.constant 0 : index
    %118 = vector.load %arg20[%c5_100, %c0_101] : memref<24x128xf32, #tpu.memory_space<vmem>>, vector<16x128xf32>
    %c0_102 = arith.constant 0 : index
    %c1_103 = arith.constant 1 : index
    %c0_104 = arith.constant 0 : index
    %c0_105 = arith.constant 0 : index
    %119 = vector.load %arg9[%c0_102, %c1_103, %c0_104, %c0_105] : memref<2x5x128x256xbf16, #tpu.memory_space<vmem>>, vector<1x1x128x256xbf16>
    %120 = vector.shape_cast %119 : vector<1x1x128x256xbf16> to vector<128x256xbf16>
    %121 = arith.truncf %118 : vector<16x128xf32> to vector<16x128xbf16>
    %cst_106 = arith.constant dense<0.000000e+00> : vector<16x256xf32>
    %122 = tpu.matmul %121, %120, %cst_106 {dimension_numbers = #tpu.dot_dimension_numbers<[1], [0], [0], [1], [0, 0, 1, 1], [], []>} : vector<16x128xbf16>, vector<128x256xbf16>, vector<16x256xf32> -> vector<16x256xf32>
    %123 = arith.addf %117, %122 : vector<16x256xf32>
    %c6_107 = arith.constant 6 : index
    %c0_108 = arith.constant 0 : index
    %124 = vector.load %arg20[%c6_107, %c0_108] : memref<24x128xf32, #tpu.memory_space<vmem>>, vector<16x128xf32>
    %c0_109 = arith.constant 0 : index
    %c2_110 = arith.constant 2 : index
    %c0_111 = arith.constant 0 : index
    %c0_112 = arith.constant 0 : index
    %125 = vector.load %arg9[%c0_109, %c2_110, %c0_111, %c0_112] : memref<2x5x128x256xbf16, #tpu.memory_space<vmem>>, vector<1x1x128x256xbf16>
    %126 = vector.shape_cast %125 : vector<1x1x128x256xbf16> to vector<128x256xbf16>
    %127 = arith.truncf %124 : vector<16x128xf32> to vector<16x128xbf16>
    %cst_113 = arith.constant dense<0.000000e+00> : vector<16x256xf32>
    %128 = tpu.matmul %127, %126, %cst_113 {dimension_numbers = #tpu.dot_dimension_numbers<[1], [0], [0], [1], [0, 0, 1, 1], [], []>} : vector<16x128xbf16>, vector<128x256xbf16>, vector<16x256xf32> -> vector<16x256xf32>
    %129 = arith.addf %123, %128 : vector<16x256xf32>
    %c7_114 = arith.constant 7 : index
    %c0_115 = arith.constant 0 : index
    %130 = vector.load %arg20[%c7_114, %c0_115] : memref<24x128xf32, #tpu.memory_space<vmem>>, vector<16x128xf32>
    %c0_116 = arith.constant 0 : index
    %c3_117 = arith.constant 3 : index
    %c0_118 = arith.constant 0 : index
    %c0_119 = arith.constant 0 : index
    %131 = vector.load %arg9[%c0_116, %c3_117, %c0_118, %c0_119] : memref<2x5x128x256xbf16, #tpu.memory_space<vmem>>, vector<1x1x128x256xbf16>
    %132 = vector.shape_cast %131 : vector<1x1x128x256xbf16> to vector<128x256xbf16>
    %133 = arith.truncf %130 : vector<16x128xf32> to vector<16x128xbf16>
    %cst_120 = arith.constant dense<0.000000e+00> : vector<16x256xf32>
    %134 = tpu.matmul %133, %132, %cst_120 {dimension_numbers = #tpu.dot_dimension_numbers<[1], [0], [0], [1], [0, 0, 1, 1], [], []>} : vector<16x128xbf16>, vector<128x256xbf16>, vector<16x256xf32> -> vector<16x256xf32>
    %135 = arith.addf %129, %134 : vector<16x256xf32>
    %136 = vector.extract_strided_slice %135 {offsets = [0, 0], sizes = [16, 128], strides = [1, 1]} : vector<16x256xf32> to vector<16x128xf32>
    %137 = vector.extract_strided_slice %135 {offsets = [0, 128], sizes = [16, 128], strides = [1, 1]} : vector<16x256xf32> to vector<16x128xf32>
    %138 = arith.negf %137 : vector<16x128xf32>
    %139 = math.exp %138 : vector<16x128xf32>
    %cst_121 = arith.constant 1.000000e+00 : f32
    %140 = vector.broadcast %cst_121 : f32 to vector<16x128xf32>
    %141 = arith.addf %140, %139 : vector<16x128xf32>
    %142 = arith.divf %140, %141 : vector<16x128xf32>
    %143 = arith.mulf %136, %142 : vector<16x128xf32>
    %144 = arith.addf %143, %99 : vector<16x128xf32>
    %c0_122 = arith.constant 0 : index
    %c0_123 = arith.constant 0 : index
    %c0_124 = arith.constant 0 : index
    %145 = vector.load %arg11[%c0_122, %c0_123, %c0_124] : memref<2x128x128xbf16, #tpu.memory_space<vmem>>, vector<1x128x128xbf16>
    %146 = vector.shape_cast %145 : vector<1x128x128xbf16> to vector<128x128xbf16>
    %147 = arith.truncf %144 : vector<16x128xf32> to vector<16x128xbf16>
    %cst_125 = arith.constant dense<0.000000e+00> : vector<16x128xf32>
    %148 = tpu.matmul %147, %146, %cst_125 {dimension_numbers = #tpu.dot_dimension_numbers<[1], [0], [0], [1], [0, 0, 1, 1], [], []>} : vector<16x128xbf16>, vector<128x128xbf16>, vector<16x128xf32> -> vector<16x128xf32>
    %c0_126 = arith.constant 0 : index
    %c0_127 = arith.constant 0 : index
    %c0_128 = arith.constant 0 : index
    %149 = vector.load %arg12[%c0_126, %c0_127, %c0_128] : memref<2x1x128xf32, #tpu.memory_space<vmem>>, vector<1x1x128xf32>
    %150 = vector.shape_cast %149 : vector<1x1x128xf32> to vector<1x128xf32>
    %151 = vector.broadcast %150 : vector<1x128xf32> to vector<16x128xf32>
    %152 = arith.addf %148, %151 : vector<16x128xf32>
    %c0_129 = arith.constant 0 : index
    %c0_130 = arith.constant 0 : index
    %c0_131 = arith.constant 0 : index
    %c0_132 = arith.constant 0 : index
    %153 = vector.load %arg3[%c0_129, %c0_130, %c0_131, %c0_132] : memref<2x1x128x128xbf16, #tpu.memory_space<vmem>>, vector<1x1x128x128xbf16>
    %154 = vector.shape_cast %153 : vector<1x1x128x128xbf16> to vector<128x128xbf16>
    %155 = arith.truncf %152 : vector<16x128xf32> to vector<16x128xbf16>
    %cst_133 = arith.constant dense<0.000000e+00> : vector<16x128xf32>
    %156 = tpu.matmul %155, %154, %cst_133 {dimension_numbers = #tpu.dot_dimension_numbers<[1], [0], [0], [1], [0, 0, 1, 1], [], []>} : vector<16x128xbf16>, vector<128x128xbf16>, vector<16x128xf32> -> vector<16x128xf32>
    %cst_134 = arith.constant -1.000000e+30 : f32
    %157 = vector.broadcast %cst_134 : f32 to vector<16x128xf32>
    %158 = arith.select %102, %156, %157 : vector<16x128xi1>, vector<16x128xf32>
    %cst_135 = arith.constant dense<0xFF800000> : vector<16xf32>
    %159 = vector.multi_reduction <maximumf>, %158, %cst_135 [1] : vector<16x128xf32> to vector<16xf32>
    %160 = vector.shape_cast %159 : vector<16xf32> to vector<16x1xf32>
    %161 = vector.broadcast %160 : vector<16x1xf32> to vector<16x128xf32>
    %162 = arith.subf %158, %161 : vector<16x128xf32>
    %163 = math.exp %162 : vector<16x128xf32>
    %cst_136 = arith.constant dense<0.000000e+00> : vector<16xf32>
    %164 = vector.multi_reduction <add>, %163, %cst_136 [1] : vector<16x128xf32> to vector<16xf32>
    %165 = vector.shape_cast %164 : vector<16xf32> to vector<16x1xf32>
    %166 = tpu.reciprocal %165 {approx = true} : vector<16x1xf32> -> vector<16x1xf32>
    %167 = vector.broadcast %166 : vector<16x1xf32> to vector<16x128xf32>
    %168 = arith.mulf %163, %167 : vector<16x128xf32>
    %169 = arith.truncf %168 : vector<16x128xf32> to vector<16x128xbf16>
    %c0_137 = arith.constant 0 : index
    %c0_138 = arith.constant 0 : index
    %c0_139 = arith.constant 0 : index
    %c0_140 = arith.constant 0 : index
    %170 = vector.load %arg19[%c0_137, %c0_138, %c0_139, %c0_140] : memref<1x2x16x128xbf16, #tpu.memory_space<vmem>>, vector<1x1x16x128xbf16>
    %171 = vector.shape_cast %170 : vector<1x1x16x128xbf16> to vector<16x128xbf16>
    %172 = vector.shape_cast %169 : vector<16x128xbf16> to vector<1x1x16x128xbf16>
    tpu.vector_store %arg19[%c0_137, %c0_138, %c0_139, %c0_140], %172 {strides = array<i32>} : memref<1x2x16x128xbf16, #tpu.memory_space<vmem>>, vector<1x1x16x128xbf16>,
    %c0_141 = arith.constant 0 : index
    %c0_142 = arith.constant 0 : index
    %c0_143 = arith.constant 0 : index
    %c0_144 = arith.constant 0 : index
    %173 = vector.load %arg4[%c0_141, %c0_142, %c0_143, %c0_144] : memref<2x1x128x128xbf16, #tpu.memory_space<vmem>>, vector<1x1x128x128xbf16>
    %174 = vector.shape_cast %173 : vector<1x1x128x128xbf16> to vector<128x128xbf16>
    %175 = arith.truncf %168 : vector<16x128xf32> to vector<16x128xbf16>
    %cst_145 = arith.constant dense<0.000000e+00> : vector<16x128xf32>
    %176 = tpu.matmul %175, %174, %cst_145 {dimension_numbers = #tpu.dot_dimension_numbers<[1], [0], [0], [1], [0, 0, 1, 1], [], []>} : vector<16x128xbf16>, vector<128x128xbf16>, vector<16x128xf32> -> vector<16x128xf32>
    %c0_146 = arith.constant 0 : index
    %c0_147 = arith.constant 0 : index
    %c0_148 = arith.constant 0 : index
    %177 = vector.load %arg13[%c0_146, %c0_147, %c0_148] : memref<2x128x128xbf16, #tpu.memory_space<vmem>>, vector<1x128x128xbf16>
    %178 = vector.shape_cast %177 : vector<1x128x128xbf16> to vector<128x128xbf16>
    %179 = arith.truncf %176 : vector<16x128xf32> to vector<16x128xbf16>
    %cst_149 = arith.constant dense<0.000000e+00> : vector<16x128xf32>
    %180 = tpu.matmul %179, %178, %cst_149 {dimension_numbers = #tpu.dot_dimension_numbers<[1], [0], [0], [1], [0, 0, 1, 1], [], []>} : vector<16x128xbf16>, vector<128x128xbf16>, vector<16x128xf32> -> vector<16x128xf32>
    %c0_150 = arith.constant 0 : index
    %c0_151 = arith.constant 0 : index
    %c0_152 = arith.constant 0 : index
    %181 = vector.load %arg14[%c0_150, %c0_151, %c0_152] : memref<2x1x128xf32, #tpu.memory_space<vmem>>, vector<1x1x128xf32>
    %182 = vector.shape_cast %181 : vector<1x1x128xf32> to vector<1x128xf32>
    %183 = vector.broadcast %182 : vector<1x128xf32> to vector<16x128xf32>
    %184 = arith.addf %180, %183 : vector<16x128xf32>
    %185 = arith.addf %184, %144 : vector<16x128xf32>
    %cst_153 = arith.constant 0.707106769 : f32
    %186 = vector.broadcast %cst_153 : f32 to vector<16x128xf32>
    %187 = arith.mulf %185, %186 : vector<16x128xf32>
    %188 = arith.addf %187, %98 : vector<16x128xf32>
    %cst_154 = arith.constant 0.707106769 : f32
    %189 = vector.broadcast %cst_154 : f32 to vector<16x128xf32>
    %190 = arith.mulf %188, %189 : vector<16x128xf32>
    %c8_155 = arith.constant 8 : index
    %c0_156 = arith.constant 0 : index
    %191 = vector.load %arg20[%c8_155, %c0_156] : memref<24x128xf32, #tpu.memory_space<vmem>>, vector<16x128xf32>
    tpu.vector_store %arg20[%c8_155, %c0_156], %190 {strides = array<i32>} : memref<24x128xf32, #tpu.memory_space<vmem>>, vector<16x128xf32>,
    %c1_157 = arith.constant 1 : index
    %c4_158 = arith.constant 4 : index
    %c0_159 = arith.constant 0 : index
    %c0_160 = arith.constant 0 : index
    %192 = vector.load %arg9[%c1_157, %c4_158, %c0_159, %c0_160] : memref<2x5x128x256xbf16, #tpu.memory_space<vmem>>, vector<1x1x128x256xbf16>
    %193 = vector.shape_cast %192 : vector<1x1x128x256xbf16> to vector<128x256xbf16>
    %194 = arith.truncf %190 : vector<16x128xf32> to vector<16x128xbf16>
    %cst_161 = arith.constant dense<0.000000e+00> : vector<16x256xf32>
    %195 = tpu.matmul %194, %193, %cst_161 {dimension_numbers = #tpu.dot_dimension_numbers<[1], [0], [0], [1], [0, 0, 1, 1], [], []>} : vector<16x128xbf16>, vector<128x256xbf16>, vector<16x256xf32> -> vector<16x256xf32>
    %c1_162 = arith.constant 1 : index
    %c0_163 = arith.constant 0 : index
    %c0_164 = arith.constant 0 : index
    %196 = vector.load %arg10[%c1_162, %c0_163, %c0_164] : memref<2x1x256xf32, #tpu.memory_space<vmem>>, vector<1x1x256xf32>
    %197 = vector.shape_cast %196 : vector<1x1x256xf32> to vector<1x256xf32>
    %198 = vector.broadcast %197 : vector<1x256xf32> to vector<16x256xf32>
    %199 = arith.addf %195, %198 : vector<16x256xf32>
    %c4_165 = arith.constant 4 : index
    %c0_166 = arith.constant 0 : index
    %200 = vector.load %arg20[%c4_165, %c0_166] : memref<24x128xf32, #tpu.memory_space<vmem>>, vector<16x128xf32>
    %c1_167 = arith.constant 1 : index
    %c0_168 = arith.constant 0 : index
    %c0_169 = arith.constant 0 : index
    %c0_170 = arith.constant 0 : index
    %201 = vector.load %arg9[%c1_167, %c0_168, %c0_169, %c0_170] : memref<2x5x128x256xbf16, #tpu.memory_space<vmem>>, vector<1x1x128x256xbf16>
    %202 = vector.shape_cast %201 : vector<1x1x128x256xbf16> to vector<128x256xbf16>
    %203 = arith.truncf %200 : vector<16x128xf32> to vector<16x128xbf16>
    %cst_171 = arith.constant dense<0.000000e+00> : vector<16x256xf32>
    %204 = tpu.matmul %203, %202, %cst_171 {dimension_numbers = #tpu.dot_dimension_numbers<[1], [0], [0], [1], [0, 0, 1, 1], [], []>} : vector<16x128xbf16>, vector<128x256xbf16>, vector<16x256xf32> -> vector<16x256xf32>
    %205 = arith.addf %199, %204 : vector<16x256xf32>
    %c5_172 = arith.constant 5 : index
    %c0_173 = arith.constant 0 : index
    %206 = vector.load %arg20[%c5_172, %c0_173] : memref<24x128xf32, #tpu.memory_space<vmem>>, vector<16x128xf32>
    %c1_174 = arith.constant 1 : index
    %c1_175 = arith.constant 1 : index
    %c0_176 = arith.constant 0 : index
    %c0_177 = arith.constant 0 : index
    %207 = vector.load %arg9[%c1_174, %c1_175, %c0_176, %c0_177] : memref<2x5x128x256xbf16, #tpu.memory_space<vmem>>, vector<1x1x128x256xbf16>
    %208 = vector.shape_cast %207 : vector<1x1x128x256xbf16> to vector<128x256xbf16>
    %209 = arith.truncf %206 : vector<16x128xf32> to vector<16x128xbf16>
    %cst_178 = arith.constant dense<0.000000e+00> : vector<16x256xf32>
    %210 = tpu.matmul %209, %208, %cst_178 {dimension_numbers = #tpu.dot_dimension_numbers<[1], [0], [0], [1], [0, 0, 1, 1], [], []>} : vector<16x128xbf16>, vector<128x256xbf16>, vector<16x256xf32> -> vector<16x256xf32>
    %211 = arith.addf %205, %210 : vector<16x256xf32>
    %c6_179 = arith.constant 6 : index
    %c0_180 = arith.constant 0 : index
    %212 = vector.load %arg20[%c6_179, %c0_180] : memref<24x128xf32, #tpu.memory_space<vmem>>, vector<16x128xf32>
    %c1_181 = arith.constant 1 : index
    %c2_182 = arith.constant 2 : index
    %c0_183 = arith.constant 0 : index
    %c0_184 = arith.constant 0 : index
    %213 = vector.load %arg9[%c1_181, %c2_182, %c0_183, %c0_184] : memref<2x5x128x256xbf16, #tpu.memory_space<vmem>>, vector<1x1x128x256xbf16>
    %214 = vector.shape_cast %213 : vector<1x1x128x256xbf16> to vector<128x256xbf16>
    %215 = arith.truncf %212 : vector<16x128xf32> to vector<16x128xbf16>
    %cst_185 = arith.constant dense<0.000000e+00> : vector<16x256xf32>
    %216 = tpu.matmul %215, %214, %cst_185 {dimension_numbers = #tpu.dot_dimension_numbers<[1], [0], [0], [1], [0, 0, 1, 1], [], []>} : vector<16x128xbf16>, vector<128x256xbf16>, vector<16x256xf32> -> vector<16x256xf32>
    %217 = arith.addf %211, %216 : vector<16x256xf32>
    %c7_186 = arith.constant 7 : index
    %c0_187 = arith.constant 0 : index
    %218 = vector.load %arg20[%c7_186, %c0_187] : memref<24x128xf32, #tpu.memory_space<vmem>>, vector<16x128xf32>
    %c1_188 = arith.constant 1 : index
    %c3_189 = arith.constant 3 : index
    %c0_190 = arith.constant 0 : index
    %c0_191 = arith.constant 0 : index
    %219 = vector.load %arg9[%c1_188, %c3_189, %c0_190, %c0_191] : memref<2x5x128x256xbf16, #tpu.memory_space<vmem>>, vector<1x1x128x256xbf16>
    %220 = vector.shape_cast %219 : vector<1x1x128x256xbf16> to vector<128x256xbf16>
    %221 = arith.truncf %218 : vector<16x128xf32> to vector<16x128xbf16>
    %cst_192 = arith.constant dense<0.000000e+00> : vector<16x256xf32>
    %222 = tpu.matmul %221, %220, %cst_192 {dimension_numbers = #tpu.dot_dimension_numbers<[1], [0], [0], [1], [0, 0, 1, 1], [], []>} : vector<16x128xbf16>, vector<128x256xbf16>, vector<16x256xf32> -> vector<16x256xf32>
    %223 = arith.addf %217, %222 : vector<16x256xf32>
    %224 = vector.extract_strided_slice %223 {offsets = [0, 0], sizes = [16, 128], strides = [1, 1]} : vector<16x256xf32> to vector<16x128xf32>
    %225 = vector.extract_strided_slice %223 {offsets = [0, 128], sizes = [16, 128], strides = [1, 1]} : vector<16x256xf32> to vector<16x128xf32>
    %226 = arith.negf %225 : vector<16x128xf32>
    %227 = math.exp %226 : vector<16x128xf32>
    %cst_193 = arith.constant 1.000000e+00 : f32
    %228 = vector.broadcast %cst_193 : f32 to vector<16x128xf32>
    %229 = arith.addf %228, %227 : vector<16x128xf32>
    %230 = arith.divf %228, %229 : vector<16x128xf32>
    %231 = arith.mulf %224, %230 : vector<16x128xf32>
    %232 = arith.addf %231, %99 : vector<16x128xf32>
    %c1_194 = arith.constant 1 : index
    %c0_195 = arith.constant 0 : index
    %c0_196 = arith.constant 0 : index
    %233 = vector.load %arg11[%c1_194, %c0_195, %c0_196] : memref<2x128x128xbf16, #tpu.memory_space<vmem>>, vector<1x128x128xbf16>
    %234 = vector.shape_cast %233 : vector<1x128x128xbf16> to vector<128x128xbf16>
    %235 = arith.truncf %232 : vector<16x128xf32> to vector<16x128xbf16>
    %cst_197 = arith.constant dense<0.000000e+00> : vector<16x128xf32>
    %236 = tpu.matmul %235, %234, %cst_197 {dimension_numbers = #tpu.dot_dimension_numbers<[1], [0], [0], [1], [0, 0, 1, 1], [], []>} : vector<16x128xbf16>, vector<128x128xbf16>, vector<16x128xf32> -> vector<16x128xf32>
    %c1_198 = arith.constant 1 : index
    %c0_199 = arith.constant 0 : index
    %c0_200 = arith.constant 0 : index
    %237 = vector.load %arg12[%c1_198, %c0_199, %c0_200] : memref<2x1x128xf32, #tpu.memory_space<vmem>>, vector<1x1x128xf32>
    %238 = vector.shape_cast %237 : vector<1x1x128xf32> to vector<1x128xf32>
    %239 = vector.broadcast %238 : vector<1x128xf32> to vector<16x128xf32>
    %240 = arith.addf %236, %239 : vector<16x128xf32>
    %c1_201 = arith.constant 1 : index
    %c0_202 = arith.constant 0 : index
    %c0_203 = arith.constant 0 : index
    %c0_204 = arith.constant 0 : index
    %241 = vector.load %arg3[%c1_201, %c0_202, %c0_203, %c0_204] : memref<2x1x128x128xbf16, #tpu.memory_space<vmem>>, vector<1x1x128x128xbf16>
    %242 = vector.shape_cast %241 : vector<1x1x128x128xbf16> to vector<128x128xbf16>
    %243 = arith.truncf %240 : vector<16x128xf32> to vector<16x128xbf16>
    %cst_205 = arith.constant dense<0.000000e+00> : vector<16x128xf32>
    %244 = tpu.matmul %243, %242, %cst_205 {dimension_numbers = #tpu.dot_dimension_numbers<[1], [0], [0], [1], [0, 0, 1, 1], [], []>} : vector<16x128xbf16>, vector<128x128xbf16>, vector<16x128xf32> -> vector<16x128xf32>
    %cst_206 = arith.constant -1.000000e+30 : f32
    %245 = vector.broadcast %cst_206 : f32 to vector<16x128xf32>
    %246 = arith.select %102, %244, %245 : vector<16x128xi1>, vector<16x128xf32>
    %cst_207 = arith.constant dense<0xFF800000> : vector<16xf32>
    %247 = vector.multi_reduction <maximumf>, %246, %cst_207 [1] : vector<16x128xf32> to vector<16xf32>
    %248 = vector.shape_cast %247 : vector<16xf32> to vector<16x1xf32>
    %249 = vector.broadcast %248 : vector<16x1xf32> to vector<16x128xf32>
    %250 = arith.subf %246, %249 : vector<16x128xf32>
    %251 = math.exp %250 : vector<16x128xf32>
    %cst_208 = arith.constant dense<0.000000e+00> : vector<16xf32>
    %252 = vector.multi_reduction <add>, %251, %cst_208 [1] : vector<16x128xf32> to vector<16xf32>
    %253 = vector.shape_cast %252 : vector<16xf32> to vector<16x1xf32>
    %254 = tpu.reciprocal %253 {approx = true} : vector<16x1xf32> -> vector<16x1xf32>
    %255 = vector.broadcast %254 : vector<16x1xf32> to vector<16x128xf32>
    %256 = arith.mulf %251, %255 : vector<16x128xf32>
    %257 = arith.truncf %256 : vector<16x128xf32> to vector<16x128xbf16>
    %c0_209 = arith.constant 0 : index
    %c1_210 = arith.constant 1 : index
    %c0_211 = arith.constant 0 : index
    %c0_212 = arith.constant 0 : index
    %258 = vector.load %arg19[%c0_209, %c1_210, %c0_211, %c0_212] : memref<1x2x16x128xbf16, #tpu.memory_space<vmem>>, vector<1x1x16x128xbf16>
    %259 = vector.shape_cast %258 : vector<1x1x16x128xbf16> to vector<16x128xbf16>
    %260 = vector.shape_cast %257 : vector<16x128xbf16> to vector<1x1x16x128xbf16>
    tpu.vector_store %arg19[%c0_209, %c1_210, %c0_211, %c0_212], %260 {strides = array<i32>} : memref<1x2x16x128xbf16, #tpu.memory_space<vmem>>, vector<1x1x16x128xbf16>,
    %c1_213 = arith.constant 1 : index
    %c0_214 = arith.constant 0 : index
    %c0_215 = arith.constant 0 : index
    %c0_216 = arith.constant 0 : index
    %261 = vector.load %arg4[%c1_213, %c0_214, %c0_215, %c0_216] : memref<2x1x128x128xbf16, #tpu.memory_space<vmem>>, vector<1x1x128x128xbf16>
    %262 = vector.shape_cast %261 : vector<1x1x128x128xbf16> to vector<128x128xbf16>
    %263 = arith.truncf %256 : vector<16x128xf32> to vector<16x128xbf16>
    %cst_217 = arith.constant dense<0.000000e+00> : vector<16x128xf32>
    %264 = tpu.matmul %263, %262, %cst_217 {dimension_numbers = #tpu.dot_dimension_numbers<[1], [0], [0], [1], [0, 0, 1, 1], [], []>} : vector<16x128xbf16>, vector<128x128xbf16>, vector<16x128xf32> -> vector<16x128xf32>
    %c1_218 = arith.constant 1 : index
    %c0_219 = arith.constant 0 : index
    %c0_220 = arith.constant 0 : index
    %265 = vector.load %arg13[%c1_218, %c0_219, %c0_220] : memref<2x128x128xbf16, #tpu.memory_space<vmem>>, vector<1x128x128xbf16>
    %266 = vector.shape_cast %265 : vector<1x128x128xbf16> to vector<128x128xbf16>
    %267 = arith.truncf %264 : vector<16x128xf32> to vector<16x128xbf16>
    %cst_221 = arith.constant dense<0.000000e+00> : vector<16x128xf32>
    %268 = tpu.matmul %267, %266, %cst_221 {dimension_numbers = #tpu.dot_dimension_numbers<[1], [0], [0], [1], [0, 0, 1, 1], [], []>} : vector<16x128xbf16>, vector<128x128xbf16>, vector<16x128xf32> -> vector<16x128xf32>
    %c1_222 = arith.constant 1 : index
    %c0_223 = arith.constant 0 : index
    %c0_224 = arith.constant 0 : index
    %269 = vector.load %arg14[%c1_222, %c0_223, %c0_224] : memref<2x1x128xf32, #tpu.memory_space<vmem>>, vector<1x1x128xf32>
    %270 = vector.shape_cast %269 : vector<1x1x128xf32> to vector<1x128xf32>
    %271 = vector.broadcast %270 : vector<1x128xf32> to vector<16x128xf32>
    %272 = arith.addf %268, %271 : vector<16x128xf32>
    %273 = arith.addf %272, %232 : vector<16x128xf32>
    %cst_225 = arith.constant 0.707106769 : f32
    %274 = vector.broadcast %cst_225 : f32 to vector<16x128xf32>
    %275 = arith.mulf %273, %274 : vector<16x128xf32>
    %276 = arith.addf %275, %190 : vector<16x128xf32>
    %cst_226 = arith.constant 0.707106769 : f32
    %277 = vector.broadcast %cst_226 : f32 to vector<16x128xf32>
    %278 = arith.mulf %276, %277 : vector<16x128xf32>
    %c0_227 = arith.constant 0 : index
    %c0_228 = arith.constant 0 : index
    %279 = vector.load %arg17[%c0_227, %c0_228] : memref<16x128xf32, #tpu.memory_space<vmem>>, vector<16x128xf32>
    tpu.vector_store %arg17[%c0_227, %c0_228], %278 {strides = array<i32>} : memref<16x128xf32, #tpu.memory_space<vmem>>, vector<16x128xf32>,
    %c0_229 = arith.constant 0 : index
    %c0_230 = arith.constant 0 : index
    %280 = vector.load %arg15[%c0_229, %c0_230] : memref<128x128xbf16, #tpu.memory_space<vmem>>, vector<128x128xbf16>
    %281 = arith.truncf %278 : vector<16x128xf32> to vector<16x128xbf16>
    %cst_231 = arith.constant dense<0.000000e+00> : vector<16x128xf32>
    %282 = tpu.matmul %281, %280, %cst_231 {dimension_numbers = #tpu.dot_dimension_numbers<[1], [0], [0], [1], [0, 0, 1, 1], [], []>} : vector<16x128xbf16>, vector<128x128xbf16>, vector<16x128xf32> -> vector<16x128xf32>
    %c0_232 = arith.constant 0 : index
    %c0_233 = arith.constant 0 : index
    %283 = vector.load %arg16[%c0_232, %c0_233] : memref<1x128xf32, #tpu.memory_space<vmem>>, vector<1x128xf32>
    %284 = vector.broadcast %283 : vector<1x128xf32> to vector<16x128xf32>
    %285 = arith.addf %282, %284 : vector<16x128xf32>
    %286 = arith.negf %285 : vector<16x128xf32>
    %287 = math.exp %286 : vector<16x128xf32>
    %cst_234 = arith.constant 1.000000e+00 : f32
    %288 = vector.broadcast %cst_234 : f32 to vector<16x128xf32>
    %289 = arith.addf %288, %287 : vector<16x128xf32>
    %290 = arith.divf %288, %289 : vector<16x128xf32>
    %c0_235 = arith.constant 0 : index
    %c0_236 = arith.constant 0 : index
    %291 = vector.load %arg18[%c0_235, %c0_236] : memref<16x128xf32, #tpu.memory_space<vmem>>, vector<16x128xf32>
    tpu.vector_store %arg18[%c0_235, %c0_236], %290 {strides = array<i32>} : memref<16x128xf32, #tpu.memory_space<vmem>>, vector<16x128xf32>,
    return
  }
  func.func @transform_0(%arg0: i32) -> (i32, i32) {
    %c0_i32 = arith.constant 0 : i32
    %c0_i32_0 = arith.constant 0 : i32
    return %arg0, %c0_i32 : i32, i32
  }
  func.func @transform_1(%arg0: i32) -> (i32, i32) {
    %c0_i32 = arith.constant 0 : i32
    %c0_i32_0 = arith.constant 0 : i32
    return %arg0, %c0_i32 : i32, i32
  }
  func.func @transform_2(%arg0: i32) -> (i32, i32, i32, i32) {
    %c0_i32 = arith.constant 0 : i32
    %c0_i32_0 = arith.constant 0 : i32
    %c0_i32_1 = arith.constant 0 : i32
    %c0_i32_2 = arith.constant 0 : i32
    return %c0_i32, %arg0, %c0_i32_0, %c0_i32_1 : i32, i32, i32, i32
  }
  func.func @transform_3(%arg0: i32) -> (i32, i32, i32, i32) {
    %c0_i32 = arith.constant 0 : i32
    %c0_i32_0 = arith.constant 0 : i32
    %c0_i32_1 = arith.constant 0 : i32
    %c0_i32_2 = arith.constant 0 : i32
    return %c0_i32, %arg0, %c0_i32_0, %c0_i32_1 : i32, i32, i32, i32
  }
  func.func @transform_4(%arg0: i32) -> (i32, i32) {
    %c0_i32 = arith.constant 0 : i32
    %c0_i32_0 = arith.constant 0 : i32
    %c0_i32_1 = arith.constant 0 : i32
    return %c0_i32, %c0_i32_0 : i32, i32
  }
  func.func @transform_5(%arg0: i32) -> (i32, i32) {
    %c0_i32 = arith.constant 0 : i32
    %c0_i32_0 = arith.constant 0 : i32
    %c0_i32_1 = arith.constant 0 : i32
    return %c0_i32, %c0_i32_0 : i32, i32
  }
  func.func @transform_6(%arg0: i32) -> (i32, i32, i32, i32) {
    %c0_i32 = arith.constant 0 : i32
    %c0_i32_0 = arith.constant 0 : i32
    %c0_i32_1 = arith.constant 0 : i32
    %c0_i32_2 = arith.constant 0 : i32
    %c0_i32_3 = arith.constant 0 : i32
    return %c0_i32, %c0_i32_0, %c0_i32_1, %c0_i32_2 : i32, i32, i32, i32
  }
  func.func @transform_7(%arg0: i32) -> (i32, i32, i32) {
    %c0_i32 = arith.constant 0 : i32
    %c0_i32_0 = arith.constant 0 : i32
    %c0_i32_1 = arith.constant 0 : i32
    %c0_i32_2 = arith.constant 0 : i32
    return %c0_i32, %c0_i32_0, %c0_i32_1 : i32, i32, i32
  }
  func.func @transform_8(%arg0: i32) -> (i32, i32, i32, i32) {
    %c0_i32 = arith.constant 0 : i32
    %c0_i32_0 = arith.constant 0 : i32
    %c0_i32_1 = arith.constant 0 : i32
    %c0_i32_2 = arith.constant 0 : i32
    %c0_i32_3 = arith.constant 0 : i32
    return %c0_i32, %c0_i32_0, %c0_i32_1, %c0_i32_2 : i32, i32, i32, i32
  }
  func.func @transform_9(%arg0: i32) -> (i32, i32, i32) {
    %c0_i32 = arith.constant 0 : i32
    %c0_i32_0 = arith.constant 0 : i32
    %c0_i32_1 = arith.constant 0 : i32
    %c0_i32_2 = arith.constant 0 : i32
    return %c0_i32, %c0_i32_0, %c0_i32_1 : i32, i32, i32
  }
  func.func @transform_10(%arg0: i32) -> (i32, i32, i32) {
    %c0_i32 = arith.constant 0 : i32
    %c0_i32_0 = arith.constant 0 : i32
    %c0_i32_1 = arith.constant 0 : i32
    %c0_i32_2 = arith.constant 0 : i32
    return %c0_i32, %c0_i32_0, %c0_i32_1 : i32, i32, i32
  }
  func.func @transform_11(%arg0: i32) -> (i32, i32, i32) {
    %c0_i32 = arith.constant 0 : i32
    %c0_i32_0 = arith.constant 0 : i32
    %c0_i32_1 = arith.constant 0 : i32
    %c0_i32_2 = arith.constant 0 : i32
    return %c0_i32, %c0_i32_0, %c0_i32_1 : i32, i32, i32
  }
  func.func @transform_12(%arg0: i32) -> (i32, i32, i32) {
    %c0_i32 = arith.constant 0 : i32
    %c0_i32_0 = arith.constant 0 : i32
    %c0_i32_1 = arith.constant 0 : i32
    %c0_i32_2 = arith.constant 0 : i32
    return %c0_i32, %c0_i32_0, %c0_i32_1 : i32, i32, i32
  }
  func.func @transform_13(%arg0: i32) -> (i32, i32, i32) {
    %c0_i32 = arith.constant 0 : i32
    %c0_i32_0 = arith.constant 0 : i32
    %c0_i32_1 = arith.constant 0 : i32
    %c0_i32_2 = arith.constant 0 : i32
    return %c0_i32, %c0_i32_0, %c0_i32_1 : i32, i32, i32
  }
  func.func @transform_14(%arg0: i32) -> (i32, i32) {
    %c0_i32 = arith.constant 0 : i32
    %c0_i32_0 = arith.constant 0 : i32
    %c0_i32_1 = arith.constant 0 : i32
    return %c0_i32, %c0_i32_0 : i32, i32
  }
  func.func @transform_15(%arg0: i32) -> (i32, i32) {
    %c0_i32 = arith.constant 0 : i32
    %c0_i32_0 = arith.constant 0 : i32
    %c0_i32_1 = arith.constant 0 : i32
    return %c0_i32, %c0_i32_0 : i32, i32
  }
  func.func @transform_16(%arg0: i32) -> (i32, i32) {
    %c0_i32 = arith.constant 0 : i32
    %c0_i32_0 = arith.constant 0 : i32
    return %arg0, %c0_i32 : i32, i32
  }
  func.func @transform_17(%arg0: i32) -> (i32, i32) {
    %c0_i32 = arith.constant 0 : i32
    %c0_i32_0 = arith.constant 0 : i32
    return %arg0, %c0_i32 : i32, i32
  }
  func.func @transform_18(%arg0: i32) -> (i32, i32, i32, i32) {
    %c0_i32 = arith.constant 0 : i32
    %c0_i32_0 = arith.constant 0 : i32
    %c0_i32_1 = arith.constant 0 : i32
    %c0_i32_2 = arith.constant 0 : i32
    return %arg0, %c0_i32, %c0_i32_0, %c0_i32_1 : i32, i32, i32, i32
  }
}

</mosaic_0001>

<bundles_post_ra>
// kernel: decoder_forward.1
= control target key start
LH: loop header
LB: loop body
LE: loop exit
PB: predicated region body
PF: predicated region fallthrough
CT: control target
= control target key end

     0   :  { %s8024_s0 = inlined_call_operand.vmem [shape: f32[32,64], index: 0, kind: input, shape index: {}]   ;;  %s8025_s1 = inlined_call_operand.vmem [shape: f32[32,128], index: 1, kind: input, shape index: {}]   ;;  %s8026_s2 = inlined_call_operand.vmem [shape: bf16[2,2,128,128], index: 2, kind: input, shape index: {}]   ;;  %s8027_s3 = inlined_call_operand.vmem [shape: bf16[2,2,128,128], index: 3, kind: input, shape index: {}]   ;;  %s8028_s4 = inlined_call_operand.vmem [shape: bf16[64,128], index: 4, kind: input, shape index: {}]   ;;  %s8029_s5 = inlined_call_operand.vmem [shape: f32[1,128], index: 5, kind: input, shape index: {}]   ;;  %s8030_s6 = inlined_call_operand.hbm [shape: bf16[2,5,128,256], index: 6, kind: input, shape index: {}]   ;;  %s8031_s7 = inlined_call_operand.vmem [shape: f32[2,1,256], index: 7, kind: input, shape index: {}]   ;;  %s8032_s8 = inlined_call_operand.hbm [shape: bf16[2,5,128,256], index: 8, kind: input, shape index: {}]   ;;  %s8033_s9 = inlined_call_operand.vmem [shape: f32[2,1,256], index: 9, kind: input, shape index: {}]   ;;  %s8034_s10 = inlined_call_operand.vmem [shape: bf16[2,128,128], index: 10, kind: input, shape index: {}]   ;;  %s8035_s11 = inlined_call_operand.vmem [shape: f32[2,1,128], index: 11, kind: input, shape index: {}]   ;;  %s8036_s12 = inlined_call_operand.vmem [shape: bf16[2,128,128], index: 12, kind: input, shape index: {}]   ;;  %s8037_s13 = inlined_call_operand.vmem [shape: f32[2,1,128], index: 13, kind: input, shape index: {}]   ;;  %s8038_s14 = inlined_call_operand.vmem [shape: bf16[128,128], index: 14, kind: input, shape index: {}]   ;;  %s8039_s15 = inlined_call_operand.vmem [shape: f32[1,128], index: 15, kind: input, shape index: {}]   ;;  %s8040_s16 = inlined_call_operand.hbm [shape: f32[32,128], index: 16, kind: output, shape index: {0}]   ;;  %s8041_s17 = inlined_call_operand.vmem [shape: f32[32,128], index: 17, kind: output, shape index: {1}]   ;;  %s8042_s18 = inlined_call_operand.vmem [shape: bf16[2,2,16,128], index: 18, kind: output, shape index: {2}]  }
   0x1   :  { %8048 = sst [smem:[#allocation18_spill]] %s8024_s0 }
   0x2   :  { %8049 = sst [smem:[#allocation19_spill]] %s8025_s1 }
   0x3   :  { %8050 = sst [smem:[#allocation20_spill]] %s8026_s2 }
   0x4   :  { %8051 = sst [smem:[#allocation21_spill]] %s8027_s3 }
   0x5   :  { %8052 = sst [smem:[#allocation22_spill]] %s8028_s4 }
   0x6   :  { %8053 = sst [smem:[#allocation23_spill]] %s8030_s6 }
   0x7   :  { %8054 = sst [smem:[#allocation24_spill]] %s8039_s15 }
   0x8   :  { %8055 = sst [smem:[#allocation25_spill]] %s8040_s16 }
   0x9   :  { %8056 = sst [smem:[#allocation26_spill]] %s8041_s17 }
   0xa   :  { %24 = vsyncpa [#allocation6], 0 }
   0xb   :  { %25 = vsyncpa [#allocation9], 0 }
   0xc   :  { %26 = vsyncpa [#allocation7], 0 }
   0xd   :  { %28 = vsyncpa [#allocation7 + $0x1], 0  ;;  %s7461_s27 = smov 0   ;;  %s7463_s28 = smov 0  }
   0xe   :  { %s7465_s29 = smov 0   ;;  %s7467_s30 = smov 0  }
   0xf LB: > { %8057 = sst [smem:[#allocation14_spill]] %s7345_s27  ;;  %s7482_s0 = sadd.s32 4294967295, %s7357_s30   ;;  %s7357_s30 = sphi %s7467_s30, %s8076_s30   ;;  %s7353_s29 = sphi %s7465_s29, %s8080_s29   ;;  %s7349_s28 = sphi %s7463_s28, %s8079_s28   ;;  %s7345_s27 = sphi %s7461_s27, %s8078_s27  }
  0x10   : > { %s4990_s19 = sadd.s32 4294967294, %s7357_s30   ;;  %s7486_s1 = sadd.s32 1, %s7357_s30  }
  0x11   : > { %8058 = sst [smem:[#allocation15_spill]] %s7486_s1  ;;  %s93_s20 = sadd.s32 1, %s7353_s29 }
  0x12   : > { %s90_s21 = ssub.s32 %s7357_s30, %s7486_s1  ;;  %p100_p0 = scmp.ne.s32.totalorder %s7353_s29, %s7349_s28 }
  0x13   : > { %p91_p1 = scmp.eq.s32.totalorder %s90_s21, 0  ;;  %p101_p2 = scmp.eq.s32.totalorder %s7357_s30, 0 }
  0x14   : > { %p408_p3 = scmp.eq.s32.totalorder %s7482_s0, 1  ;;  %p413_p4 = scmp.ne.s32.totalorder %s7349_s28, %s7345_s27 }
  0x15   : > { %s7498_s22 = scalar_select %p91_p1, %s7353_s29, %s93_s20  }
  0x16   : > { %p7500_p5 = por %p101_p2, %p100_p0  ;;  %p7504_p6 = por %p408_p3, %p100_p0 }
  0x17   : > { %8059 = sst [smem:[#allocation16_spill]] %s7498_s22  ;;  %p414_p7 = scmp.eq.s32.totalorder %s4990_s19, 1 }
  0x18   : > { %p4991_p8 = scmp.ge.s32.totalorder %s7357_s30, 1  ;;  %p473_p9 = scmp.lt.s32.totalorder %s7357_s30, 3 }
  0x19   : > { %p7510_p10 = por %p414_p7, %p413_p4  ;;  %p7117_p11 = scmp.eq.s32.totalorder %s7482_s0, 0 }
  0x1a   : > { %p7515_p12 = pnand %p4991_p8, %p473_p9  ;;  %s8065_s6 = sld [smem:[#allocation23_spill]] }
  0x1b   : > { %s8062_s24 = scalar_select %p7510_p10, 1, 0 }
  0x1c   : > { %p7106_p13 = pneg %p7515_p12  ;;  %s7359_s19 = smov [#allocation5]  }
  0x1d   : > { %8063 = sst [smem:[#allocation17_spill]] %s8062_s24  ;;  %s492_s22 = sshll.u32 %s7359_s19, 4  ;;  %s493_s22 = int_to_ptr.vmem [resolvable:$true] %s492_s22 }
  0x1e   : > { %p7107_p0 = pnand %p7117_p11, %p7106_p13  ;;  %s507_s27 = sshll.u32 %s8032_s8, 4  ;;  %s508_s27 = int_to_ptr.hbm [resolvable:$true] %s507_s27 }
  0x1f   : > { %s7360_s17 = smov 128   ;;  %s7361_s15 = smov 8  }
  0x20   : > { %s490_s21 = sshll.u32 %s8065_s6, 4  ;;  %s7362_s16 = smov [#allocation8]   ;;  %s491_s21 = int_to_ptr.hbm [resolvable:$true] %s490_s21 }
  0x21   : > { %7109 = dma.hbm_to_vmem [thread:$0]  (!%p7107_p0), %s491_s21, 20480, %s493_s22, [#allocation6], %s7360_s17, %s7360_s17, %s7361_s15  }
  0x22   : > { %s509_s26 = sshll.u32 %s7362_s16, 4  ;;  %p4994_p1 = scmp.ge.s32.totalorder %s7357_s30, 2  ;;  %s510_s26 = int_to_ptr.vmem [resolvable:$true] %s509_s26 }
  0x23   : > { %7112 = dma.hbm_to_vmem [thread:$0]  (!%p7107_p0), %s508_s27, 20480, %s510_s26, [#allocation9], %s7360_s17, %s7360_s17, %s7361_s15  }
  0x24   : > { %540 = sbr.rel (%p4994_p1) target bundleno = 93 (0x5d), region = 64 }
  0x29   : > { %561 = sbr.rel (!%p7500_p5) target bundleno = 67 (0x43), region = 76  ;;  %s563_s1 = sand.u32 (%p7500_p5), 1, %s7353_s29  }
  0x2a   : > { %s6685_s24 = sshll.u32 (%p7500_p5), %s7357_s30, 6  ;;  %s4995_s20 = sshll.u32 (%p7500_p5), %s563_s1, 7 }
  0x2b   : > { %s8066_s22 = sld [smem:[#allocation20_spill]] (%p7500_p5)  ;;  %s565_s15 = scalar_lea.vmem (%p7500_p5), [#allocation3], %s4995_s20 }
  0x31   : > { %s7539_s21 = scalar_lea.vmem %s8066_s22, %s6685_s24 }
  0x32   : > { %v585_v0 = vld [vmem:[%s7539_s21] sm:$0xff]   ;;  %v589_v1 = vld [vmem:[%s7539_s21 + $0x8] sm:$0xff]   ;;  %v593_v2 = vld [vmem:[%s7539_s21 + $0x10] sm:$0xff]  }
  0x33   : > { %586 = vst [vmem:[%s565_s15] sm:$0xff] %v585_v0   ;;  %v597_v3 = vld [vmem:[%s7539_s21 + $0x18] sm:$0xff]   ;;  %v601_v4 = vld [vmem:[%s7539_s21 + $0x20] sm:$0xff]   ;;  %v605_v5 = vld [vmem:[%s7539_s21 + $0x28] sm:$0xff]  }
  0x34   : > { %590 = vst [vmem:[%s565_s15 + $0x8] sm:$0xff] %v589_v1   ;;  %v609_v6 = vld [vmem:[%s7539_s21 + $0x30] sm:$0xff]   ;;  %v613_v7 = vld [vmem:[%s7539_s21 + $0x38] sm:$0xff]   ;;  %v617_v8 = vld [vmem:[%s7539_s21 + $0x80] sm:$0xff]  }
  0x35   : > { %594 = vst [vmem:[%s565_s15 + $0x10] sm:$0xff] %v593_v2   ;;  %v621_v9 = vld [vmem:[%s7539_s21 + $0x88] sm:$0xff]   ;;  %v625_v10 = vld [vmem:[%s7539_s21 + $0x90] sm:$0xff]   ;;  %v629_v11 = vld [vmem:[%s7539_s21 + $0x98] sm:$0xff]  }
  0x36   : > { %598 = vst [vmem:[%s565_s15 + $0x18] sm:$0xff] %v597_v3   ;;  %v633_v12 = vld [vmem:[%s7539_s21 + $0xa0] sm:$0xff]   ;;  %v637_v13 = vld [vmem:[%s7539_s21 + $0xa8] sm:$0xff]   ;;  %v641_v14 = vld [vmem:[%s7539_s21 + $0xb0] sm:$0xff]  }
  0x37   : > { %602 = vst [vmem:[%s565_s15 + $0x20] sm:$0xff] %v601_v4   ;;  %v645_v15 = vld [vmem:[%s7539_s21 + $0xb8] sm:$0xff]  }
  0x38   : > { %606 = vst [vmem:[%s565_s15 + $0x28] sm:$0xff] %v605_v5  }
  0x39   : > { %610 = vst [vmem:[%s565_s15 + $0x30] sm:$0xff] %v609_v6  }
  0x3a   : > { %614 = vst [vmem:[%s565_s15 + $0x38] sm:$0xff] %v613_v7  }
  0x3b   : > { %618 = vst [vmem:[%s565_s15 + $0x40] sm:$0xff] %v617_v8  }
  0x3c   : > { %622 = vst [vmem:[%s565_s15 + $0x48] sm:$0xff] %v621_v9  }
  0x3d   : > { %626 = vst [vmem:[%s565_s15 + $0x50] sm:$0xff] %v625_v10  }
  0x3e   : > { %630 = vst [vmem:[%s565_s15 + $0x58] sm:$0xff] %v629_v11  }
  0x3f   : > { %634 = vst [vmem:[%s565_s15 + $0x60] sm:$0xff] %v633_v12  }
  0x40   : > { %638 = vst [vmem:[%s565_s15 + $0x68] sm:$0xff] %v637_v13  }
  0x41   : > { %642 = vst [vmem:[%s565_s15 + $0x70] sm:$0xff] %v641_v14  }
  0x42   : > { %646 = vst [vmem:[%s565_s15 + $0x78] sm:$0xff] %v645_v15  }
  0x43 PF: > { %736 = sbr.rel (!%p7500_p5) target bundleno = 93 (0x5d), region = 117  ;;  %s738_s6 = sand.u32 (%p7500_p5), 1, %s7353_s29  }
  0x44   : > { %s6686_s16 = sshll.u32 (%p7500_p5), %s7357_s30, 6  ;;  %s4998_s17 = sshll.u32 (%p7500_p5), %s738_s6, 7 }
  0x45   : > { %s8067_s3 = sld [smem:[#allocation21_spill]] (%p7500_p5)  ;;  %s740_s2 = scalar_lea.vmem (%p7500_p5), [#allocation4], %s4998_s17 }
  0x4b   : > { %s7564_s1 = scalar_lea.vmem %s8067_s3, %s6686_s16 }
  0x4c   : > { %v760_v16 = vld [vmem:[%s7564_s1] sm:$0xff]   ;;  %v764_v17 = vld [vmem:[%s7564_s1 + $0x8] sm:$0xff]   ;;  %v768_v18 = vld [vmem:[%s7564_s1 + $0x10] sm:$0xff]  }
  0x4d   : > { %761 = vst [vmem:[%s740_s2] sm:$0xff] %v760_v16   ;;  %v772_v19 = vld [vmem:[%s7564_s1 + $0x18] sm:$0xff]   ;;  %v776_v20 = vld [vmem:[%s7564_s1 + $0x20] sm:$0xff]   ;;  %v780_v21 = vld [vmem:[%s7564_s1 + $0x28] sm:$0xff]  }
  0x4e   : > { %765 = vst [vmem:[%s740_s2 + $0x8] sm:$0xff] %v764_v17   ;;  %v784_v22 = vld [vmem:[%s7564_s1 + $0x30] sm:$0xff]   ;;  %v788_v23 = vld [vmem:[%s7564_s1 + $0x38] sm:$0xff]   ;;  %v792_v24 = vld [vmem:[%s7564_s1 + $0x80] sm:$0xff]  }
  0x4f   : > { %769 = vst [vmem:[%s740_s2 + $0x10] sm:$0xff] %v768_v18   ;;  %v796_v25 = vld [vmem:[%s7564_s1 + $0x88] sm:$0xff]   ;;  %v800_v26 = vld [vmem:[%s7564_s1 + $0x90] sm:$0xff]   ;;  %v804_v27 = vld [vmem:[%s7564_s1 + $0x98] sm:$0xff]  }
  0x50   : > { %773 = vst [vmem:[%s740_s2 + $0x18] sm:$0xff] %v772_v19   ;;  %v808_v28 = vld [vmem:[%s7564_s1 + $0xa0] sm:$0xff]   ;;  %v812_v29 = vld [vmem:[%s7564_s1 + $0xa8] sm:$0xff]   ;;  %v816_v30 = vld [vmem:[%s7564_s1 + $0xb0] sm:$0xff]  }
  0x51   : > { %777 = vst [vmem:[%s740_s2 + $0x20] sm:$0xff] %v776_v20   ;;  %v820_v31 = vld [vmem:[%s7564_s1 + $0xb8] sm:$0xff]  }
  0x52   : > { %781 = vst [vmem:[%s740_s2 + $0x28] sm:$0xff] %v780_v21  }
  0x53   : > { %785 = vst [vmem:[%s740_s2 + $0x30] sm:$0xff] %v784_v22  }
  0x54   : > { %789 = vst [vmem:[%s740_s2 + $0x38] sm:$0xff] %v788_v23  }
  0x55   : > { %793 = vst [vmem:[%s740_s2 + $0x40] sm:$0xff] %v792_v24  }
  0x56   : > { %797 = vst [vmem:[%s740_s2 + $0x48] sm:$0xff] %v796_v25  }
  0x57   : > { %801 = vst [vmem:[%s740_s2 + $0x50] sm:$0xff] %v800_v26  }
  0x58   : > { %805 = vst [vmem:[%s740_s2 + $0x58] sm:$0xff] %v804_v27  }
  0x59   : > { %809 = vst [vmem:[%s740_s2 + $0x60] sm:$0xff] %v808_v28  }
  0x5a   : > { %813 = vst [vmem:[%s740_s2 + $0x68] sm:$0xff] %v812_v29  }
  0x5b   : > { %817 = vst [vmem:[%s740_s2 + $0x70] sm:$0xff] %v816_v30  }
  0x5c   : > { %821 = vst [vmem:[%s740_s2 + $0x78] sm:$0xff] %v820_v31  }
  0x5d PF: > { %914 = sbr.rel (%p7515_p12) target bundleno = 2902 (0xb56), region = 158  ;;  %s7585_s24 = sand.u32 (!%p7515_p12), 1, %s7349_s28  }
  0x5e   : > { %s5002_s20 = sshll.u32 (!%p7515_p12), %s7585_s24, 7 }
  0x5f   : > { %s7588_s19 = scalar_lea.vmem (!%p7515_p12), [#allocation3], %s5002_s20  ;;  %s7590_s22 = scalar_lea.vmem (!%p7515_p12), [#allocation4], %s5002_s20 }
  0x62   : > { %7332 = dma.done.wait (%p7117_p11), [#allocation6], 20480  }
  0x63   : > { %7334 = vsyncadd (%p7117_p11), [#allocation6], 4294946816 }
  0x64   : > { %7336 = dma.done.wait (%p7117_p11), [#allocation9], 20480  }
  0x65   : > { %7338 = vsyncadd (%p7117_p11), [#allocation9], 4294946816  ;;  %s5007_s25 = sshll.u32 %s7482_s0, 1  ;;  %s8068_s4 = sld [smem:[#allocation22_spill]]  ;;  %v5090_v34 = vld [vmem:[#allocation5 + $0x270] sm:$0xf] }
  0x66   : > { %p1012_p2 = scmp.lt.s32.totalorder %s5007_s25, 3  ;;  %v6707_v35 = vld [vmem:[#allocation5 + $0x274] sm:$0xf0]  ;;  %v6706_v36 = vld [vmem:[#allocation5 + $0x274] sm:$0xf]  ;;  %s8069_s1 = sld [smem:[#allocation18_spill]] }
  0x67   : > { %v5091_v37 = vor.u32 %v6707_v35, %v5090_v34  ;;  %v5092_v38 = vld [vmem:[#allocation5 + $0x278] sm:$0xf0]  ;;  %v5082_v39 = vld [vmem:[#allocation5 + $0x260] sm:$0xf]  ;;  %v6705_v40 = vld [vmem:[#allocation5 + $0x264] sm:$0xf0] }
  0x68   : > { %s8082_s25 = smov (!%p1012_p2, %s5007_s25), 3  ;;  %v5095_v41 = vor.u32 %v6706_v36, %v5092_v38  ;;  %v6704_v42 = vld [vmem:[#allocation5 + $0x264] sm:$0xf]  ;;  %v5084_v43 = vld [vmem:[#allocation5 + $0x268] sm:$0xf0]  ;;  %v5083_v44 = vor.u32 %v6705_v40, %v5082_v39  ;;  %vm1076_vm0 = vcmask 523264  }
  0x69   : > { %s7607_s17 = sshll.u32 %s8082_s25, 3  ;;  %1202 = vmatpush.bf16.msra.mxu1 %v5091_v37  ;;  %v5087_v46 = vor.u32 %v6704_v42, %v5084_v43  ;;  %v5074_v47 = vld [vmem:[#allocation5 + $0x250] sm:$0xf]  ;;  %v6703_v48 = vld [vmem:[#allocation5 + $0x254] sm:$0xf0]  ;;  %s8070_s20 = sld [smem:[#allocation19_spill]] }
  0x6a   : > { %1216 = vmatpush.bf16.msra.mxu2 %v5095_v41  ;;  %v6702_v49 = vld [vmem:[#allocation5 + $0x254] sm:$0xf]  ;;  %v5076_v50 = vld [vmem:[#allocation5 + $0x258] sm:$0xf0]  ;;  %v5075_v54 = vor.u32 %v6703_v48, %v5074_v47  ;;  %v5066_v55 = vld [vmem:[#allocation5 + $0x240] sm:$0xf] }
  0x6b   : > { %v6691_v32 = vld [vmem:[%s8068_s4 + $0x18] sm:$0xff]  ;;  %v6690_v33 = vld [vmem:[%s8068_s4 + $0x10] sm:$0xff]  ;;  %v6689_v45 = vld [vmem:[%s8068_s4 + $0x8] sm:$0xff]  ;;  %v5079_v57 = vor.u32 %v6702_v49, %v5076_v50  ;;  %p1030_p3 = scmp.lt.s32.totalorder %s7482_s0, 1  ;;  %s5006_s6 = sshll.u32 %s7585_s24, 4 }
  0x6c   : > { %1084 = vmatpush.bf16.msra.mxu0 %v6691_v32  ;;  %s1015_s2 = scalar_lea.vmem %s8069_s1, %s7607_s17  ;;  %v6688_v51 = vld [vmem:[%s8068_s4] sm:$0xff]  ;;  %v5154_v58 = vld [vmem:[#allocation5 + $0x70] sm:$0xf]  ;;  %v6723_v59 = vld [vmem:[#allocation5 + $0x74] sm:$0xf0]  ;;  %s8071_s1 = sld [smem:[#allocation25_spill]] }
  0x6d   : > { %v1037_v52 = vld [vmem:[%s1015_s2] sm:$0xff]  ;;  %v1038_v53 = vld [vmem:[%s1015_s2 + $0x8] sm:$0xff]  ;;  %1203 = vmatpush.bf16.msra.mxu1 %v5083_v44  ;;  %v6700_v61 = vld [vmem:[#allocation5 + $0x244] sm:$0xf]  ;;  %v5155_v63 = vor.u32 %v6723_v59, %v5154_v58  ;;  %s1031_s16 = scalar_select %p1030_p3, %s7482_s0, 1 }
  0x6e   : > { %v6701_v56 = vld [vmem:[#allocation5 + $0x244] sm:$0xf0]  ;;  %1217 = vmatpush.bf16.msra.mxu2 %v5087_v46  ;;  %v6722_v60 = vld [vmem:[#allocation5 + $0x74] sm:$0xf]  ;;  %v5068_v62 = vld [vmem:[#allocation5 + $0x248] sm:$0xf0]  ;;  %v1047_v3 = vpack.c.bf16 %v1038_v53, %v1037_v52 }
  0x6f   : > { %v5156_v0 = vld [vmem:[#allocation5 + $0x78] sm:$0xf0]  ;;  %v5146_v2 = vld [vmem:[#allocation5 + $0x60] sm:$0xf]  ;;  %v5067_v4 = vor.u32 %v6701_v56, %v5066_v55  ;;  %1329 = vmatpush.bf16.msra.mxu3 %v5155_v63  ;;  %v6721_v5 = vld [vmem:[#allocation5 + $0x64] sm:$0xf0]  ;;  %v5071_v8 = vor.u32 %v6700_v61, %v5068_v62  ;;  %s7789_s25 = scalar_lea.vmem %s8070_s20, %s7607_s17 }
  0x70   : > { %1085 = vmatpush.bf16.msra.mxu0 %v6690_v33  ;;  %v5159_v1 = vor.u32 %v6722_v60, %v5156_v0  ;;  %v6720_v6 = vld [vmem:[#allocation5 + $0x64] sm:$0xf]  ;;  %v5148_v7 = vld [vmem:[#allocation5 + $0x68] sm:$0xf0]  ;;  %v5058_v9 = vld [vmem:[#allocation5 + $0x230] sm:$0xf]  ;;  %v5147_v12 = vor.u32 %v6721_v5, %v5146_v2 }
  0x71   : > { %1204 = vmatpush.bf16.msra.mxu1 %v5075_v54  ;;  %v6699_v10 = vld [vmem:[#allocation5 + $0x234] sm:$0xf0]  ;;  %v6698_v11 = vld [vmem:[#allocation5 + $0x234] sm:$0xf]  ;;  %v5060_v13 = vld [vmem:[#allocation5 + $0x238] sm:$0xf0]  ;;  %v5151_v14 = vor.u32 %v6720_v6, %v5148_v7 }
  0x72   : > { %1218 = vmatpush.bf16.msra.mxu2 %v5079_v57  ;;  %v5138_v15 = vld [vmem:[#allocation5 + $0x50] sm:$0xf]  ;;  %v6719_v16 = vld [vmem:[#allocation5 + $0x54] sm:$0xf0]  ;;  %v6718_v17 = vld [vmem:[#allocation5 + $0x54] sm:$0xf]  ;;  %v5059_v19 = vor.u32 %v6699_v10, %v5058_v9  ;;  %v5063_v20 = vor.u32 %v6698_v11, %v5060_v13 }
  0x73   : > { %v5140_v18 = vld [vmem:[#allocation5 + $0x58] sm:$0xf0]  ;;  %v5050_v21 = vld [vmem:[#allocation5 + $0x220] sm:$0xf]  ;;  %v6697_v22 = vld [vmem:[#allocation5 + $0x224] sm:$0xf0]  ;;  %1330 = vmatpush.bf16.msra.mxu3 %v5147_v12  ;;  %v5139_v24 = vor.u32 %v6719_v16, %v5138_v15 }
  0x74   : > { %1086 = vmatpush.bf16.msra.mxu0 %v6689_v45  ;;  %v6696_v23 = vld [vmem:[#allocation5 + $0x224] sm:$0xf]  ;;  %v5052_v25 = vld [vmem:[#allocation5 + $0x228] sm:$0xf0]  ;;  %v5143_v26 = vor.u32 %v6718_v17, %v5140_v18  ;;  %v5130_v27 = vld [vmem:[#allocation5 + $0x40] sm:$0xf]  ;;  %v5051_v31 = vor.u32 %v6697_v22, %v5050_v21 }
  0x75   : > { %1205 = vmatpush.bf16.msra.mxu1 %v5067_v4  ;;  %v6717_v28 = vld [vmem:[#allocation5 + $0x44] sm:$0xf0]  ;;  %v6716_v29 = vld [vmem:[#allocation5 + $0x44] sm:$0xf]  ;;  %v5132_v30 = vld [vmem:[#allocation5 + $0x48] sm:$0xf0]  ;;  %v5055_v32 = vor.u32 %v6696_v23, %v5052_v25 }
  0x76   : > { %1219 = vmatpush.bf16.msra.mxu2 %v5071_v8  ;;  %v5042_v33 = vld [vmem:[#allocation5 + $0x210] sm:$0xf]  ;;  %v6695_v34 = vld [vmem:[#allocation5 + $0x214] sm:$0xf0]  ;;  %v6694_v35 = vld [vmem:[#allocation5 + $0x214] sm:$0xf]  ;;  %v5131_v36 = vor.u32 %v6717_v28, %v5130_v27  ;;  %v5135_v38 = vor.u32 %v6716_v29, %v5132_v30 }
  0x77   : > { %1331 = vmatpush.bf16.msra.mxu3 %v5139_v24  ;;  %v5044_v37 = vld [vmem:[#allocation5 + $0x218] sm:$0xf0]  ;;  %v5122_v39 = vld [vmem:[#allocation5 + $0x30] sm:$0xf]  ;;  %v6715_v40 = vld [vmem:[#allocation5 + $0x34] sm:$0xf0]  ;;  %v5043_v45 = vor.u32 %v6695_v34, %v5042_v33 }
  0x78   : > { %1087 = vmatpush.bf16.msra.mxu0 %v6688_v51  ;;  %v5034_v41 = vld [vmem:[#allocation5 + $0x200] sm:$0xf]  ;;  %v6693_v42 = vld [vmem:[#allocation5 + $0x204] sm:$0xf0]  ;;  %v6714_v43 = vld [vmem:[#allocation5 + $0x34] sm:$0xf]  ;;  %v5047_v50 = vor.u32 %v6694_v35, %v5044_v37  ;;  %v5123_v53 = vor.u32 %v6715_v40, %v5122_v39 }
  0x79   : > { %1206 = vmatpush.bf16.msra.mxu1 %v5059_v19  ;;  %v5124_v44 = vld [vmem:[#allocation5 + $0x38] sm:$0xf0]  ;;  %v6692_v46 = vld [vmem:[#allocation5 + $0x204] sm:$0xf]  ;;  %v5036_v47 = vld [vmem:[#allocation5 + $0x208] sm:$0xf0]  ;;  %v5035_v57 = vor.u32 %v6693_v42, %v5034_v41 }
  0x7a   : > { %1220 = vmatpush.bf16.msra.mxu2 %v5063_v20  ;;  %v5218_v48 = vld [vmem:[#allocation5 + $0xf0] sm:$0xf]  ;;  %v6739_v49 = vld [vmem:[#allocation5 + $0xf4] sm:$0xf0]  ;;  %v6738_v51 = vld [vmem:[#allocation5 + $0xf4] sm:$0xf]  ;;  %v5127_v54 = vor.u32 %v6714_v43, %v5124_v44  ;;  %v5039_v60 = vor.u32 %v6692_v46, %v5036_v47 }
  0x7b   : > { %5031 = vmatmul.msk.bf16.vlgmr.msra.gmra.mxu0 %vm1076_vm0, %v1047_v3  ;;  %v5220_v52 = vld [vmem:[#allocation5 + $0xf8] sm:$0xf0]  ;;  %1332 = vmatpush.bf16.msra.mxu3 %v5131_v36  ;;  %v5114_v55 = vld [vmem:[#allocation5 + $0x20] sm:$0xf]  ;;  %v6713_v56 = vld [vmem:[#allocation5 + $0x24] sm:$0xf0]  ;;  %v5219_v61 = vor.u32 %v6739_v49, %v5218_v48 }
  0x7c   : > { %1343 = vmatpush.bf16.msrb.mxu0 %v5159_v1  ;;  %v6712_v58 = vld [vmem:[#allocation5 + $0x24] sm:$0xf]  ;;  %v5116_v59 = vld [vmem:[#allocation5 + $0x28] sm:$0xf0]  ;;  %v5223_v62 = vor.u32 %v6738_v51, %v5220_v52  ;;  %v5210_v63 = vld [vmem:[#allocation5 + $0xe0] sm:$0xf]  ;;  %v5115_v1 = vor.u32 %v6713_v56, %v5114_v55 }
  0x7d   : > { %1207 = vmatpush.bf16.msra.mxu1 %v5051_v31  ;;  %v6737_v0 = vld [vmem:[#allocation5 + $0xe4] sm:$0xf0]  ;;  %v6736_v2 = vld [vmem:[#allocation5 + $0xe4] sm:$0xf]  ;;  %v5212_v3 = vld [vmem:[#allocation5 + $0xe8] sm:$0xf0]  ;;  %v5119_v4 = vor.u32 %v6712_v58, %v5116_v59 }
  0x7e   : > { %1221 = vmatpush.bf16.msra.mxu2 %v5055_v32  ;;  %v5211_v5 = vor.u32 %v6737_v0, %v5210_v63  ;;  %v5215_v6 = vor.u32 %v6736_v2, %v5212_v3  ;;  %v5202_v7 = vld [vmem:[#allocation5 + $0xd0] sm:$0xf]  ;;  %v6735_v8 = vld [vmem:[#allocation5 + $0xd4] sm:$0xf0]  ;;  %v6734_v9 = vld [vmem:[#allocation5 + $0xd4] sm:$0xf] }
  0x7f   : > { %1333 = vmatpush.bf16.msra.mxu3 %v5123_v53  ;;  %v5204_v10 = vld [vmem:[#allocation5 + $0xd8] sm:$0xf0]  ;;  %v5203_v11 = vor.u32 %v6735_v8, %v5202_v7  ;;  %v5194_v13 = vld [vmem:[#allocation5 + $0xc0] sm:$0xf]  ;;  %v6732_v15 = vld [vmem:[#allocation5 + $0xc4] sm:$0xf] }
  0x80   : > { %1344 = vmatpush.bf16.msrb.mxu0 %v5151_v14  ;;  %v5207_v12 = vor.u32 %v6734_v9, %v5204_v10  ;;  %v6733_v14 = vld [vmem:[#allocation5 + $0xc4] sm:$0xf0]  ;;  %v5196_v16 = vld [vmem:[#allocation5 + $0xc8] sm:$0xf0]  ;;  %v5106_v19 = vld [vmem:[#allocation5 + $0x10] sm:$0xf] }
  0x81   : > { %1208 = vmatpush.bf16.msra.mxu1 %v5043_v45  ;;  %v5195_v17 = vor.u32 %v6733_v14, %v5194_v13  ;;  %v5199_v18 = vor.u32 %v6732_v15, %v5196_v16  ;;  %v6711_v20 = vld [vmem:[#allocation5 + $0x14] sm:$0xf0]  ;;  %v6710_v21 = vld [vmem:[#allocation5 + $0x14] sm:$0xf]  ;;  %v5108_v23 = vld [vmem:[#allocation5 + $0x18] sm:$0xf0] }
  0x82   : > { %1222 = vmatpush.bf16.msra.mxu2 %v5047_v50  ;;  %v5107_v22 = vor.u32 %v6711_v20, %v5106_v19  ;;  %v5186_v24 = vld [vmem:[#allocation5 + $0xb0] sm:$0xf]  ;;  %v6731_v25 = vld [vmem:[#allocation5 + $0xb4] sm:$0xf0]  ;;  %v6730_v28 = vld [vmem:[#allocation5 + $0xb4] sm:$0xf] }
  0x83   : > { %1334 = vmatpush.bf16.msra.mxu3 %v5115_v1  ;;  %v5187_v27 = vor.u32 %v6731_v25, %v5186_v24  ;;  %v5188_v29 = vld [vmem:[#allocation5 + $0xb8] sm:$0xf0]  ;;  %v5098_v31 = vld [vmem:[#allocation5] sm:$0xf]  ;;  %v6709_v32 = vld [vmem:[#allocation5 + $0x4] sm:$0xf0] }
  0x84   : > { %1345 = vmatpush.bf16.msrb.mxu0 %v5143_v26  ;;  %v5111_v26 = vor.u32 %v6710_v21, %v5108_v23  ;;  %v5191_v30 = vor.u32 %v6730_v28, %v5188_v29  ;;  %v6708_v33 = vld [vmem:[#allocation5 + $0x4] sm:$0xf]  ;;  %v5099_v34 = vor.u32 %v6709_v32, %v5098_v31  ;;  %v5100_v35 = vld [vmem:[#allocation5 + $0x8] sm:$0xf0]  ;;  %v5178_v36 = vld [vmem:[#allocation5 + $0xa0] sm:$0xf] }
  0x85   : > { %1209 = vmatpush.bf16.msra.mxu1 %v5035_v57  ;;  %v6729_v37 = vld [vmem:[#allocation5 + $0xa4] sm:$0xf0]  ;;  %v6728_v40 = vld [vmem:[#allocation5 + $0xa4] sm:$0xf]  ;;  %v5180_v41 = vld [vmem:[#allocation5 + $0xa8] sm:$0xf0] }
  0x86   : > { %1223 = vmatpush.bf16.msra.mxu2 %v5039_v60  ;;  %v5179_v39 = vor.u32 %v6729_v37, %v5178_v36  ;;  %v5282_v42 = vld [vmem:[#allocation5 + $0x170] sm:$0xf]  ;;  %v5183_v43 = vor.u32 %v6728_v40, %v5180_v41  ;;  %v6755_v44 = vld [vmem:[#allocation5 + $0x174] sm:$0xf0]  ;;  %v6754_v45 = vld [vmem:[#allocation5 + $0x174] sm:$0xf] }
  0x87   : > { %1335 = vmatpush.bf16.msra.mxu3 %v5107_v22  ;;  %v5284_v46 = vld [vmem:[#allocation5 + $0x178] sm:$0xf0]  ;;  %v5283_v47 = vor.u32 %v6755_v44, %v5282_v42  ;;  %v5170_v49 = vld [vmem:[#allocation5 + $0x90] sm:$0xf]  ;;  %v6727_v50 = vld [vmem:[#allocation5 + $0x94] sm:$0xf0] }
  0x88   : > { %1346 = vmatpush.bf16.msrb.mxu0 %v5135_v38  ;;  %v5103_v38 = vor.u32 %v6708_v33, %v5100_v35  ;;  %v5287_v48 = vor.u32 %v6754_v45, %v5284_v46  ;;  %v6726_v51 = vld [vmem:[#allocation5 + $0x94] sm:$0xf]  ;;  %v5171_v52 = vor.u32 %v6727_v50, %v5170_v49  ;;  %v5172_v53 = vld [vmem:[#allocation5 + $0x98] sm:$0xf0]  ;;  %v6753_v55 = vld [vmem:[#allocation5 + $0x164] sm:$0xf0] }
  0x89   : > { %1461 = vmatpush.bf16.msrb.mxu1 %v5219_v61  ;;  %v5175_v56 = vor.u32 %v6726_v51, %v5172_v53  ;;  %v6752_v58 = vld [vmem:[#allocation5 + $0x164] sm:$0xf]  ;;  %v5276_v59 = vld [vmem:[#allocation5 + $0x168] sm:$0xf0]  ;;  %v7363_v61 = vmov 0.0   ;;  %s6687_s27 = sshll.u32 %s1031_s16, 4 }
  0x8a   : > { %1475 = vmatpush.bf16.msrb.mxu2 %v5223_v62  ;;  %v5279_v60 = vor.u32 %v6752_v58, %v5276_v59  ;;  %1036 = vst [vmem:[#allocation2] sm:$0xff] %v7363_v61  ;;  %v5162_v62 = vld [vmem:[#allocation5 + $0x80] sm:$0xf]  ;;  %v6725_v63 = vld [vmem:[#allocation5 + $0x84] sm:$0xf0]  ;;  %s7840_s2 = scalar_lea.vmem %s8042_s18, %s6687_s27  ;;  %s7084_s16 = sshll.u32 %s7482_s0, 4 }
  0x8b   : > { %1336 = vmatpush.bf16.msra.mxu3 %v5099_v34  ;;  %v6724_v0 = vld [vmem:[#allocation5 + $0x84] sm:$0xf]  ;;  %v5163_v1 = vor.u32 %v6725_v63, %v5162_v62  ;;  %v5164_v2 = vld [vmem:[#allocation5 + $0x88] sm:$0xf0]  ;;  %v5266_v3 = vld [vmem:[#allocation5 + $0x150] sm:$0xf] }
  0x8c   : > { %1347 = vmatpush.bf16.msrb.mxu0 %v5127_v54  ;;  %v5274_v54 = vld [vmem:[#allocation5 + $0x160] sm:$0xf]  ;;  %v6750_v7 = vld [vmem:[#allocation5 + $0x154] sm:$0xf]  ;;  %v5268_v8 = vld [vmem:[#allocation5 + $0x158] sm:$0xf0] }
  0x8d   : > { %1462 = vmatpush.bf16.msrb.mxu1 %v5211_v5  ;;  %v5275_v57 = vor.u32 %v6753_v55, %v5274_v54  ;;  %v5167_v5 = vor.u32 %v6724_v0, %v5164_v2  ;;  %v5271_v9 = vor.u32 %v6750_v7, %v5268_v8  ;;  %v5258_v10 = vld [vmem:[#allocation5 + $0x140] sm:$0xf]  ;;  %v5260_v13 = vld [vmem:[#allocation5 + $0x148] sm:$0xf0]  ;;  %v5250_v16 = vld [vmem:[#allocation5 + $0x130] sm:$0xf] }
  0x8e   : > { %1476 = vmatpush.bf16.msrb.mxu2 %v5215_v6  ;;  %v5252_v20 = vld [vmem:[#allocation5 + $0x138] sm:$0xf0]  ;;  %v5242_v22 = vld [vmem:[#allocation5 + $0x120] sm:$0xf]  ;;  %v6745_v23 = vld [vmem:[#allocation5 + $0x124] sm:$0xf0] }
  0x8f   : > { %1593 = vmatpush.bf16.msrb.mxu3 %v5283_v47  ;;  %v6744_v24 = vld [vmem:[#allocation5 + $0x124] sm:$0xf]  ;;  %v5244_v25 = vld [vmem:[#allocation5 + $0x128] sm:$0xf0]  ;;  %v7161_v28 = vld [vmem:[%s8029_s5] ss:$0 sm:$0xff] }
  0x90   : > { %1348 = vmatpush.bf16.msrb.mxu0 %v5119_v4  ;;  %v6751_v4 = vld [vmem:[#allocation5 + $0x154] sm:$0xf0]  ;;  %v5234_v29 = vld [vmem:[#allocation5 + $0x110] sm:$0xf]  ;;  %v6742_v31 = vld [vmem:[#allocation5 + $0x114] sm:$0xf] }
  0x91   : > { %1463 = vmatpush.bf16.msrb.mxu1 %v5203_v11  ;;  %v5267_v6 = vor.u32 %v6751_v4, %v5266_v3  ;;  %v6749_v11 = vld [vmem:[#allocation5 + $0x144] sm:$0xf0]  ;;  %v5236_v33 = vld [vmem:[#allocation5 + $0x118] sm:$0xf0]  ;;  %v5226_v36 = vld [vmem:[#allocation5 + $0x100] sm:$0xf] }
  0x92   : > { %1477 = vmatpush.bf16.msrb.mxu2 %v5207_v12  ;;  %v6748_v12 = vld [vmem:[#allocation5 + $0x144] sm:$0xf]  ;;  %v5259_v14 = vor.u32 %v6749_v11, %v5258_v10  ;;  %v5239_v34 = vor.u32 %v6742_v31, %v5236_v33  ;;  %v6741_v37 = vld [vmem:[#allocation5 + $0x104] sm:$0xf0]  ;;  %v5228_v40 = vld [vmem:[#allocation5 + $0x108] sm:$0xf0] }
  0x93   : > { %1594 = vmatpush.bf16.msrb.mxu3 %v5275_v57  ;;  %v5263_v15 = vor.u32 %v6748_v12, %v5260_v13  ;;  %v5227_v41 = vor.u32 %v6741_v37, %v5226_v36  ;;  %v5346_v45 = vld [vmem:[#allocation5 + $0x1f0] sm:$0xf]  ;;  %v6771_v47 = vld [vmem:[#allocation5 + $0x1f4] sm:$0xf0]  ;;  %v5348_v49 = vld [vmem:[#allocation5 + $0x1f8] sm:$0xf0] }
  0x94   : > { %1349 = vmatpush.bf16.msrb.mxu0 %v5111_v26  ;;  %v5243_v26 = vor.u32 %v6745_v23, %v5242_v22  ;;  %v5347_v51 = vor.u32 %v6771_v47, %v5346_v45  ;;  %v5338_v53 = vld [vmem:[#allocation5 + $0x1e0] sm:$0xf]  ;;  %v6769_v54 = vld [vmem:[#allocation5 + $0x1e4] sm:$0xf0]  ;;  %v5340_v57 = vld [vmem:[#allocation5 + $0x1e8] sm:$0xf0] }
  0x95   : > { %1464 = vmatpush.bf16.msrb.mxu1 %v5195_v17  ;;  %v6747_v17 = vld [vmem:[#allocation5 + $0x134] sm:$0xf0]  ;;  %v5339_v58 = vor.u32 %v6769_v54, %v5338_v53  ;;  %v6766_v62 = vld [vmem:[#allocation5 + $0x1d4] sm:$0xf]  ;;  %v5332_v63 = vld [vmem:[#allocation5 + $0x1d8] sm:$0xf0] }
  0x96   : > { %1478 = vmatpush.bf16.msrb.mxu2 %v5199_v18  ;;  %v6746_v18 = vld [vmem:[#allocation5 + $0x134] sm:$0xf]  ;;  %v5251_v19 = vor.u32 %v6747_v17, %v5250_v16  ;;  %v6767_v61 = vld [vmem:[#allocation5 + $0x1d4] sm:$0xf0]  ;;  %v5335_v3 = vor.u32 %v6766_v62, %v5332_v63  ;;  %v5322_v4 = vld [vmem:[#allocation5 + $0x1c0] sm:$0xf] }
  0x97   : > { %1595 = vmatpush.bf16.msrb.mxu3 %v5267_v6  ;;  %v5255_v21 = vor.u32 %v6746_v18, %v5252_v20  ;;  %v6765_v6 = vld [vmem:[#allocation5 + $0x1c4] sm:$0xf0]  ;;  %v6764_v7 = vld [vmem:[#allocation5 + $0x1c4] sm:$0xf]  ;;  %v5324_v8 = vld [vmem:[#allocation5 + $0x1c8] sm:$0xf0] }
  0x98   : > { %1350 = vmatpush.bf16.msrb.mxu0 %v5103_v38  ;;  %v6740_v38 = vld [vmem:[#allocation5 + $0x104] sm:$0xf]  ;;  %v5327_v10 = vor.u32 %v6764_v7, %v5324_v8  ;;  %v5314_v11 = vld [vmem:[#allocation5 + $0x1b0] sm:$0xf]  ;;  %v6763_v12 = vld [vmem:[#allocation5 + $0x1b4] sm:$0xf0] }
  0x99   : > { %1465 = vmatpush.bf16.msrb.mxu1 %v5187_v27  ;;  %v5247_v27 = vor.u32 %v6744_v24, %v5244_v25  ;;  %v5231_v42 = vor.u32 %v6740_v38, %v5228_v40  ;;  %v6762_v13 = vld [vmem:[#allocation5 + $0x1b4] sm:$0xf]  ;;  %v5315_v17 = vor.u32 %v6763_v12, %v5314_v11  ;;  %v6760_v22 = vld [vmem:[#allocation5 + $0x1a4] sm:$0xf]  ;;  %v5308_v23 = vld [vmem:[#allocation5 + $0x1a8] sm:$0xf0] }
  0x9a   : > { %1479 = vmatpush.bf16.msrb.mxu2 %v5191_v30  ;;  %v6743_v30 = vld [vmem:[#allocation5 + $0x114] sm:$0xf0]  ;;  %v5311_v25 = vor.u32 %v6760_v22, %v5308_v23  ;;  %v6757_v36 = vld [vmem:[#allocation5 + $0x184] sm:$0xf0]  ;;  %v6756_v37 = vld [vmem:[#allocation5 + $0x184] sm:$0xf] }
  0x9b   : > { %1596 = vmatpush.bf16.msrb.mxu3 %v5259_v14  ;;  %v5235_v32 = vor.u32 %v6743_v30, %v5234_v29  ;;  %v5316_v14 = vld [vmem:[#allocation5 + $0x1b8] sm:$0xf0]  ;;  %v5292_v38 = vld [vmem:[#allocation5 + $0x188] sm:$0xf0]  ;;  %v5413_v45 = vld [vmem:[#allocation5 + $0x4f0] sm:$0xf] }
  0x9c   : > { %1607 = vmatpush.bf16.msra.mxu0 %v5287_v48  ;;  %v6770_v48 = vld [vmem:[#allocation5 + $0x1f4] sm:$0xf]  ;;  %v5319_v18 = vor.u32 %v6762_v13, %v5316_v14  ;;  %v5300_v29 = vld [vmem:[#allocation5 + $0x198] sm:$0xf0]  ;;  %v5295_v40 = vor.u32 %v6756_v37, %v5292_v38  ;;  %v6785_v53 = vld [vmem:[#allocation5 + $0x4e4] sm:$0xf0] }
  0x9d   : > { %1466 = vmatpush.bf16.msrb.mxu1 %v5179_v39  ;;  %v6786_v47 = vld [vmem:[#allocation5 + $0x4f4] sm:$0xf]  ;;  %v6784_v54 = vld [vmem:[#allocation5 + $0x4e4] sm:$0xf]  ;;  %v5399_v62 = vld [vmem:[#allocation5 + $0x4d8] sm:$0xf0] }
  0x9e   : > { %1480 = vmatpush.bf16.msrb.mxu2 %v5183_v43  ;;  %v5381_v7 = vld [vmem:[#allocation5 + $0x4b0] sm:$0xf]  ;;  %v6779_v8 = vld [vmem:[#allocation5 + $0x4b4] sm:$0xf0]  ;;  %v5383_v11 = vld [vmem:[#allocation5 + $0x4b8] sm:$0xf0] }
  0x9f   : > { %1597 = vmatpush.bf16.msrb.mxu3 %v5251_v19  ;;  %v5306_v19 = vld [vmem:[#allocation5 + $0x1a0] sm:$0xf]  ;;  %v6800_v37 = vld [vmem:[#allocation5 + $0x2e4] sm:$0xf]  ;;  %v5471_v38 = vld [vmem:[#allocation5 + $0x2e8] sm:$0xf0] }
  0xa0   : > { %1608 = vmatpush.bf16.msra.mxu0 %v5279_v60  ;;  %v5330_v60 = vld [vmem:[#allocation5 + $0x1d0] sm:$0xf]  ;;  %s4776_s21 = scalar_lea.sflag [#allocation7], %s7585_s24 }
  0xa1   : > { %1467 = vmatpush.bf16.msrb.mxu1 %v5171_v52  ;;  %v5351_v52 = vor.u32 %v6770_v48, %v5348_v49  ;;  %v5331_v2 = vor.u32 %v6767_v61, %v5330_v60  ;;  %v5415_v49 = vld [vmem:[#allocation5 + $0x4f8] sm:$0xf0]  ;;  %v6782_v60 = vld [vmem:[#allocation5 + $0x4d4] sm:$0xf] }
  0xa2   : > { %1481 = vmatpush.bf16.msrb.mxu2 %v5175_v56  ;;  %v6768_v56 = vld [vmem:[#allocation5 + $0x1e4] sm:$0xf]  ;;  %v5402_v63 = vor.u32 %v6782_v60, %v5399_v62  ;;  %v6818_v60 = vld [vmem:[#allocation5 + $0x374] sm:$0xf] }
  0xa3   : > { %1598 = vmatpush.bf16.msrb.mxu3 %v5243_v26  ;;  %v5343_v59 = vor.u32 %v6768_v56, %v5340_v57  ;;  %v5298_v26 = vld [vmem:[#allocation5 + $0x190] sm:$0xf]  ;;  %v5407_v56 = vld [vmem:[#allocation5 + $0x4e8] sm:$0xf0] }
  0xa4   : > { %1609 = vmatpush.bf16.msra.mxu0 %v5271_v9  ;;  %v5323_v9 = vor.u32 %v6765_v6, %v5322_v4  ;;  %v5410_v57 = vor.u32 %v6784_v54, %v5407_v56  ;;  %v5463_v56 = vld [vmem:[#allocation5 + $0x2d8] sm:$0xf0] }
  0xa5   : > { %1468 = vmatpush.bf16.msrb.mxu1 %v5163_v1 }
  0xa6   : > { %1482 = vmatpush.bf16.msrb.mxu2 %v5167_v5 }
  0xa7   : > { %1599 = vmatpush.bf16.msrb.mxu3 %v5235_v32 }
  0xa8   : > { %1610 = vmatpush.bf16.msra.mxu0 %v5263_v15 }
  0xab   : > { %1600 = vmatpush.bf16.msrb.mxu3 %v5227_v41 }
  0xac   : > { %1611 = vmatpush.bf16.msra.mxu0 %v5255_v21  ;;  %v6761_v21 = vld [vmem:[#allocation5 + $0x1a4] sm:$0xf0] }
  0xad   : > { %v5307_v24 = vor.u32 %v6761_v21, %v5306_v19  ;;  %v5375_v19 = vld [vmem:[#allocation5 + $0x4a8] sm:$0xf0]  ;;  %v6803_v21 = vld [vmem:[#allocation5 + $0x2f4] sm:$0xf0] }
  0xb0   : > { %1612 = vmatpush.bf16.msra.mxu0 %v5247_v27  ;;  %v6759_v27 = vld [vmem:[#allocation5 + $0x194] sm:$0xf0] }
  0xb1   : > { %v5299_v32 = vor.u32 %v6759_v27, %v5298_v26  ;;  %v5365_v27 = vld [vmem:[#allocation5 + $0x490] sm:$0xf] }
  0xb4   : > { %1613 = vmatpush.bf16.msra.mxu0 %v5239_v34  ;;  %v5290_v34 = vld [vmem:[#allocation5 + $0x180] sm:$0xf] }
  0xb8   : > { %1614 = vmatpush.bf16.msra.mxu0 %v5231_v42 }
  0xf8   : > { %v1089_v35 = vpop.f32.mrf.mxu0 }
  0xf9   : > { %v1090_v39 = vadd.f32 %v7161_v28, %v1089_v35 }
  0xfb   : > { %v7623_v43 = vmax.f32 %v1090_v39, 0.0  ;;  %v5291_v39 = vor.u32 %v6757_v36, %v5290_v34  ;;  %v7640_v34 = vld [vmem:[%s8031_s7] sm:$0x3] }
  0xfd   : > { %1096 = vst [vmem:[#allocation2 + $0x8] sm:$0xff] %v7623_v43 }
 0x100   : > { %v1091_v44 = vpop.f32.mrf.mxu0 }
 0x101   : > { %v1092_v46 = vadd.f32 %v7161_v28, %v1091_v44  ;;  %v6758_v28 = vld [vmem:[#allocation5 + $0x194] sm:$0xf] }
 0x102   : > { %v5303_v33 = vor.u32 %v6758_v28, %v5300_v29  ;;  %v6775_v28 = vld [vmem:[#allocation5 + $0x494] sm:$0xf0]  ;;  %v6774_v29 = vld [vmem:[#allocation5 + $0x494] sm:$0xf] }
 0x103   : > { %v7626_v50 = vmax.f32 %v1092_v46, 0.0  ;;  %v6787_v46 = vld [vmem:[#allocation5 + $0x4f4] sm:$0xf0] }
 0x104   : > { %v1230_v0 = vld [vmem:[#allocation2 + $0x4] sm:$0xff]  ;;  %v5414_v48 = vor.u32 %v6787_v46, %v5413_v45  ;;  %v5357_v45 = vld [vmem:[#allocation5 + $0x480] sm:$0xf]  ;;  %v6773_v46 = vld [vmem:[#allocation5 + $0x484] sm:$0xf0] }
 0x105   : > { %1097 = vst [vmem:[#allocation2 + $0x10] sm:$0xff] %v7626_v50  ;;  %v1115_v55 = vpack.c.bf16 %v7626_v50, %v7623_v43  ;;  %v1361_v16 = vld [vmem:[#allocation2 + $0x5] sm:$0xff] }
 0x106   : > { %v1493_v31 = vld [vmem:[#allocation2 + $0x6] sm:$0xff] }
 0x107   : > { %1210 = vmatmul.bf16.vlgmr.msra.gmra.mxu1 %v1115_v55  ;;  %1224 = vmatmul.bf16.vlgmr.msra.gmra.mxu2 %v1115_v55  ;;  %v1625_v42 = vld [vmem:[#allocation2 + $0x7] sm:$0xff] }
 0x108   : > { %1725 = vmatpush.bf16.msra.mxu1 %v5347_v51  ;;  %1739 = vmatpush.bf16.msra.mxu2 %v5351_v52  ;;  %v5418_v51 = vor.u32 %v6786_v47, %v5415_v49  ;;  %v5405_v52 = vld [vmem:[#allocation5 + $0x4e0] sm:$0xf]  ;;  %v6772_v47 = vld [vmem:[#allocation5 + $0x484] sm:$0xf]  ;;  %v5359_v49 = vld [vmem:[#allocation5 + $0x488] sm:$0xf0] }
 0x109   : > { %v5406_v55 = vor.u32 %v6785_v53, %v5405_v52  ;;  %v6799_v52 = vld [vmem:[#allocation5 + $0x2d4] sm:$0xf0]  ;;  %v5362_v53 = vor.u32 %v6772_v47, %v5359_v49  ;;  %v5519_v49 = vld [vmem:[#allocation5 + $0x348] sm:$0xf0] }
 0x10c   : > { %1726 = vmatpush.bf16.msra.mxu1 %v5339_v58  ;;  %1740 = vmatpush.bf16.msra.mxu2 %v5343_v59  ;;  %v1231_v1 = vld [vmem:[#allocation2 + $0xc] sm:$0xff]  ;;  %v5397_v58 = vld [vmem:[#allocation5 + $0x4d0] sm:$0xf] }
 0x10d   : > { %v1248_v5 = vpack.c.bf16 %v1231_v1, %v1230_v0  ;;  %v1362_v15 = vld [vmem:[#allocation2 + $0xd] sm:$0xff]  ;;  %v5389_v1 = vld [vmem:[#allocation5 + $0x4c0] sm:$0xf] }
 0x10e   : > { %v1380_v20 = vpack.c.bf16 %v1362_v15, %v1361_v16  ;;  %v1494_v30 = vld [vmem:[#allocation2 + $0xe] sm:$0xff]  ;;  %v5373_v15 = vld [vmem:[#allocation5 + $0x4a0] sm:$0xf]  ;;  %v6777_v16 = vld [vmem:[#allocation5 + $0x4a4] sm:$0xf0] }
 0x10f   : > { %1337 = vmatmul.bf16.vlgmr.msra.gmra.mxu3 %v1248_v5  ;;  %1351 = vmatmul.bf16.vlgmr.msrb.gmra.mxu0 %v1248_v5  ;;  %v1512_v35 = vpack.c.bf16 %v1494_v30, %v1493_v31  ;;  %v1626_v41 = vld [vmem:[#allocation2 + $0xf] sm:$0xff]  ;;  %v5391_v5 = vld [vmem:[#allocation5 + $0x4c8] sm:$0xf0]  ;;  %v5366_v30 = vor.u32 %v6775_v28, %v5365_v27 }
 0x110   : > { %1727 = vmatpush.bf16.msra.mxu1 %v5331_v2  ;;  %1741 = vmatpush.bf16.msra.mxu2 %v5335_v3  ;;  %v1644_v44 = vpack.c.bf16 %v1626_v41, %v1625_v42  ;;  %v6783_v59 = vld [vmem:[#allocation5 + $0x4d4] sm:$0xf0]  ;;  %v6781_v2 = vld [vmem:[#allocation5 + $0x4c4] sm:$0xf0]  ;;  %v6780_v3 = vld [vmem:[#allocation5 + $0x4c4] sm:$0xf]  ;;  %v5474_v41 = vor.u32 %v6800_v37, %v5471_v38 }
 0x111   : > { %1908 = vmatpush.bf16.msra.mxu3 %v5414_v48  ;;  %1922 = vmatpush.bf16.msrb.mxu0 %v5418_v51  ;;  %v5398_v61 = vor.u32 %v6783_v59, %v5397_v58  ;;  %v5390_v4 = vor.u32 %v6781_v2, %v5389_v1  ;;  %v5394_v6 = vor.u32 %v6780_v3, %v5391_v5  ;;  %v5367_v31 = vld [vmem:[#allocation5 + $0x498] sm:$0xf0]  ;;  %v5461_v51 = vld [vmem:[#allocation5 + $0x2d0] sm:$0xf]  ;;  %v6819_v59 = vld [vmem:[#allocation5 + $0x374] sm:$0xf0] }
 0x112   : > { %v5358_v48 = vor.u32 %v6773_v46, %v5357_v45  ;;  %v5462_v54 = vor.u32 %v6799_v52, %v5461_v51  ;;  %v5453_v2 = vld [vmem:[#allocation5 + $0x2c0] sm:$0xf]  ;;  %v6797_v3 = vld [vmem:[#allocation5 + $0x2c4] sm:$0xf0]  ;;  %v5439_v37 = vld [vmem:[#allocation5 + $0x2a8] sm:$0xf0] }
 0x113   : > { %v5454_v5 = vor.u32 %v6797_v3, %v5453_v2  ;;  %v5517_v38 = vld [vmem:[#allocation5 + $0x340] sm:$0xf]  ;;  %v5511_v2 = vld [vmem:[#allocation5 + $0x338] sm:$0xf0] }
 0x114   : > { %1728 = vmatpush.bf16.msra.mxu1 %v5323_v9  ;;  %1742 = vmatpush.bf16.msra.mxu2 %v5327_v10  ;;  %v6778_v9 = vld [vmem:[#allocation5 + $0x4b4] sm:$0xf]  ;;  %v5382_v10 = vor.u32 %v6779_v8, %v5381_v7  ;;  %v5533_v7 = vld [vmem:[#allocation5 + $0x360] sm:$0xf]  ;;  %v6817_v8 = vld [vmem:[#allocation5 + $0x364] sm:$0xf0] }
 0x115   : > { %1909 = vmatpush.bf16.msra.mxu3 %v5406_v55  ;;  %1923 = vmatpush.bf16.msrb.mxu0 %v5410_v57  ;;  %v5386_v13 = vor.u32 %v6778_v9, %v5383_v11  ;;  %v6798_v55 = vld [vmem:[#allocation5 + $0x2d4] sm:$0xf]  ;;  %v5541_v57 = vld [vmem:[#allocation5 + $0x370] sm:$0xf]  ;;  %v6816_v11 = vld [vmem:[#allocation5 + $0x364] sm:$0xf] }
 0x116   : > { %v5466_v58 = vor.u32 %v6798_v55, %v5463_v56  ;;  %v5542_v62 = vor.u32 %v6819_v59, %v5541_v57  ;;  %v6790_v55 = vld [vmem:[#allocation5 + $0x294] sm:$0xf]  ;;  %v5431_v57 = vld [vmem:[#allocation5 + $0x298] sm:$0xf0]  ;;  %v6811_v59 = vld [vmem:[#allocation5 + $0x334] sm:$0xf0] }
 0x117   : > { %1469 = vmatmul.bf16.vlgmr.msrb.gmra.mxu1 %v1380_v20  ;;  %1483 = vmatmul.bf16.vlgmr.msrb.gmra.mxu2 %v1380_v20  ;;  %v5477_v20 = vld [vmem:[#allocation5 + $0x2f0] sm:$0xf] }
 0x118   : > { %1729 = vmatpush.bf16.msra.mxu1 %v5315_v17  ;;  %1743 = vmatpush.bf16.msra.mxu2 %v5319_v18  ;;  %v6776_v17 = vld [vmem:[#allocation5 + $0x4a4] sm:$0xf]  ;;  %v5374_v18 = vor.u32 %v6777_v16, %v5373_v15  ;;  %v5478_v23 = vor.u32 %v6803_v21, %v5477_v20 }
 0x119   : > { %1910 = vmatpush.bf16.msra.mxu3 %v5398_v61  ;;  %1924 = vmatpush.bf16.msrb.mxu0 %v5402_v63  ;;  %v5378_v22 = vor.u32 %v6776_v17, %v5375_v19  ;;  %v5543_v61 = vld [vmem:[#allocation5 + $0x378] sm:$0xf0]  ;;  %v6794_v19 = vld [vmem:[#allocation5 + $0x2b4] sm:$0xf] }
 0x11a   : > { %v5546_v63 = vor.u32 %v6818_v60, %v5543_v61 }
 0x11c   : > { %1730 = vmatpush.bf16.msra.mxu1 %v5307_v24  ;;  %1744 = vmatpush.bf16.msra.mxu2 %v5311_v25  ;;  %v6802_v24 = vld [vmem:[#allocation5 + $0x2f4] sm:$0xf]  ;;  %v5479_v25 = vld [vmem:[#allocation5 + $0x2f8] sm:$0xf0] }
 0x11d   : > { %1911 = vmatpush.bf16.msra.mxu3 %v5390_v4  ;;  %1925 = vmatpush.bf16.msrb.mxu0 %v5394_v6  ;;  %v5482_v26 = vor.u32 %v6802_v24, %v5479_v25  ;;  %v6796_v4 = vld [vmem:[#allocation5 + $0x2c4] sm:$0xf]  ;;  %v5455_v6 = vld [vmem:[#allocation5 + $0x2c8] sm:$0xf0]  ;;  %v5525_v24 = vld [vmem:[#allocation5 + $0x350] sm:$0xf] }
 0x11e   : > { %v5458_v9 = vor.u32 %v6796_v4, %v5455_v6  ;;  %v6815_v25 = vld [vmem:[#allocation5 + $0x354] sm:$0xf0]  ;;  %v6789_v6 = vld [vmem:[#allocation5 + $0x284] sm:$0xf0] }
 0x11f   : > { %1601 = vmatmul.bf16.vlgmr.msrb.gmra.mxu3 %v1512_v35  ;;  %1615 = vmatmul.bf16.vlgmr.msra.gmra.mxu0 %v1512_v35  ;;  %v5370_v35 = vor.u32 %v6774_v29, %v5367_v31  ;;  %v5526_v28 = vor.u32 %v6815_v25, %v5525_v24  ;;  %v6814_v29 = vld [vmem:[#allocation5 + $0x354] sm:$0xf] }
 0x120   : > { %1731 = vmatpush.bf16.msra.mxu1 %v5299_v32  ;;  %1745 = vmatpush.bf16.msra.mxu2 %v5303_v33  ;;  %v5469_v32 = vld [vmem:[#allocation5 + $0x2e0] sm:$0xf]  ;;  %v6801_v33 = vld [vmem:[#allocation5 + $0x2e4] sm:$0xf0] }
 0x121   : > { %1912 = vmatpush.bf16.msra.mxu3 %v5382_v10  ;;  %1926 = vmatpush.bf16.msrb.mxu0 %v5386_v13  ;;  %v5470_v36 = vor.u32 %v6801_v33, %v5469_v32  ;;  %v5534_v10 = vor.u32 %v6817_v8, %v5533_v7  ;;  %v5535_v13 = vld [vmem:[#allocation5 + $0x368] sm:$0xf0]  ;;  %v5437_v32 = vld [vmem:[#allocation5 + $0x2a0] sm:$0xf]  ;;  %v6793_v33 = vld [vmem:[#allocation5 + $0x2a4] sm:$0xf0] }
 0x122   : > { %v5538_v16 = vor.u32 %v6816_v11, %v5535_v13  ;;  %v6788_v7 = vld [vmem:[#allocation5 + $0x284] sm:$0xf]  ;;  %v6809_v11 = vld [vmem:[#allocation5 + $0x324] sm:$0xf0] }
 0x124   : > { %1732 = vmatpush.bf16.msra.mxu1 %v5291_v39  ;;  %1746 = vmatpush.bf16.msra.mxu2 %v5295_v40  ;;  %v1119_v40 = vperm.slane %v7640_v34, 1 }
 0x125   : > { %1913 = vmatpush.bf16.msra.mxu3 %v5374_v18  ;;  %1927 = vmatpush.bf16.msrb.mxu0 %v5378_v22  ;;  %v6795_v18 = vld [vmem:[#allocation5 + $0x2b4] sm:$0xf0] }
 0x127   : > { %1733 = vmatmul.bf16.vlgmr.msra.gmra.mxu1 %v1644_v44  ;;  %1747 = vmatmul.bf16.vlgmr.msra.gmra.mxu2 %v1644_v44 }
 0x128   : > { %2036 = vmatpush.bf16.msrb.mxu1 %v5478_v23  ;;  %2050 = vmatpush.bf16.msrb.mxu2 %v5482_v26  ;;  %v5447_v23 = vld [vmem:[#allocation5 + $0x2b8] sm:$0xf0] }
 0x129   : > { %1914 = vmatpush.bf16.msra.mxu3 %v5366_v30  ;;  %1928 = vmatpush.bf16.msrb.mxu0 %v5370_v35  ;;  %v5450_v27 = vor.u32 %v6794_v19, %v5447_v23  ;;  %v5527_v30 = vld [vmem:[#allocation5 + $0x358] sm:$0xf0]  ;;  %v6792_v35 = vld [vmem:[#allocation5 + $0x2a4] sm:$0xf] }
 0x12a   : > { %v5442_v46 = vor.u32 %v6792_v35, %v5439_v37  ;;  %v5607_v23 = vld [vmem:[#allocation5 + $0x3f8] sm:$0xf0]  ;;  %v6832_v37 = vld [vmem:[#allocation5 + $0x3e4] sm:$0xf] }
 0x12c   : > { %2037 = vmatpush.bf16.msrb.mxu1 %v5470_v36  ;;  %2051 = vmatpush.bf16.msrb.mxu2 %v5474_v41  ;;  %v5438_v36 = vor.u32 %v6793_v33, %v5437_v32  ;;  %v6813_v41 = vld [vmem:[#allocation5 + $0x344] sm:$0xf0]  ;;  %v5597_v32 = vld [vmem:[#allocation5 + $0x3e0] sm:$0xf] }
 0x12d   : > { %1915 = vmatpush.bf16.msra.mxu3 %v5358_v48  ;;  %1929 = vmatpush.bf16.msrb.mxu0 %v5362_v53  ;;  %v5518_v47 = vor.u32 %v6813_v41, %v5517_v38  ;;  %v6812_v48 = vld [vmem:[#allocation5 + $0x344] sm:$0xf]  ;;  %v5429_v53 = vld [vmem:[#allocation5 + $0x290] sm:$0xf]  ;;  %v6833_v33 = vld [vmem:[#allocation5 + $0x3e4] sm:$0xf0] }
 0x12e   : > { %v5599_v38 = vld [vmem:[#allocation5 + $0x3e8] sm:$0xf0] }
 0x130   : > { %2038 = vmatpush.bf16.msrb.mxu1 %v5462_v54  ;;  %2052 = vmatpush.bf16.msrb.mxu2 %v5466_v58  ;;  %v6791_v54 = vld [vmem:[#allocation5 + $0x294] sm:$0xf0]  ;;  %v5509_v58 = vld [vmem:[#allocation5 + $0x330] sm:$0xf] }
 0x131   : > { %2168 = vmatpush.bf16.msrb.mxu3 %v5542_v62  ;;  %2182 = vmatpush.bf16.msra.mxu0 %v5546_v63  ;;  %v5430_v56 = vor.u32 %v6791_v54, %v5429_v53  ;;  %v5434_v62 = vor.u32 %v6790_v55, %v5431_v57  ;;  %v5510_v63 = vor.u32 %v6811_v59, %v5509_v58  ;;  %v5487_v53 = vld [vmem:[#allocation5 + $0x308] sm:$0xf0]  ;;  %v6831_v57 = vld [vmem:[#allocation5 + $0x3d4] sm:$0xf0] }
 0x134   : > { %2039 = vmatpush.bf16.msrb.mxu1 %v5454_v5  ;;  %2053 = vmatpush.bf16.msrb.mxu2 %v5458_v9  ;;  %v5421_v5 = vld [vmem:[#allocation5 + $0x280] sm:$0xf]  ;;  %v5423_v9 = vld [vmem:[#allocation5 + $0x288] sm:$0xf0] }
 0x135   : > { %2169 = vmatpush.bf16.msrb.mxu3 %v5534_v10  ;;  %2183 = vmatpush.bf16.msra.mxu0 %v5538_v16  ;;  %v5422_v8 = vor.u32 %v6789_v6, %v5421_v5  ;;  %v5501_v10 = vld [vmem:[#allocation5 + $0x320] sm:$0xf]  ;;  %v5426_v13 = vor.u32 %v6788_v7, %v5423_v9  ;;  %v6808_v16 = vld [vmem:[#allocation5 + $0x324] sm:$0xf]  ;;  %v5583_v6 = vld [vmem:[#allocation5 + $0x3c8] sm:$0xf0] }
 0x138   : > { %2054 = vmatpush.bf16.msrb.mxu2 %v5450_v27  ;;  %v5493_v27 = vld [vmem:[#allocation5 + $0x310] sm:$0xf] }
 0x139   : > { %2170 = vmatpush.bf16.msrb.mxu3 %v5526_v28  ;;  %v6807_v28 = vld [vmem:[#allocation5 + $0x314] sm:$0xf0] }
 0x13a   : > { %v5494_v35 = vor.u32 %v6807_v28, %v5493_v27  ;;  %v6824_v27 = vld [vmem:[#allocation5 + $0x3a4] sm:$0xf] }
 0x13c   : > { %2055 = vmatpush.bf16.msrb.mxu2 %v5442_v46  ;;  %v5598_v46 = vor.u32 %v6833_v33, %v5597_v32 }
 0x13d   : > { %2171 = vmatpush.bf16.msrb.mxu3 %v5518_v47  ;;  %v5602_v47 = vor.u32 %v6832_v37, %v5599_v38 }
 0x140   : > { %2056 = vmatpush.bf16.msrb.mxu2 %v5434_v62 }
 0x141   : > { %2172 = vmatpush.bf16.msrb.mxu3 %v5510_v63  ;;  %v5581_v63 = vld [vmem:[#allocation5 + $0x3c0] sm:$0xf] }
 0x144   : > { %2057 = vmatpush.bf16.msrb.mxu2 %v5426_v13  ;;  %v6827_v13 = vld [vmem:[#allocation5 + $0x3b4] sm:$0xf0] }
 0x184   : > { %v7642_v39 = vpop.f32.mrf.mxu1 }
 0x18a   : > { %v7631_v0 = vpop.f32.mrf.mxu2 }
 0x18b   : > { %v1226_v1 = vadd.f32 %v7631_v0, %v1119_v40  ;;  %v5445_v0 = vld [vmem:[#allocation5 + $0x2b0] sm:$0xf] }
 0x18c   : > { %v7633_v12 = vpop.f32.mrf.mxu0  ;;  %v7651_v20 = vpop.f32.mrf.mxu1  ;;  %v5446_v22 = vor.u32 %v6795_v18, %v5445_v0  ;;  %v5605_v0 = vld [vmem:[#allocation5 + $0x3f0] sm:$0xf] }
 0x18d   : > { %v1358_v17 = vadd.f32 %v7633_v12, %v1226_v1  ;;  %v5530_v12 = vor.u32 %v6814_v29, %v5527_v30  ;;  %v6810_v1 = vld [vmem:[#allocation5 + $0x334] sm:$0xf] }
 0x18e   : > { %2040 = vmatpush.bf16.msrb.mxu1 %v5446_v22  ;;  %v5514_v4 = vor.u32 %v6810_v1, %v5511_v2  ;;  %v6834_v22 = vld [vmem:[#allocation5 + $0x3f4] sm:$0xf]  ;;  %v6829_v1 = vld [vmem:[#allocation5 + $0x3c4] sm:$0xf0]  ;;  %v6828_v2 = vld [vmem:[#allocation5 + $0x3c4] sm:$0xf] }
 0x18f   : > { %2184 = vmatpush.bf16.msra.mxu0 %v5530_v12  ;;  %v6806_v29 = vld [vmem:[#allocation5 + $0x314] sm:$0xf]  ;;  %v5582_v5 = vor.u32 %v6829_v1, %v5581_v63 }
 0x192   : > { %v7635_v14 = vpop.f32.mrf.mxu2  ;;  %2041 = vmatpush.bf16.msrb.mxu1 %v5438_v36 }
 0x193   : > { %v1228_v31 = vadd.f32 %v7635_v14, %v1119_v40  ;;  %v5522_v14 = vor.u32 %v6812_v48, %v5519_v49  ;;  %v1118_v48 = vperm.slane %v7640_v34, 0  ;;  %v6830_v34 = vld [vmem:[#allocation5 + $0x3d4] sm:$0xf] }
 0x194   : > { %v7645_v42 = vpop.f32.mrf.mxu0  ;;  %v7659_v3 = vpop.f32.mrf.mxu1 }
 0x195   : > { %v1360_v40 = vadd.f32 %v7645_v42, %v1228_v31  ;;  %2185 = vmatpush.bf16.msra.mxu0 %v5522_v14  ;;  %v5495_v31 = vld [vmem:[#allocation5 + $0x318] sm:$0xf0]  ;;  %v6805_v14 = vld [vmem:[#allocation5 + $0x304] sm:$0xf0]  ;;  %v1212_v58 = vadd.f32 %v7642_v39, %v1118_v48  ;;  %v5586_v39 = vor.u32 %v6828_v2, %v5583_v6 }
 0x196   : > { %2042 = vmatpush.bf16.msrb.mxu1 %v5430_v56  ;;  %v5498_v36 = vor.u32 %v6806_v29, %v5495_v31  ;;  %v5589_v56 = vld [vmem:[#allocation5 + $0x3d0] sm:$0xf]  ;;  %v5567_v29 = vld [vmem:[#allocation5 + $0x3a8] sm:$0xf0] }
 0x197   : > { %v5590_v59 = vor.u32 %v6831_v57, %v5589_v56  ;;  %v5570_v32 = vor.u32 %v6824_v27, %v5567_v29  ;;  %v5549_v56 = vld [vmem:[#allocation5 + $0x380] sm:$0xf]  ;;  %v6821_v57 = vld [vmem:[#allocation5 + $0x384] sm:$0xf0]  ;;  %v5647_v29 = vld [vmem:[#allocation5 + $0x448] sm:$0xf0] }
 0x199   : > { %2186 = vmatpush.bf16.msra.mxu0 %v5514_v4 }
 0x19a   : > { %v1484_v44 = vpop.f32.mrf.mxu2  ;;  %2043 = vmatpush.bf16.msrb.mxu1 %v5422_v8 }
 0x19b   : > { %v1490_v26 = vadd.f32 %v1484_v44, %v1358_v17  ;;  %v7656_v44 = vpop.f32.mrf.mxu3  ;;  %v5503_v17 = vld [vmem:[#allocation5 + $0x328] sm:$0xf0] }
 0x19c   : > { %v1616_v21 = vpop.f32.mrf.mxu0  ;;  %v5506_v19 = vor.u32 %v6808_v16, %v5503_v17  ;;  %v1357_v62 = vadd.f32 %v7656_v44, %v1212_v58  ;;  %v5573_v44 = vld [vmem:[#allocation5 + $0x3b0] sm:$0xf]  ;;  %v1214_v16 = vadd.f32 %v7651_v20, %v1118_v48  ;;  %v6820_v58 = vld [vmem:[#allocation5 + $0x384] sm:$0xf] }
 0x19d   : > { %v1622_v45 = vadd.f32 %v1616_v21, %v1490_v26  ;;  %v6835_v21 = vld [vmem:[#allocation5 + $0x3f4] sm:$0xf0]  ;;  %v5610_v26 = vor.u32 %v6834_v22, %v5607_v23 }
 0x19e   : > { %v5606_v25 = vor.u32 %v6835_v21, %v5605_v0  ;;  %2187 = vmatpush.bf16.msra.mxu0 %v5506_v19  ;;  %v5574_v19 = vor.u32 %v6827_v13, %v5573_v44  ;;  %v5575_v21 = vld [vmem:[#allocation5 + $0x3b8] sm:$0xf0]  ;;  %v6849_v13 = vld [vmem:[#allocation5 + $0x464] sm:$0xf0] }
 0x19f   : > { %2314 = vmatpush.bf16.msra.mxu2 %v5610_v26  ;;  %v6825_v26 = vld [vmem:[#allocation5 + $0x3a4] sm:$0xf0] }
 0x1a0   : > { %2300 = vmatpush.bf16.msra.mxu1 %v5606_v25  ;;  %v5565_v25 = vld [vmem:[#allocation5 + $0x3a0] sm:$0xf] }
 0x1a1   : > { %v5566_v20 = vor.u32 %v6825_v26, %v5565_v25  ;;  %v5645_v26 = vld [vmem:[#allocation5 + $0x440] sm:$0xf] }
 0x1a2   : > { %v1486_v15 = vpop.f32.mrf.mxu2  ;;  %2188 = vmatpush.bf16.msra.mxu0 %v5498_v36 }
 0x1a3   : > { %v1492_v60 = vadd.f32 %v1486_v15, %v1360_v40  ;;  %v5502_v15 = vor.u32 %v6809_v11, %v5501_v10  ;;  %v7661_v30 = vpop.f32.mrf.mxu3  ;;  %v6804_v40 = vld [vmem:[#allocation5 + $0x304] sm:$0xf]  ;;  %2315 = vmatpush.bf16.msra.mxu2 %v5602_v47  ;;  %v1489_v10 = vadd.f32 %v7659_v3, %v1357_v62  ;;  %v5550_v62 = vor.u32 %v6821_v57, %v5549_v56 }
 0x1a4   : > { %v1618_v42 = vpop.f32.mrf.mxu0  ;;  %2301 = vmatpush.bf16.msra.mxu1 %v5598_v46  ;;  %v5490_v55 = vor.u32 %v6804_v40, %v5487_v53 }
 0x1a5   : > { %v1624_v18 = vadd.f32 %v1618_v42, %v1492_v60  ;;  %2173 = vmatpush.bf16.msrb.mxu3 %v5502_v15  ;;  %v5591_v60 = vld [vmem:[#allocation5 + $0x3d8] sm:$0xf0]  ;;  %v6826_v15 = vld [vmem:[#allocation5 + $0x3b4] sm:$0xf] }
 0x1a6   : > { %2189 = vmatpush.bf16.msra.mxu0 %v5490_v55  ;;  %v5578_v23 = vor.u32 %v6826_v15, %v5575_v21  ;;  %v6846_v21 = vld [vmem:[#allocation5 + $0x454] sm:$0xf] }
 0x1a8   : > { %2302 = vmatpush.bf16.msra.mxu1 %v5590_v59  ;;  %v5551_v59 = vld [vmem:[#allocation5 + $0x388] sm:$0xf0] }
 0x1a9   : > { %2174 = vmatpush.bf16.msrb.mxu3 %v5494_v35  ;;  %v5554_v63 = vor.u32 %v6820_v58, %v5551_v59  ;;  %v5613_v58 = vld [vmem:[#allocation5 + $0x400] sm:$0xf] }
 0x1aa   : > { %v1748_v51 = vpop.f32.mrf.mxu2 }
 0x1ab   : > { %v1754_v52 = vadd.f32 %v1748_v51, %v1622_v45  ;;  %v5485_v51 = vld [vmem:[#allocation5 + $0x300] sm:$0xf]  ;;  %v1602_v4 = vpop.f32.mrf.mxu3 }
 0x1ac   : > { %v5486_v54 = vor.u32 %v6805_v14, %v5485_v51  ;;  %2303 = vmatpush.bf16.msra.mxu1 %v5582_v5  ;;  %v1621_v17 = vadd.f32 %v1602_v4, %v1489_v10  ;;  %v5559_v51 = vld [vmem:[#allocation5 + $0x398] sm:$0xf0]  ;;  %v5669_v5 = vld [vmem:[#allocation5 + $0x470] sm:$0xf] }
 0x1ad   : > { %v5352_v61 = vmul.f32 -1.442695, %v1754_v52  ;;  %v7666_v52 = vpop.f32.mrf.mxu1 }
 0x1ae   : > { %2175 = vmatpush.bf16.msrb.mxu3 %v5486_v54 }
 0x1af   : > { %7167 = vpow2.f32 %v5352_v61  ;;  %v5594_v61 = vor.u32 %v6830_v34, %v5591_v60 }
 0x1b0   : > { %2304 = vmatpush.bf16.msra.mxu1 %v5574_v19  ;;  %v6847_v19 = vld [vmem:[#allocation5 + $0x454] sm:$0xf0] }
 0x1b1   : > { %2316 = vmatpush.bf16.msra.mxu2 %v5594_v61 }
 0x1b2   : > { %v1750_v24 = vpop.f32.mrf.mxu2 }
 0x1b3   : > { %v1756_v12 = vadd.f32 %v1750_v24, %v1624_v18  ;;  %v1359_v24 = vadd.f32 %v7661_v30, %v1214_v16  ;;  %v1604_v35 = vpop.f32.mrf.mxu3  ;;  %v6848_v16 = vld [vmem:[#allocation5 + $0x464] sm:$0xf] }
 0x1b4   : > { %2305 = vmatpush.bf16.msra.mxu1 %v5566_v20  ;;  %v6844_v20 = vld [vmem:[#allocation5 + $0x444] sm:$0xf] }
 0x1b5   : > { %v7168_v41 = vpop.eup %7167  ;;  %v5353_v45 = vmul.f32 -1.442695, %v1756_v12  ;;  %2317 = vmatpush.bf16.msra.mxu2 %v5586_v39  ;;  %v1734_v0 = vpop.f32.mrf.mxu1  ;;  %v1491_v37 = vadd.f32 %v7666_v52, %v1359_v24  ;;  %v5671_v39 = vld [vmem:[#allocation5 + $0x478] sm:$0xf0] }
 0x1b6   : > { %v7664_v49 = vadd.f32 1.0, %v7168_v41  ;;  %v1753_v33 = vadd.f32 %v1734_v0, %v1621_v17  ;;  %v5557_v41 = vld [vmem:[#allocation5 + $0x390] sm:$0xf]  ;;  %v5663_v17 = vld [vmem:[#allocation5 + $0x468] sm:$0xf0] }
 0x1b7   : > { %7169 = vpow2.f32 %v5353_v45  ;;  %v6823_v45 = vld [vmem:[#allocation5 + $0x394] sm:$0xf0]  ;;  %v1623_v14 = vadd.f32 %v1604_v35, %v1491_v37  ;;  %v5666_v0 = vor.u32 %v6848_v16, %v5663_v17  ;;  %v6842_v35 = vld [vmem:[#allocation5 + $0x434] sm:$0xf]  ;;  %v5729_v16 = vld [vmem:[#allocation8 + $0x268] sm:$0xf0] }
 0x1b8   : > { %7171 = vrcp.f32 %v7664_v49  ;;  %v1776_v18 = vand.u32 2147483648, %v7664_v49  ;;  %v1774_v3 = vand.u32 2147483647, %v7664_v49  ;;  %vm1770_vm2 = vweird.f32 %v7664_v49 }
 0x1b9   : > { %2318 = vmatpush.bf16.msra.mxu2 %v5578_v23  ;;  %v5558_v48 = vor.u32 %v6823_v45, %v5557_v41  ;;  %v5629_v45 = vld [vmem:[#allocation5 + $0x420] sm:$0xf] }
 0x1ba   : > { %v1777_v31 = vor.u32 1.1754944e-38, %v1776_v18  ;;  %vm1775_vm4 = vcmp.eq.f32.partialorder %v1774_v3, 8.507059e+37  ;;  %v5653_v18 = vld [vmem:[#allocation5 + $0x450] sm:$0xf] }
 0x1bb   : > { %2306 = vmatpush.bf16.msra.mxu1 %v5558_v48  ;;  %v5654_v24 = vor.u32 %v6847_v19, %v5653_v18  ;;  %v6840_v48 = vld [vmem:[#allocation5 + $0x424] sm:$0xf]  ;;  %v6862_v18 = vld [vmem:[#allocation8 + $0x254] sm:$0xf] }
 0x1bd   : > { %v7170_v42 = vpop.eup %7169  ;;  %2319 = vmatpush.bf16.msra.mxu2 %v5570_v32  ;;  %v1736_v34 = vpop.f32.mrf.mxu1  ;;  %v5637_v32 = vld [vmem:[#allocation5 + $0x430] sm:$0xf] }
 0x1be   : > { %v7172_v7 = vpop.eup %7171  ;;  %v7671_v8 = vadd.f32 1.0, %v7170_v42  ;;  %v1755_v2 = vadd.f32 %v1736_v34, %v1623_v14 }
 0x1bf   : > { %v1766_v9 = vmul.f32 %v7172_v7, %v7664_v49  ;;  %vm1771_vm1 = vweird.f32 %v7172_v7  ;;  %v6822_v49 = vld [vmem:[#allocation5 + $0x394] sm:$0xf]  ;;  %2307 = vmatpush.bf16.msra.mxu1 %v5550_v62  ;;  %v6836_v62 = vld [vmem:[#allocation5 + $0x404] sm:$0xf] }
 0x1c0   : > { %7173 = vrcp.f32 %v7671_v8  ;;  %vm1772_vm3 = vmor %vm1770_vm2, %vm1771_vm1  ;;  %v1791_v40 = vand.u32 2147483648, %v7671_v8  ;;  %v5562_v53 = vor.u32 %v6822_v49, %v5559_v51  ;;  %v1789_v55 = vand.u32 2147483647, %v7671_v8  ;;  %v5631_v49 = vld [vmem:[#allocation5 + $0x428] sm:$0xf0] }
 0x1c1   : > { %v1767_v11 = vsub.f32 1.0, %v1766_v9  ;;  %vm1785_vm6 = vweird.f32 %v7671_v8  ;;  %v5634_v14 = vor.u32 %v6840_v48, %v5631_v49  ;;  %v6882_v49 = vld [vmem:[#allocation8 + $0x74] sm:$0xf] }
 0x1c2   : > { %2320 = vmatpush.bf16.msra.mxu2 %v5562_v53  ;;  %v1792_v1 = vor.u32 1.1754944e-38, %v1791_v40  ;;  %vm1790_vm8 = vcmp.eq.f32.partialorder %v1789_v55, 8.507059e+37  ;;  %v5621_v40 = vld [vmem:[#allocation5 + $0x410] sm:$0xf]  ;;  %v6839_v53 = vld [vmem:[#allocation5 + $0x414] sm:$0xf0] }
 0x1c3   : > { %v1768_v22 = vmul.f32 %v7172_v7, %v1767_v11  ;;  %v5661_v11 = vld [vmem:[#allocation5 + $0x460] sm:$0xf]  ;;  %v5623_v55 = vld [vmem:[#allocation5 + $0x418] sm:$0xf0]  ;;  %v5622_v57 = vor.u32 %v6839_v53, %v5621_v40  ;;  %v5687_v53 = vld [vmem:[#allocation8 + $0x210] sm:$0xf] }
 0x1c5   : > { %v1769_v28 = vadd.f32 %v7172_v7, %v1768_v22  ;;  %v5655_v22 = vld [vmem:[#allocation5 + $0x458] sm:$0xf0] }
 0x1c6   : > { %v7174_v12 = vpop.eup %7173  ;;  %2321 = vmatpush.bf16.msra.mxu2 %v5554_v63  ;;  %v5658_v25 = vor.u32 %v6846_v21, %v5655_v22  ;;  %v5615_v63 = vld [vmem:[#allocation5 + $0x408] sm:$0xf0]  ;;  %v5721_v21 = vld [vmem:[#allocation8 + $0x258] sm:$0xf0] }
 0x1c7   : > { %v1781_v36 = vmul.f32 %v7174_v12, %v7671_v8  ;;  %v1773_v30 = vsel %vm1772_vm3, %v7172_v7, %v1769_v28  ;;  %vm1786_vm5 = vweird.f32 %v7174_v12  ;;  %v6851_v7 = vld [vmem:[#allocation5 + $0x474] sm:$0xf0]  ;;  %v6850_v8 = vld [vmem:[#allocation5 + $0x474] sm:$0xf]  ;;  %v6845_v28 = vld [vmem:[#allocation5 + $0x444] sm:$0xf0]  ;;  %v5724_v22 = vor.u32 %v6862_v18, %v5721_v21 }
 0x1c8   : > { %v1778_v38 = vsel %vm1775_vm4, %v1777_v31, %v1773_v30  ;;  %vm1787_vm7 = vmor %vm1785_vm6, %vm1786_vm5  ;;  %v5670_v10 = vor.u32 %v6851_v7, %v5669_v5  ;;  %v5674_v44 = vor.u32 %v6850_v8, %v5671_v39  ;;  %v5650_v31 = vor.u32 %v6844_v20, %v5647_v29  ;;  %v5735_v5 = vld [vmem:[#allocation8 + $0x270] sm:$0xf]  ;;  %v6866_v7 = vld [vmem:[#allocation8 + $0x274] sm:$0xf] }
 0x1c9   : > { %v1782_v46 = vsub.f32 1.0, %v1781_v36  ;;  %v1795_v47 = vmul.f32 %v1778_v38, %v1753_v33  ;;  %v6843_v33 = vld [vmem:[#allocation5 + $0x434] sm:$0xf0]  ;;  %v5639_v36 = vld [vmem:[#allocation5 + $0x438] sm:$0xf0] }
 0x1ca   : > { %v5638_v38 = vor.u32 %v6843_v33, %v5637_v32  ;;  %v5642_v41 = vor.u32 %v6842_v35, %v5639_v36  ;;  %v5737_v39 = vld [vmem:[#allocation8 + $0x278] sm:$0xf0]  ;;  %v5703_v20 = vld [vmem:[#allocation8 + $0x230] sm:$0xf]  ;;  %v6859_v29 = vld [vmem:[#allocation8 + $0x234] sm:$0xf0] }
 0x1cb   : > { %v1783_v54 = vmul.f32 %v7174_v12, %v1782_v46  ;;  %v1797_v52 = vadd.f32 %v1795_v47, %v7623_v43  ;;  %v6841_v47 = vld [vmem:[#allocation5 + $0x424] sm:$0xf0]  ;;  %v5705_v32 = vld [vmem:[#allocation8 + $0x238] sm:$0xf0]  ;;  %v5695_v36 = vld [vmem:[#allocation8 + $0x220] sm:$0xf] }
 0x1cc   : > { %v5630_v51 = vor.u32 %v6841_v47, %v5629_v45  ;;  %v5799_v45 = vld [vmem:[#allocation8 + $0x70] sm:$0xf]  ;;  %v5865_v18 = vld [vmem:[#allocation8 + $0xf8] sm:$0xf0] }
 0x1cd   : > { %v1784_v60 = vadd.f32 %v7174_v12, %v1783_v54  ;;  %v7687_v61 = vmul.f32 0.70710677, %v1797_v52  ;;  %v6838_v54 = vld [vmem:[#allocation5 + $0x414] sm:$0xf] }
 0x1ce   : > { %v5626_v34 = vor.u32 %v6838_v54, %v5623_v55  ;;  %v6855_v54 = vld [vmem:[#allocation8 + $0x214] sm:$0xf0]  ;;  %v6854_v55 = vld [vmem:[#allocation8 + $0x214] sm:$0xf] }
 0x1cf   : > { %v1788_v43 = vsel %vm1787_vm7, %v7174_v12, %v1784_v60  ;;  %1801 = vst [vmem:[#allocation2 + $0x8] sm:$0xff] %v7687_v61  ;;  %v5646_v12 = vor.u32 %v6845_v28, %v5645_v26  ;;  %v6837_v60 = vld [vmem:[#allocation5 + $0x404] sm:$0xf0] }
 0x1d0   : > { %v1793_v42 = vsel %vm1790_vm8, %v1792_v1, %v1788_v43  ;;  %v5614_v1 = vor.u32 %v6837_v60, %v5613_v58 }
 0x1d1   : > { %v1796_v4 = vmul.f32 %v1793_v42, %v1755_v2  ;;  %v5618_v2 = vor.u32 %v6836_v62, %v5615_v63  ;;  %v6880_v62 = vld [vmem:[#allocation8 + $0x64] sm:$0xf]  ;;  %v5793_v63 = vld [vmem:[#allocation8 + $0x68] sm:$0xf0] }
 0x1d3   : > { %v1798_v6 = vadd.f32 %v1796_v4, %v7626_v50  ;;  %v5662_v50 = vor.u32 %v6849_v13, %v5661_v11  ;;  %v6865_v11 = vld [vmem:[#allocation8 + $0x264] sm:$0xf0]  ;;  %v6864_v13 = vld [vmem:[#allocation8 + $0x264] sm:$0xf] }
 0x1d4   : > { %v5732_v17 = vor.u32 %v6864_v13, %v5729_v16  ;;  %v6878_v13 = vld [vmem:[#allocation8 + $0x54] sm:$0xf]  ;;  %v5863_v16 = vld [vmem:[#allocation8 + $0xf0] sm:$0xf] }
 0x1d5   : > { %v7692_v9 = vmul.f32 0.70710677, %v1798_v6  ;;  %v6867_v6 = vld [vmem:[#allocation8 + $0x274] sm:$0xf0] }
 0x1d6   : > { %v1936_v3 = vld [vmem:[#allocation2 + $0x4] sm:$0xff]  ;;  %v5736_v8 = vor.u32 %v6867_v6, %v5735_v5  ;;  %v6853_v5 = vld [vmem:[#allocation8 + $0x204] sm:$0xf0]  ;;  %v6852_v6 = vld [vmem:[#allocation8 + $0x204] sm:$0xf] }
 0x1d7   : > { %1802 = vst [vmem:[#allocation2 + $0x10] sm:$0xff] %v7692_v9  ;;  %v1820_v15 = vpack.c.bf16 %v7692_v9, %v7687_v61  ;;  %v2068_v37 = vld [vmem:[#allocation2 + $0x5] sm:$0xff] }
 0x1d8   : > { %v2200_v56 = vld [vmem:[#allocation2 + $0x6] sm:$0xff] }
 0x1d9   : > { %1916 = vmatmul.bf16.vlgmr.msra.gmra.mxu3 %v1820_v15  ;;  %1930 = vmatmul.bf16.vlgmr.msrb.gmra.mxu0 %v1820_v15  ;;  %v2332_v42 = vld [vmem:[#allocation2 + $0x7] sm:$0xff] }
 0x1da   : > { %2432 = vmatpush.bf16.msra.mxu3 %v5670_v10  ;;  %2446 = vmatpush.bf16.msrb.mxu0 %v5674_v44  ;;  %v5740_v10 = vor.u32 %v6866_v7, %v5737_v39  ;;  %v5727_v44 = vld [vmem:[#allocation8 + $0x260] sm:$0xf]  ;;  %v5783_v39 = vld [vmem:[#allocation8 + $0x50] sm:$0xf] }
 0x1db   : > { %v5728_v15 = vor.u32 %v6865_v11, %v5727_v44 }
 0x1de   : > { %2433 = vmatpush.bf16.msra.mxu3 %v5662_v50  ;;  %2447 = vmatpush.bf16.msrb.mxu0 %v5666_v0  ;;  %v1937_v23 = vld [vmem:[#allocation2 + $0xc] sm:$0xff]  ;;  %v5719_v50 = vld [vmem:[#allocation8 + $0x250] sm:$0xf] }
 0x1df   : > { %v1955_v27 = vpack.c.bf16 %v1937_v23, %v1936_v3  ;;  %v2069_v30 = vld [vmem:[#allocation2 + $0xd] sm:$0xff]  ;;  %v5711_v23 = vld [vmem:[#allocation8 + $0x240] sm:$0xf] }
 0x1e0   : > { %v2087_v46 = vpack.c.bf16 %v2069_v30, %v2068_v37  ;;  %v2201_v52 = vld [vmem:[#allocation2 + $0xe] sm:$0xff]  ;;  %v6857_v30 = vld [vmem:[#allocation8 + $0x224] sm:$0xf0]  ;;  %v6856_v37 = vld [vmem:[#allocation8 + $0x224] sm:$0xf] }
 0x1e1   : > { %2044 = vmatmul.bf16.vlgmr.msrb.gmra.mxu1 %v1955_v27  ;;  %2058 = vmatmul.bf16.vlgmr.msrb.gmra.mxu2 %v1955_v27  ;;  %v2219_v59 = vpack.c.bf16 %v2201_v52, %v2200_v56  ;;  %v2333_v43 = vld [vmem:[#allocation2 + $0xf] sm:$0xff]  ;;  %v5713_v27 = vld [vmem:[#allocation8 + $0x248] sm:$0xf0]  ;;  %v5688_v52 = vor.u32 %v6855_v54, %v5687_v53 }
 0x1e2   : > { %2434 = vmatpush.bf16.msra.mxu3 %v5654_v24  ;;  %2448 = vmatpush.bf16.msrb.mxu0 %v5658_v25  ;;  %v2351_v4 = vpack.c.bf16 %v2333_v43, %v2332_v42  ;;  %v6863_v0 = vld [vmem:[#allocation8 + $0x254] sm:$0xf0]  ;;  %v6861_v24 = vld [vmem:[#allocation8 + $0x244] sm:$0xf0]  ;;  %v6860_v25 = vld [vmem:[#allocation8 + $0x244] sm:$0xf] }
 0x1e3   : > { %2619 = vmatpush.bf16.msrb.mxu1 %v5736_v8  ;;  %2633 = vmatpush.bf16.msrb.mxu2 %v5740_v10  ;;  %v5720_v19 = vor.u32 %v6863_v0, %v5719_v50  ;;  %v5712_v26 = vor.u32 %v6861_v24, %v5711_v23  ;;  %v5716_v28 = vor.u32 %v6860_v25, %v5713_v27  ;;  %v5689_v56 = vld [vmem:[#allocation8 + $0x218] sm:$0xf0]  ;;  %v5681_v8 = vld [vmem:[#allocation8 + $0x208] sm:$0xf0]  ;;  %v6879_v10 = vld [vmem:[#allocation8 + $0x54] sm:$0xf0] }
 0x1e4   : > { %v5684_v44 = vor.u32 %v6852_v6, %v5681_v8  ;;  %v5784_v11 = vor.u32 %v6879_v10, %v5783_v39  ;;  %v6899_v50 = vld [vmem:[#allocation8 + $0xf4] sm:$0xf0]  ;;  %v6898_v0 = vld [vmem:[#allocation8 + $0xf4] sm:$0xf]  ;;  %v6877_v23 = vld [vmem:[#allocation8 + $0x44] sm:$0xf0] }
 0x1e5   : > { %v5868_v21 = vor.u32 %v6898_v0, %v5865_v18  ;;  %v6876_v24 = vld [vmem:[#allocation8 + $0x44] sm:$0xf]  ;;  %v5777_v27 = vld [vmem:[#allocation8 + $0x48] sm:$0xf0]  ;;  %v6894_v53 = vld [vmem:[#allocation8 + $0xd4] sm:$0xf] }
 0x1e6   : > { %2435 = vmatpush.bf16.msra.mxu3 %v5646_v12  ;;  %2449 = vmatpush.bf16.msrb.mxu0 %v5650_v31  ;;  %v6858_v12 = vld [vmem:[#allocation8 + $0x234] sm:$0xf]  ;;  %v5704_v31 = vor.u32 %v6859_v29, %v5703_v20  ;;  %v6897_v20 = vld [vmem:[#allocation8 + $0xe4] sm:$0xf0]  ;;  %v5849_v54 = vld [vmem:[#allocation8 + $0xd8] sm:$0xf0] }
 0x1e7   : > { %2620 = vmatpush.bf16.msrb.mxu1 %v5728_v15  ;;  %2634 = vmatpush.bf16.msrb.mxu2 %v5732_v17  ;;  %v5708_v33 = vor.u32 %v6858_v12, %v5705_v32  ;;  %v5785_v15 = vld [vmem:[#allocation8 + $0x58] sm:$0xf0]  ;;  %v5780_v12 = vor.u32 %v6876_v24, %v5777_v27  ;;  %v6896_v32 = vld [vmem:[#allocation8 + $0xe4] sm:$0xf]  ;;  %v6869_v27 = vld [vmem:[#allocation8 + $0x4] sm:$0xf0] }
 0x1e8   : > { %v5788_v17 = vor.u32 %v6878_v13, %v5785_v15  ;;  %v5751_v13 = vld [vmem:[#allocation8 + $0x10] sm:$0xf]  ;;  %v6871_v15 = vld [vmem:[#allocation8 + $0x14] sm:$0xf0] }
 0x1e9   : > { %2176 = vmatmul.bf16.vlgmr.msrb.gmra.mxu3 %v2087_v46  ;;  %2190 = vmatmul.bf16.vlgmr.msra.gmra.mxu0 %v2087_v46  ;;  %v6883_v46 = vld [vmem:[#allocation8 + $0x74] sm:$0xf0] }
 0x1ea   : > { %2436 = vmatpush.bf16.msra.mxu3 %v5638_v38  ;;  %2450 = vmatpush.bf16.msrb.mxu0 %v5642_v41  ;;  %v5696_v38 = vor.u32 %v6857_v30, %v5695_v36  ;;  %v5697_v41 = vld [vmem:[#allocation8 + $0x228] sm:$0xf0]  ;;  %v5800_v48 = vor.u32 %v6883_v46, %v5799_v45  ;;  %v6874_v45 = vld [vmem:[#allocation8 + $0x34] sm:$0xf] }
 0x1eb   : > { %2621 = vmatpush.bf16.msrb.mxu1 %v5720_v19  ;;  %2635 = vmatpush.bf16.msrb.mxu2 %v5724_v22  ;;  %v5700_v47 = vor.u32 %v6856_v37, %v5697_v41  ;;  %v5864_v19 = vor.u32 %v6899_v50, %v5863_v16  ;;  %v5775_v22 = vld [vmem:[#allocation8 + $0x40] sm:$0xf]  ;;  %v6875_v41 = vld [vmem:[#allocation8 + $0x34] sm:$0xf0]  ;;  %v6870_v16 = vld [vmem:[#allocation8 + $0x14] sm:$0xf] }
 0x1ec   : > { %v6891_v50 = vld [vmem:[#allocation8 + $0xb4] sm:$0xf0] }
 0x1ee   : > { %2437 = vmatpush.bf16.msra.mxu3 %v5630_v51  ;;  %2451 = vmatpush.bf16.msrb.mxu0 %v5634_v14  ;;  %v5801_v51 = vld [vmem:[#allocation8 + $0x78] sm:$0xf0]  ;;  %v7704_v14 = vld [vmem:[%s8031_s7 + $0x2] sm:$0x3] }
 0x1ef   : > { %2622 = vmatpush.bf16.msrb.mxu1 %v5712_v26  ;;  %2636 = vmatpush.bf16.msrb.mxu2 %v5716_v28  ;;  %v5804_v40 = vor.u32 %v6882_v49, %v5801_v51  ;;  %v5776_v26 = vor.u32 %v6877_v23, %v5775_v22  ;;  %v5855_v28 = vld [vmem:[#allocation8 + $0xe0] sm:$0xf]  ;;  %v6895_v49 = vld [vmem:[#allocation8 + $0xd4] sm:$0xf0]  ;;  %v5833_v22 = vld [vmem:[#allocation8 + $0xb8] sm:$0xf0] }
 0x1f1   : > { %2308 = vmatmul.bf16.vlgmr.msra.gmra.mxu1 %v2219_v59  ;;  %2322 = vmatmul.bf16.vlgmr.msra.gmra.mxu2 %v2219_v59  ;;  %v5692_v59 = vor.u32 %v6854_v55, %v5689_v56  ;;  %v5852_v55 = vor.u32 %v6894_v53, %v5849_v54  ;;  %v5759_v56 = vld [vmem:[#allocation8 + $0x20] sm:$0xf]  ;;  %v5815_v54 = vld [vmem:[#allocation8 + $0x90] sm:$0xf] }
 0x1f2   : > { %2438 = vmatpush.bf16.msra.mxu3 %v5622_v57  ;;  %2452 = vmatpush.bf16.msrb.mxu0 %v5626_v34  ;;  %v5791_v57 = vld [vmem:[#allocation8 + $0x60] sm:$0xf]  ;;  %v6881_v34 = vld [vmem:[#allocation8 + $0x64] sm:$0xf0] }
 0x1f3   : > { %2623 = vmatpush.bf16.msrb.mxu1 %v5704_v31  ;;  %2637 = vmatpush.bf16.msrb.mxu2 %v5708_v33  ;;  %v5792_v60 = vor.u32 %v6881_v34, %v5791_v57  ;;  %v5856_v31 = vor.u32 %v6897_v20, %v5855_v28  ;;  %v5857_v33 = vld [vmem:[#allocation8 + $0xe8] sm:$0xf0]  ;;  %v6873_v57 = vld [vmem:[#allocation8 + $0x24] sm:$0xf0]  ;;  %v6872_v34 = vld [vmem:[#allocation8 + $0x24] sm:$0xf] }
 0x1f4   : > { %v5860_v30 = vor.u32 %v6896_v32, %v5857_v33  ;;  %v6868_v28 = vld [vmem:[#allocation8 + $0x4] sm:$0xf]  ;;  %v6889_v32 = vld [vmem:[#allocation8 + $0xa4] sm:$0xf0] }
 0x1f6   : > { %2439 = vmatpush.bf16.msra.mxu3 %v5614_v1  ;;  %2453 = vmatpush.bf16.msrb.mxu0 %v5618_v2  ;;  %v1825_v1 = vperm.slane %v7704_v14, 1  ;;  %v5796_v2 = vor.u32 %v6880_v62, %v5793_v63  ;;  %v5839_v62 = vld [vmem:[#allocation8 + $0xc0] sm:$0xf]  ;;  %v6893_v63 = vld [vmem:[#allocation8 + $0xc4] sm:$0xf0] }
 0x1f7   : > { %2624 = vmatpush.bf16.msrb.mxu1 %v5696_v38  ;;  %2638 = vmatpush.bf16.msrb.mxu2 %v5700_v47  ;;  %v5767_v38 = vld [vmem:[#allocation8 + $0x30] sm:$0xf]  ;;  %v5840_v6 = vor.u32 %v6893_v63, %v5839_v62 }
 0x1f8   : > { %v5768_v47 = vor.u32 %v6875_v41, %v5767_v38  ;;  %v6888_v38 = vld [vmem:[#allocation8 + $0xa4] sm:$0xf]  ;;  %v5825_v41 = vld [vmem:[#allocation8 + $0xa8] sm:$0xf0] }
 0x1f9   : > { %2440 = vmatmul.bf16.vlgmr.msra.gmra.mxu3 %v2351_v4  ;;  %2454 = vmatmul.bf16.vlgmr.msrb.gmra.mxu0 %v2351_v4  ;;  %v5679_v4 = vld [vmem:[#allocation8 + $0x200] sm:$0xf] }
 0x1fa   : > { %2746 = vmatpush.bf16.msrb.mxu3 %v5800_v48  ;;  %2760 = vmatpush.bf16.msra.mxu0 %v5804_v40  ;;  %v5680_v7 = vor.u32 %v6853_v5, %v5679_v4  ;;  %v5769_v48 = vld [vmem:[#allocation8 + $0x38] sm:$0xf0] }
 0x1fb   : > { %2625 = vmatpush.bf16.msrb.mxu1 %v5688_v52  ;;  %2639 = vmatpush.bf16.msrb.mxu2 %v5692_v59  ;;  %v5772_v51 = vor.u32 %v6874_v45, %v5769_v48  ;;  %v5760_v59 = vor.u32 %v6873_v57, %v5759_v56  ;;  %v5927_v45 = vld [vmem:[#allocation8 + $0x170] sm:$0xf]  ;;  %v6915_v48 = vld [vmem:[#allocation8 + $0x174] sm:$0xf0]  ;;  %v5817_v57 = vld [vmem:[#allocation8 + $0x98] sm:$0xf0] }
 0x1fe   : > { %2747 = vmatpush.bf16.msrb.mxu3 %v5792_v60  ;;  %2761 = vmatpush.bf16.msra.mxu0 %v5796_v2  ;;  %v5761_v60 = vld [vmem:[#allocation8 + $0x28] sm:$0xf0] }
 0x1ff   : > { %2626 = vmatpush.bf16.msrb.mxu1 %v5680_v7  ;;  %2640 = vmatpush.bf16.msrb.mxu2 %v5684_v44  ;;  %v5764_v5 = vor.u32 %v6872_v34, %v5761_v60  ;;  %v6892_v7 = vld [vmem:[#allocation8 + $0xc4] sm:$0xf]  ;;  %v5919_v34 = vld [vmem:[#allocation8 + $0x160] sm:$0xf] }
 0x202   : > { %2748 = vmatpush.bf16.msrb.mxu3 %v5784_v11  ;;  %2762 = vmatpush.bf16.msra.mxu0 %v5788_v17  ;;  %v5752_v17 = vor.u32 %v6871_v15, %v5751_v13  ;;  %v5809_v13 = vld [vmem:[#allocation8 + $0x88] sm:$0xf0] }
 0x203   : > { %2878 = vmatpush.bf16.msra.mxu1 %v5864_v19  ;;  %2892 = vmatpush.bf16.msra.mxu2 %v5868_v21  ;;  %v6890_v21 = vld [vmem:[#allocation8 + $0xb4] sm:$0xf] }
 0x204   : > { %v5836_v24 = vor.u32 %v6890_v21, %v5833_v22  ;;  %v6909_v21 = vld [vmem:[#allocation8 + $0x144] sm:$0xf0]  ;;  %v6908_v22 = vld [vmem:[#allocation8 + $0x144] sm:$0xf] }
 0x206   : > { %2749 = vmatpush.bf16.msrb.mxu3 %v5776_v26  ;;  %2763 = vmatpush.bf16.msra.mxu0 %v5780_v12  ;;  %v5743_v26 = vld [vmem:[#allocation8] sm:$0xf]  ;;  %v5745_v12 = vld [vmem:[#allocation8 + $0x8] sm:$0xf0] }
 0x207   : > { %2879 = vmatpush.bf16.msra.mxu1 %v5856_v31  ;;  %2893 = vmatpush.bf16.msra.mxu2 %v5860_v30  ;;  %v5823_v31 = vld [vmem:[#allocation8 + $0xa0] sm:$0xf]  ;;  %v5748_v30 = vor.u32 %v6868_v28, %v5745_v12 }
 0x20a   : > { %2750 = vmatpush.bf16.msrb.mxu3 %v5768_v47  ;;  %2764 = vmatpush.bf16.msra.mxu0 %v5772_v51 }
 0x20b   : > { %2894 = vmatpush.bf16.msra.mxu2 %v5852_v55  ;;  %v6887_v55 = vld [vmem:[#allocation8 + $0x94] sm:$0xf0] }
 0x20c   : > { %v5816_v56 = vor.u32 %v6887_v55, %v5815_v54  ;;  %v5889_v54 = vld [vmem:[#allocation8 + $0x128] sm:$0xf0] }
 0x20e   : > { %2751 = vmatpush.bf16.msrb.mxu3 %v5760_v59  ;;  %2765 = vmatpush.bf16.msra.mxu0 %v5764_v5  ;;  %v5921_v5 = vld [vmem:[#allocation8 + $0x168] sm:$0xf0] }
 0x212   : > { %2752 = vmatpush.bf16.msrb.mxu3 %v5752_v17  ;;  %v5911_v17 = vld [vmem:[#allocation8 + $0x150] sm:$0xf] }
 0x256   : > { %v7697_v3 = vpop.f32.mrf.mxu0 }
 0x257   : > { %v1932_v29 = vadd.f32 %v7697_v3, %v1825_v1  ;;  %v5847_v3 = vld [vmem:[#allocation8 + $0xd0] sm:$0xf] }
 0x258   : > { %v5848_v40 = vor.u32 %v6895_v49, %v5847_v3  ;;  %v6914_v3 = vld [vmem:[#allocation8 + $0x174] sm:$0xf]  ;;  %v5929_v49 = vld [vmem:[#allocation8 + $0x178] sm:$0xf0] }
 0x259   : > { %v5932_v53 = vor.u32 %v6914_v3, %v5929_v49  ;;  %v5887_v49 = vld [vmem:[#allocation8 + $0x120] sm:$0xf] }
 0x25a   : > { %2880 = vmatpush.bf16.msra.mxu1 %v5848_v40  ;;  %v5928_v40 = vor.u32 %v6915_v48, %v5927_v45 }
 0x25c   : > { %v7707_v43 = vpop.f32.mrf.mxu3 }
 0x25e   : > { %v7699_v35 = vpop.f32.mrf.mxu0  ;;  %v7719_v10 = vpop.f32.mrf.mxu1  ;;  %2881 = vmatpush.bf16.msra.mxu1 %v5840_v6  ;;  %v1824_v6 = vperm.slane %v7704_v14, 0  ;;  %v6911_v14 = vld [vmem:[#allocation8 + $0x154] sm:$0xf0] }
 0x25f   : > { %v1934_v2 = vadd.f32 %v7699_v35, %v1825_v1  ;;  %v5753_v35 = vld [vmem:[#allocation8 + $0x18] sm:$0xf0]  ;;  %v5831_v1 = vld [vmem:[#allocation8 + $0xb0] sm:$0xf] }
 0x260   : > { %v5756_v18 = vor.u32 %v6870_v16, %v5753_v35  ;;  %v5832_v19 = vor.u32 %v6891_v50, %v5831_v1  ;;  %v6910_v35 = vld [vmem:[#allocation8 + $0x154] sm:$0xf]  ;;  %v5912_v1 = vor.u32 %v6911_v14, %v5911_v17  ;;  %v5913_v50 = vld [vmem:[#allocation8 + $0x158] sm:$0xf0]  ;;  %v6901_v17 = vld [vmem:[#allocation8 + $0x104] sm:$0xf0] }
 0x262   : > { %2766 = vmatpush.bf16.msra.mxu0 %v5756_v18  ;;  %2882 = vmatpush.bf16.msra.mxu1 %v5832_v19  ;;  %v5916_v18 = vor.u32 %v6910_v35, %v5913_v50  ;;  %v5903_v19 = vld [vmem:[#allocation8 + $0x140] sm:$0xf]  ;;  %v5873_v50 = vld [vmem:[#allocation8 + $0x108] sm:$0xf0] }
 0x264   : > { %v2059_v58 = vpop.f32.mrf.mxu2  ;;  %v7714_v46 = vpop.f32.mrf.mxu3 }
 0x265   : > { %v2065_v37 = vadd.f32 %v2059_v58, %v1932_v29  ;;  %v5744_v29 = vor.u32 %v6869_v27, %v5743_v26  ;;  %v5905_v26 = vld [vmem:[#allocation8 + $0x148] sm:$0xf0] }
 0x266   : > { %v2191_v42 = vpop.f32.mrf.mxu0  ;;  %2767 = vmatpush.bf16.msra.mxu0 %v5748_v30  ;;  %v7724_v60 = vpop.f32.mrf.mxu1  ;;  %v6907_v30 = vld [vmem:[#allocation8 + $0x134] sm:$0xf0] }
 0x267   : > { %v2197_v52 = vadd.f32 %v2191_v42, %v2065_v37  ;;  %v5841_v42 = vld [vmem:[#allocation8 + $0xc8] sm:$0xf0]  ;;  %v5824_v37 = vor.u32 %v6889_v32, %v5823_v31  ;;  %2753 = vmatpush.bf16.msrb.mxu3 %v5744_v29  ;;  %v5895_v31 = vld [vmem:[#allocation8 + $0x130] sm:$0xf] }
 0x268   : > { %v5844_v39 = vor.u32 %v6892_v7, %v5841_v42 }
 0x269   : > { %2883 = vmatpush.bf16.msra.mxu1 %v5824_v37  ;;  %v6906_v37 = vld [vmem:[#allocation8 + $0x134] sm:$0xf] }
 0x26a   : > { %2895 = vmatpush.bf16.msra.mxu2 %v5844_v39  ;;  %3024 = vmatpush.bf16.msrb.mxu0 %v5932_v53  ;;  %v6885_v39 = vld [vmem:[#allocation8 + $0x84] sm:$0xf0] }
 0x26b   : > { %3010 = vmatpush.bf16.msra.mxu3 %v5928_v40 }
 0x26c   : > { %v2061_v25 = vpop.f32.mrf.mxu2  ;;  %v7721_v23 = vpop.f32.mrf.mxu3 }
 0x26d   : > { %v2067_v44 = vadd.f32 %v2061_v25, %v1934_v2  ;;  %2884 = vmatpush.bf16.msra.mxu1 %v5816_v56 }
 0x26e   : > { %v7712_v36 = vpop.f32.mrf.mxu0  ;;  %2896 = vmatpush.bf16.msra.mxu2 %v5836_v24  ;;  %v2309_v12 = vpop.f32.mrf.mxu1 }
 0x26f   : > { %v2199_v25 = vadd.f32 %v7712_v36, %v2067_v44  ;;  %v5828_v36 = vor.u32 %v6888_v38, %v5825_v41  ;;  %v6884_v44 = vld [vmem:[#allocation8 + $0x84] sm:$0xf]  ;;  %v1920_v38 = vadd.f32 %v7714_v46, %v1824_v6 }
 0x270   : > { %v5812_v16 = vor.u32 %v6884_v44, %v5809_v13 }
 0x272   : > { %2897 = vmatpush.bf16.msra.mxu2 %v5828_v36 }
 0x274   : > { %v2323_v58 = vpop.f32.mrf.mxu2 }
 0x275   : > { %v2329_v4 = vadd.f32 %v2323_v58, %v2197_v52  ;;  %v6886_v52 = vld [vmem:[#allocation8 + $0x94] sm:$0xf]  ;;  %v6913_v58 = vld [vmem:[#allocation8 + $0x164] sm:$0xf0] }
 0x276   : > { %v2455_v8 = vpop.f32.mrf.mxu0  ;;  %v5820_v63 = vor.u32 %v6886_v52, %v5817_v57  ;;  %v5920_v2 = vor.u32 %v6913_v58, %v5919_v34  ;;  %v2066_v52 = vadd.f32 %v7724_v60, %v1920_v38  ;;  %v6928_v38 = vld [vmem:[#allocation8 + $0x1e4] sm:$0xf] }
 0x277   : > { %v2461_v11 = vadd.f32 %v2455_v8, %v2329_v4  ;;  %v6912_v4 = vld [vmem:[#allocation8 + $0x164] sm:$0xf]  ;;  %v5807_v8 = vld [vmem:[#allocation8 + $0x80] sm:$0xf] }
 0x278   : > { %v5924_v42 = vor.u32 %v6912_v4, %v5921_v5  ;;  %2898 = vmatpush.bf16.msra.mxu2 %v5820_v63  ;;  %3011 = vmatpush.bf16.msra.mxu3 %v5920_v2  ;;  %v5808_v15 = vor.u32 %v6885_v39, %v5807_v8  ;;  %v5879_v2 = vld [vmem:[#allocation8 + $0x110] sm:$0xf]  ;;  %v6903_v4 = vld [vmem:[#allocation8 + $0x114] sm:$0xf0]  ;;  %v2311_v5 = vpop.f32.mrf.mxu1  ;;  %v5881_v8 = vld [vmem:[#allocation8 + $0x118] sm:$0xf0] }
 0x279   : > { %v5675_v0 = vmul.f32 -1.442695, %v2461_v11  ;;  %v7729_v11 = vpop.f32.mrf.mxu3  ;;  %v5880_v60 = vor.u32 %v6903_v4, %v5879_v2 }
 0x27a   : > { %3025 = vmatpush.bf16.msrb.mxu0 %v5924_v42  ;;  %2885 = vmatpush.bf16.msra.mxu1 %v5808_v15  ;;  %v6902_v42 = vld [vmem:[#allocation8 + $0x114] sm:$0xf] }
 0x27b   : > { %7175 = vpow2.f32 %v5675_v0  ;;  %v1918_v0 = vadd.f32 %v7707_v43, %v1824_v6  ;;  %v5884_v44 = vor.u32 %v6902_v42, %v5881_v8  ;;  %v5953_v42 = vld [vmem:[#allocation8 + $0x1a8] sm:$0xf0] }
 0x27c   : > { %v2325_v20 = vpop.f32.mrf.mxu2  ;;  %2899 = vmatpush.bf16.msra.mxu2 %v5812_v16  ;;  %3012 = vmatpush.bf16.msra.mxu3 %v5912_v1  ;;  %v5871_v16 = vld [vmem:[#allocation8 + $0x100] sm:$0xf]  ;;  %v6900_v1 = vld [vmem:[#allocation8 + $0x104] sm:$0xf] }
 0x27d   : > { %v2331_v33 = vadd.f32 %v2325_v20, %v2199_v25  ;;  %v5904_v25 = vor.u32 %v6909_v21, %v5903_v19  ;;  %v5908_v20 = vor.u32 %v6908_v22, %v5905_v26  ;;  %v2064_v29 = vadd.f32 %v7719_v10, %v1918_v0  ;;  %v5897_v10 = vld [vmem:[#allocation8 + $0x138] sm:$0xf0] }
 0x27e   : > { %v2457_v47 = vpop.f32.mrf.mxu0  ;;  %3026 = vmatpush.bf16.msrb.mxu0 %v5916_v18  ;;  %v5900_v3 = vor.u32 %v6906_v37, %v5897_v10  ;;  %v5872_v19 = vor.u32 %v6901_v17, %v5871_v16  ;;  %v5876_v21 = vor.u32 %v6900_v1, %v5873_v50  ;;  %v5975_v10 = vld [vmem:[#allocation8 + $0x1d0] sm:$0xf]  ;;  %v5935_v1 = vld [vmem:[#allocation8 + $0x180] sm:$0xf] }
 0x27f   : > { %v2463_v51 = vadd.f32 %v2457_v47, %v2331_v33  ;;  %v2196_v32 = vadd.f32 %v7721_v23, %v2064_v29  ;;  %v5896_v47 = vor.u32 %v6907_v30, %v5895_v31  ;;  %v6904_v23 = vld [vmem:[#allocation8 + $0x124] sm:$0xf]  ;;  %v6930_v29 = vld [vmem:[#allocation8 + $0x1f4] sm:$0xf]  ;;  %v6929_v30 = vld [vmem:[#allocation8 + $0x1e4] sm:$0xf0] }
 0x280   : > { %3013 = vmatpush.bf16.msra.mxu3 %v5904_v25  ;;  %v5892_v57 = vor.u32 %v6904_v23, %v5889_v54  ;;  %v6924_v54 = vld [vmem:[#allocation8 + $0x1c4] sm:$0xf] }
 0x281   : > { %v7176_v59 = vpop.eup %7175  ;;  %v5676_v62 = vmul.f32 -1.442695, %v2463_v51  ;;  %v2441_v41 = vpop.f32.mrf.mxu3  ;;  %v6905_v51 = vld [vmem:[#allocation8 + $0x124] sm:$0xf0]  ;;  %v2328_v40 = vadd.f32 %v2309_v12, %v2196_v32  ;;  %v5993_v12 = vld [vmem:[#allocation8 + $0x1f8] sm:$0xf0] }
 0x282   : > { %v7727_v7 = vadd.f32 1.0, %v7176_v59  ;;  %3027 = vmatpush.bf16.msrb.mxu0 %v5908_v20  ;;  %v5888_v46 = vor.u32 %v6905_v51, %v5887_v49  ;;  %v6931_v20 = vld [vmem:[#allocation8 + $0x1f4] sm:$0xf0]  ;;  %v5996_v32 = vor.u32 %v6930_v29, %v5993_v12  ;;  %v2533_v12 = vld [vmem:[%s8033_s9] sm:$0x3] }
 0x283   : > { %7177 = vpow2.f32 %v5676_v62  ;;  %v2460_v34 = vadd.f32 %v2441_v41, %v2328_v40  ;;  %v2198_v62 = vadd.f32 %v7729_v11, %v2066_v52  ;;  %v5985_v41 = vld [vmem:[#allocation8 + $0x1e8] sm:$0xf0]  ;;  %v5967_v40 = vld [vmem:[#allocation8 + $0x1c0] sm:$0xf] }
 0x284   : > { %7179 = vrcp.f32 %v7727_v7  ;;  %v2483_v45 = vand.u32 2147483648, %v7727_v7  ;;  %v2481_v48 = vand.u32 2147483647, %v7727_v7  ;;  %vm2477_vm10 = vweird.f32 %v7727_v7  ;;  %3014 = vmatpush.bf16.msra.mxu3 %v5896_v47 }
 0x285   : > { %v2330_v14 = vadd.f32 %v2311_v5, %v2198_v62  ;;  %v5988_v47 = vor.u32 %v6928_v38, %v5985_v41  ;;  %v5951_v5 = vld [vmem:[#allocation8 + $0x1a0] sm:$0xf] }
 0x286   : > { %3028 = vmatpush.bf16.msrb.mxu0 %v5900_v3  ;;  %v2484_v56 = vor.u32 1.1754944e-38, %v2483_v45  ;;  %vm2482_vm12 = vcmp.eq.f32.partialorder %v2481_v48, 8.507059e+37  ;;  %v5977_v48 = vld [vmem:[#allocation8 + $0x1d8] sm:$0xf0] }
 0x288   : > { %3015 = vmatpush.bf16.msra.mxu3 %v5888_v46  ;;  %v6925_v46 = vld [vmem:[#allocation8 + $0x1c4] sm:$0xf0] }
 0x289   : > { %v7178_v24 = vpop.eup %7177  ;;  %v2443_v35 = vpop.f32.mrf.mxu3  ;;  %v5968_v52 = vor.u32 %v6925_v46, %v5967_v40 }
 0x28a   : > { %v7180_v27 = vpop.eup %7179  ;;  %v7733_v28 = vadd.f32 1.0, %v7178_v24  ;;  %3029 = vmatpush.bf16.msrb.mxu0 %v5892_v57  ;;  %v2462_v22 = vadd.f32 %v2443_v35, %v2330_v14  ;;  %v5959_v57 = vld [vmem:[#allocation8 + $0x1b0] sm:$0xf] }
 0x28b   : > { %v2473_v43 = vmul.f32 %v7180_v27, %v7727_v7  ;;  %vm2478_vm9 = vweird.f32 %v7180_v27 }
 0x28c   : > { %7181 = vrcp.f32 %v7733_v28  ;;  %vm2479_vm11 = vmor %vm2477_vm10, %vm2478_vm9  ;;  %v2498_v39 = vand.u32 2147483648, %v7733_v28  ;;  %v2496_v11 = vand.u32 2147483647, %v7733_v28  ;;  %vm2492_vm14 = vweird.f32 %v7733_v28  ;;  %3016 = vmatpush.bf16.msra.mxu3 %v5880_v60  ;;  %v6920_v60 = vld [vmem:[#allocation8 + $0x1a4] sm:$0xf] }
 0x28d   : > { %v2474_v33 = vsub.f32 1.0, %v2473_v43 }
 0x28e   : > { %3030 = vmatpush.bf16.msrb.mxu0 %v5884_v44  ;;  %vm2497_vm0 = vcmp.eq.f32.partialorder %v2496_v11, 8.507059e+37  ;;  %v5943_v44 = vld [vmem:[#allocation8 + $0x190] sm:$0xf]  ;;  %v5945_v11 = vld [vmem:[#allocation8 + $0x198] sm:$0xf0] }
 0x28f   : > { %v2475_v36 = vmul.f32 %v7180_v27, %v2474_v33  ;;  %v5983_v33 = vld [vmem:[#allocation8 + $0x1e0] sm:$0xf] }
 0x290   : > { %3017 = vmatpush.bf16.msra.mxu3 %v5872_v19  ;;  %v5984_v45 = vor.u32 %v6929_v30, %v5983_v33  ;;  %v5937_v19 = vld [vmem:[#allocation8 + $0x188] sm:$0xf0]  ;;  %v6938_v33 = vld [vmem:[%s8034_s10 + $0x30] sm:$0xff] }
 0x291   : > { %v2476_v53 = vadd.f32 %v7180_v27, %v2475_v36  ;;  %v6926_v36 = vld [vmem:[#allocation8 + $0x1d4] sm:$0xf] }
 0x292   : > { %v7182_v55 = vpop.eup %7181  ;;  %3031 = vmatpush.bf16.msrb.mxu0 %v5876_v21  ;;  %v5980_v23 = vor.u32 %v6926_v36, %v5977_v48  ;;  %v6935_v48 = vld [vmem:[%s8034_s10 + $0x18] sm:$0xff] }
 0x293   : > { %v2480_v58 = vsel %vm2479_vm11, %v7180_v27, %v2476_v53  ;;  %v2488_v59 = vmul.f32 %v7182_v55, %v7733_v28  ;;  %vm2493_vm13 = vweird.f32 %v7182_v55  ;;  %v5991_v27 = vld [vmem:[#allocation8 + $0x1f0] sm:$0xf] }
 0x294   : > { %v2485_v63 = vsel %vm2482_vm12, %v2484_v56, %v2480_v58  ;;  %vm2494_vm15 = vmor %vm2492_vm14, %vm2493_vm13  ;;  %v5992_v31 = vor.u32 %v6931_v20, %v5991_v27  ;;  %v6922_v58 = vld [vmem:[#allocation8 + $0x1b4] sm:$0xf]  ;;  %v6939_v20 = vld [vmem:[%s8034_s10 + $0x38] sm:$0xff] }
 0x295   : > { %v2502_v6 = vmul.f32 %v2485_v63, %v2460_v34  ;;  %v2489_v7 = vsub.f32 1.0, %v2488_v59  ;;  %v6923_v34 = vld [vmem:[#allocation8 + $0x1b4] sm:$0xf0]  ;;  %v5961_v59 = vld [vmem:[#allocation8 + $0x1b8] sm:$0xf0] }
 0x296   : > { %v5960_v2 = vor.u32 %v6923_v34, %v5959_v57  ;;  %v5964_v4 = vor.u32 %v6922_v58, %v5961_v59  ;;  %v6932_v34 = vld [vmem:[%s8034_s10] sm:$0xff] }
 0x297   : > { %v2504_v13 = vadd.f32 %v2502_v6, %v7687_v61  ;;  %v2490_v15 = vmul.f32 %v7182_v55, %v2489_v7  ;;  %v2499_v61 = vor.u32 1.1754944e-38, %v2498_v39  ;;  %v6921_v7 = vld [vmem:[#allocation8 + $0x1a4] sm:$0xf0]  ;;  %v5956_v39 = vor.u32 %v6920_v60, %v5953_v42 }
 0x298   : > { %v5952_v8 = vor.u32 %v6921_v7, %v5951_v5  ;;  %v6947_v5 = vld [vmem:[%s7588_s19 + $0x38] sm:$0xff]  ;;  %v6946_v7 = vld [vmem:[%s7588_s19 + $0x30] sm:$0xff]  ;;  %v2535_v42 = vperm.slane %v2533_v12, 0 }
 0x299   : > { %v2506_v0 = vmul.f32 0.70710677, %v2504_v13  ;;  %v2491_v18 = vadd.f32 %v7182_v55, %v2490_v15  ;;  %v6919_v13 = vld [vmem:[#allocation8 + $0x194] sm:$0xf0]  ;;  %v6918_v15 = vld [vmem:[#allocation8 + $0x194] sm:$0xf] }
 0x29a   : > { %v5944_v14 = vor.u32 %v6919_v13, %v5943_v44  ;;  %v5948_v35 = vor.u32 %v6918_v15, %v5945_v11 }
 0x29b   : > { %2513 = vst [vmem:[#allocation2 + $0x8] sm:$0xff] %v2506_v0  ;;  %v2495_v24 = vsel %vm2494_vm15, %v7182_v55, %v2491_v18  ;;  %v5969_v55 = vld [vmem:[#allocation8 + $0x1c8] sm:$0xf0]  ;;  %v6916_v18 = vld [vmem:[#allocation8 + $0x184] sm:$0xf] }
 0x29c   : > { %v2500_v25 = vsel %vm2497_vm0, %v2499_v61, %v2495_v24  ;;  %v5972_v56 = vor.u32 %v6924_v54, %v5969_v55  ;;  %v5940_v61 = vor.u32 %v6916_v18, %v5937_v19  ;;  %v6933_v55 = vld [vmem:[%s8034_s10 + $0x8] sm:$0xff]  ;;  %v6943_v19 = vld [vmem:[%s7588_s19 + $0x18] sm:$0xff] }
 0x29d   : > { %v2503_v26 = vmul.f32 %v2500_v25, %v2462_v22 }
 0x29f   : > { %v2505_v28 = vadd.f32 %v2503_v26, %v7692_v9  ;;  %v6927_v9 = vld [vmem:[#allocation8 + $0x1d4] sm:$0xf0] }
 0x2a0   : > { %v5976_v51 = vor.u32 %v6927_v9, %v5975_v10 }
 0x2a1   : > { %v2507_v43 = vmul.f32 0.70710677, %v2505_v28 }
 0x2a2   : > { %v2647_v3 = vld [vmem:[#allocation2 + $0x4] sm:$0xff] }
 0x2a3   : > { %2514 = vst [vmem:[#allocation2 + $0x10] sm:$0xff] %v2507_v43  ;;  %v2532_v37 = vpack.c.bf16 %v2507_v43, %v2506_v0  ;;  %v2778_v63 = vld [vmem:[#allocation2 + $0x5] sm:$0xff]  ;;  %v6917_v0 = vld [vmem:[#allocation8 + $0x184] sm:$0xf0] }
 0x2a4   : > { %v2910_v17 = vld [vmem:[#allocation2 + $0x6] sm:$0xff]  ;;  %v5936_v21 = vor.u32 %v6917_v0, %v5935_v1 }
 0x2a5   : > { %2627 = vmatmul.bf16.vlgmr.msrb.gmra.mxu1 %v2532_v37  ;;  %2641 = vmatmul.bf16.vlgmr.msrb.gmra.mxu2 %v2532_v37  ;;  %v3042_v24 = vld [vmem:[#allocation2 + $0x7] sm:$0xff] }
 0x2a6   : > { %3142 = vmatpush.bf16.msrb.mxu1 %v5992_v31  ;;  %3156 = vmatpush.bf16.msrb.mxu2 %v5996_v32  ;;  %v2536_v32 = vperm.slane %v2533_v12, 1  ;;  %v6937_v37 = vld [vmem:[%s8034_s10 + $0x28] sm:$0xff] }
 0x2aa   : > { %3143 = vmatpush.bf16.msrb.mxu1 %v5984_v45  ;;  %3157 = vmatpush.bf16.msrb.mxu2 %v5988_v47  ;;  %v2648_v49 = vld [vmem:[#allocation2 + $0xc] sm:$0xff]  ;;  %v6936_v45 = vld [vmem:[%s8034_s10 + $0x20] sm:$0xff] }
 0x2ab   : > { %v2665_v53 = vpack.c.bf16 %v2648_v49, %v2647_v3  ;;  %v2779_v62 = vld [vmem:[#allocation2 + $0xd] sm:$0xff] }
 0x2ac   : > { %v2797_v6 = vpack.c.bf16 %v2779_v62, %v2778_v63  ;;  %v2911_v16 = vld [vmem:[#allocation2 + $0xe] sm:$0xff] }
 0x2ad   : > { %2754 = vmatmul.bf16.vlgmr.msrb.gmra.mxu3 %v2665_v53  ;;  %2768 = vmatmul.bf16.vlgmr.msra.gmra.mxu0 %v2665_v53  ;;  %v2929_v50 = vpack.c.bf16 %v2911_v16, %v2910_v17  ;;  %v3043_v22 = vld [vmem:[#allocation2 + $0xf] sm:$0xff]  ;;  %v6944_v17 = vld [vmem:[%s7588_s19 + $0x20] sm:$0xff] }
 0x2ae   : > { %3144 = vmatpush.bf16.msrb.mxu1 %v5976_v51  ;;  %3158 = vmatpush.bf16.msrb.mxu2 %v5980_v23  ;;  %v3061_v25 = vpack.c.bf16 %v3043_v22, %v3042_v24  ;;  %v6934_v53 = vld [vmem:[%s8034_s10 + $0x10] sm:$0xff] }
 0x2af   : > { %3285 = vmatpush.bf16.msrb.mxu3 %v6939_v20  ;;  %3364 = vmatpush.bf16.msra.mxu0 %v6947_v5 }
 0x2b2   : > { %3145 = vmatpush.bf16.msrb.mxu1 %v5968_v52  ;;  %3159 = vmatpush.bf16.msrb.mxu2 %v5972_v56 }
 0x2b3   : > { %3286 = vmatpush.bf16.msrb.mxu3 %v6938_v33  ;;  %3365 = vmatpush.bf16.msra.mxu0 %v6946_v7  ;;  %v6954_v7 = vld [vmem:[%s7590_s22 + $0x30] sm:$0xff] }
 0x2b5   : > { %2886 = vmatmul.bf16.vlgmr.msra.gmra.mxu1 %v2797_v6  ;;  %2900 = vmatmul.bf16.vlgmr.msra.gmra.mxu2 %v2797_v6 }
 0x2b6   : > { %3146 = vmatpush.bf16.msrb.mxu1 %v5960_v2  ;;  %3160 = vmatpush.bf16.msrb.mxu2 %v5964_v4 }
 0x2b7   : > { %3287 = vmatpush.bf16.msrb.mxu3 %v6937_v37 }
 0x2ba   : > { %3147 = vmatpush.bf16.msrb.mxu1 %v5952_v8  ;;  %3161 = vmatpush.bf16.msrb.mxu2 %v5956_v39  ;;  %v6945_v39 = vld [vmem:[%s7588_s19 + $0x28] sm:$0xff] }
 0x2bb   : > { %3288 = vmatpush.bf16.msrb.mxu3 %v6936_v45  ;;  %3366 = vmatpush.bf16.msra.mxu0 %v6945_v39 }
 0x2bd   : > { %3018 = vmatmul.bf16.vlgmr.msra.gmra.mxu3 %v2929_v50  ;;  %3032 = vmatmul.bf16.vlgmr.msrb.gmra.mxu0 %v2929_v50 }
 0x2be   : > { %3148 = vmatpush.bf16.msrb.mxu1 %v5944_v14  ;;  %3162 = vmatpush.bf16.msrb.mxu2 %v5948_v35 }
 0x2bf   : > { %3289 = vmatpush.bf16.msrb.mxu3 %v6935_v48  ;;  %3367 = vmatpush.bf16.msra.mxu0 %v6944_v17  ;;  %v2509_v48 = vld [vmem:[%s7789_s25 + $0x8] sm:$0xff]  ;;  %v6952_v17 = vld [vmem:[%s7590_s22 + $0x20] sm:$0xff] }
 0x2c2   : > { %3149 = vmatpush.bf16.msrb.mxu1 %v5936_v21  ;;  %3163 = vmatpush.bf16.msrb.mxu2 %v5940_v61 }
 0x2c3   : > { %3290 = vmatpush.bf16.msrb.mxu3 %v6934_v53  ;;  %3368 = vmatpush.bf16.msra.mxu0 %v6943_v19  ;;  %v6942_v53 = vld [vmem:[%s7588_s19 + $0x10] sm:$0xff] }
 0x2c4   : > { %v6961_v19 = vld [vmem:[%s8036_s12 + $0x28] sm:$0xff] }
 0x2c5   : > { %3150 = vmatmul.bf16.vlgmr.msrb.gmra.mxu1 %v3061_v25  ;;  %3164 = vmatmul.bf16.vlgmr.msrb.gmra.mxu2 %v3061_v25 }
 0x2c7   : > { %3291 = vmatpush.bf16.msrb.mxu3 %v6933_v55  ;;  %3369 = vmatpush.bf16.msra.mxu0 %v6942_v53 }
 0x2cb   : > { %3292 = vmatpush.bf16.msrb.mxu3 %v6932_v34 }
 0x322   : > { %v2628_v29 = vpop.f32.mrf.mxu1 }
 0x323   : > { %v2629_v11 = vadd.f32 %v2628_v29, %v2535_v42 }
 0x328   : > { %v2642_v26 = vpop.f32.mrf.mxu2 }
 0x329   : > { %v2643_v30 = vadd.f32 %v2642_v26, %v2536_v32 }
 0x32a   : > { %v2769_v27 = vpop.f32.mrf.mxu0  ;;  %v2630_v47 = vpop.f32.mrf.mxu1 }
 0x32b   : > { %v2775_v41 = vadd.f32 %v2769_v27, %v2643_v30  ;;  %v2631_v14 = vadd.f32 %v2630_v47, %v2535_v42 }
 0x330   : > { %v2644_v28 = vpop.f32.mrf.mxu2  ;;  %v2755_v3 = vpop.f32.mrf.mxu3 }
 0x331   : > { %v2645_v36 = vadd.f32 %v2644_v28, %v2536_v32  ;;  %v2774_v1 = vadd.f32 %v2755_v3, %v2629_v11 }
 0x332   : > { %v2771_v43 = vpop.f32.mrf.mxu0  ;;  %v2887_v52 = vpop.f32.mrf.mxu1 }
 0x333   : > { %v2777_v23 = vadd.f32 %v2771_v43, %v2645_v36  ;;  %v2906_v22 = vadd.f32 %v2887_v52, %v2774_v1  ;;  %v2508_v36 = vld [vmem:[%s7789_s25] sm:$0xff] }
 0x334   : > { %v7162_v52 = vld [vmem:[%s8035_s11] ss:$0 sm:$0xff] }
 0x335   : > { %v6949_v1 = vld [vmem:[%s7590_s22 + $0x8] sm:$0xff] }
 0x338   : > { %v2901_v31 = vpop.f32.mrf.mxu2  ;;  %v2757_v59 = vpop.f32.mrf.mxu3 }
 0x339   : > { %v2907_v9 = vadd.f32 %v2901_v31, %v2775_v41  ;;  %v2776_v0 = vadd.f32 %v2757_v59, %v2631_v14  ;;  %v2510_v59 = vlaneseq  ;;  %v6951_v14 = vld [vmem:[%s7590_s22 + $0x18] sm:$0xff] }
 0x33a   : > { %v3033_v10 = vpop.f32.mrf.mxu0  ;;  %v2889_v6 = vpop.f32.mrf.mxu1 }
 0x33b   : > { %v3039_v49 = vadd.f32 %v3033_v10, %v2907_v9  ;;  %v2908_v27 = vadd.f32 %v2889_v6, %v2776_v0  ;;  %v6955_v6 = vld [vmem:[%s7590_s22 + $0x38] sm:$0xff]  ;;  %v6963_v0 = vld [vmem:[%s8036_s12 + $0x38] sm:$0xff] }
 0x33c   : > { %3472 = vmatpush.bf16.msra.mxu1 %v6955_v6  ;;  %3555 = vmatpush.bf16.msra.mxu2 %v6963_v0  ;;  %v6991_v0 = vld [vmem:[#allocation8 + $0x2d4] sm:$0xf0] }
 0x340   : > { %v2903_v38 = vpop.f32.mrf.mxu2  ;;  %v3019_v8 = vpop.f32.mrf.mxu3  ;;  %3473 = vmatpush.bf16.msra.mxu1 %v6954_v7  ;;  %v6252_v7 = vld [vmem:[#allocation8 + $0x2f8] sm:$0xf0] }
 0x341   : > { %v2909_v46 = vadd.f32 %v2903_v38, %v2777_v23  ;;  %v3038_v28 = vadd.f32 %v3019_v8, %v2906_v22  ;;  %v6959_v22 = vld [vmem:[%s8036_s12 + $0x18] sm:$0xff] }
 0x342   : > { %v3035_v56 = vpop.f32.mrf.mxu0  ;;  %v3151_v35 = vpop.f32.mrf.mxu1 }
 0x343   : > { %v3041_v57 = vadd.f32 %v3035_v56, %v2909_v46  ;;  %v3170_v38 = vadd.f32 %v3151_v35, %v3038_v28  ;;  %v6941_v46 = vld [vmem:[%s7588_s19 + $0x8] sm:$0xff]  ;;  %v6950_v35 = vld [vmem:[%s7590_s22 + $0x10] sm:$0xff] }
 0x344   : > { %3370 = vmatpush.bf16.msra.mxu0 %v6941_v46  ;;  %v6170_v46 = vld [vmem:[#allocation8 + $0x4d0] sm:$0xf] }
 0x348   : > { %v3165_v51 = vpop.f32.mrf.mxu2  ;;  %v3021_v24 = vpop.f32.mrf.mxu3 }
 0x349   : > { %v3171_v40 = vadd.f32 %v3165_v51, %v3039_v49  ;;  %v3040_v12 = vadd.f32 %v3021_v24, %v2908_v27 }
 0x34a   : > { %v3153_v30 = vpop.f32.mrf.mxu1 }
 0x34b   : > { %v5997_v54 = vmul.f32 -1.442695, %v3171_v40  ;;  %v3172_v47 = vadd.f32 %v3153_v30, %v3040_v12  ;;  %v6957_v30 = vld [vmem:[%s8036_s12 + $0x8] sm:$0xff] }
 0x34d   : > { %7183 = vpow2.f32 %v5997_v54  ;;  %v6940_v54 = vld [vmem:[%s7588_s19] sm:$0xff] }
 0x34e   : > { %3371 = vmatpush.bf16.msra.mxu0 %v6940_v54  ;;  %v6975_v54 = vld [vmem:[#allocation8 + $0x4d4] sm:$0xf0] }
 0x350   : > { %v3167_v58 = vpop.f32.mrf.mxu2 }
 0x351   : > { %v3173_v62 = vadd.f32 %v3167_v58, %v3041_v57 }
 0x353   : > { %v7184_v63 = vpop.eup %7183  ;;  %v5998_v2 = vmul.f32 -1.442695, %v3173_v62  ;;  %v7805_v62 = vand.u32 127, %v2510_v59  ;;  %v6250_v59 = vld [vmem:[#allocation8 + $0x2f0] sm:$0xf] }
 0x354   : > { %v3180_v4 = vadd.f32 1.0, %v7184_v63 }
 0x355   : > { %7185 = vpow2.f32 %v5998_v2  ;;  %vm2512_vm9 = vcmp.lt.s32.totalorder %v7805_v62, 8 }
 0x356   : > { %7187 = vrcp.f32 %v3180_v4  ;;  %v3193_v61 = vand.u32 2147483648, %v3180_v4  ;;  %vm3187_vm2 = vweird.f32 %v3180_v4  ;;  %v3191_v26 = vand.u32 2147483647, %v3180_v4 }
 0x358   : > { %v3194_v43 = vor.u32 1.1754944e-38, %v3193_v61  ;;  %vm3192_vm5 = vcmp.eq.f32.partialorder %v3191_v26, 8.507059e+37  ;;  %v6960_v61 = vld [vmem:[%s8036_s12 + $0x20] sm:$0xff] }
 0x35b   : > { %v7186_v60 = vpop.eup %7185 }
 0x35c   : > { %v7188_v44 = vpop.eup %7187  ;;  %v3181_v13 = vadd.f32 1.0, %v7186_v60 }
 0x35d   : > { %v3183_v15 = vmul.f32 %v7188_v44, %v3180_v4  ;;  %vm3188_vm1 = vweird.f32 %v7188_v44 }
 0x35e   : > { %7189 = vrcp.f32 %v3181_v13  ;;  %vm3189_vm3 = vmor %vm3187_vm2, %vm3188_vm1  ;;  %v3208_v31 = vand.u32 2147483648, %v3181_v13  ;;  %v3206_v33 = vand.u32 2147483647, %v3181_v13  ;;  %vm3202_vm6 = vweird.f32 %v3181_v13 }
 0x35f   : > { %v3184_v16 = vsub.f32 1.0, %v3183_v15 }
 0x360   : > { %v3209_v45 = vor.u32 1.1754944e-38, %v3208_v31  ;;  %vm3207_vm8 = vcmp.eq.f32.partialorder %v3206_v33, 8.507059e+37  ;;  %v6958_v33 = vld [vmem:[%s8036_s12 + $0x10] sm:$0xff] }
 0x361   : > { %v3185_v50 = vmul.f32 %v7188_v44, %v3184_v16  ;;  %v6953_v16 = vld [vmem:[%s7590_s22 + $0x28] sm:$0xff] }
 0x362   : > { %3474 = vmatpush.bf16.msra.mxu1 %v6953_v16  ;;  %v6971_v16 = vld [vmem:[#allocation8 + $0x4b4] sm:$0xf0] }
 0x363   : > { %v3186_v18 = vadd.f32 %v7188_v44, %v3185_v50  ;;  %v6948_v50 = vld [vmem:[%s7590_s22] sm:$0xff] }
 0x364   : > { %v7190_v21 = vpop.eup %7189 }
 0x365   : > { %v3198_v25 = vmul.f32 %v7190_v21, %v3181_v13  ;;  %v3190_v29 = vsel %vm3189_vm3, %v7188_v44, %v3186_v18  ;;  %vm3203_vm4 = vweird.f32 %v7190_v21  ;;  %v6962_v18 = vld [vmem:[%s8036_s12 + $0x30] sm:$0xff] }
 0x366   : > { %v3195_v37 = vsel %vm3192_vm5, %v3194_v43, %v3190_v29  ;;  %vm3204_vm7 = vmor %vm3202_vm6, %vm3203_vm4  ;;  %3475 = vmatpush.bf16.msra.mxu1 %v6952_v17  ;;  %3556 = vmatpush.bf16.msra.mxu2 %v6962_v18  ;;  %v6970_v17 = vld [vmem:[#allocation8 + $0x4b4] sm:$0xf] }
 0x367   : > { %v3199_v20 = vsub.f32 1.0, %v3198_v25  ;;  %v3212_v9 = vmul.f32 %v3195_v37, %v3170_v38  ;;  %v6956_v37 = vld [vmem:[%s8036_s12] sm:$0xff]  ;;  %v6186_v38 = vld [vmem:[#allocation8 + $0x4f0] sm:$0xf]  ;;  %v6990_v18 = vld [vmem:[#allocation8 + $0x2d4] sm:$0xf] }
 0x369   : > { %v3200_v32 = vmul.f32 %v7190_v21, %v3199_v20  ;;  %v7793_v51 = vadd.f32 %v3212_v9, %v2508_v36  ;;  %v6178_v9 = vld [vmem:[#allocation8 + $0x4e0] sm:$0xf]  ;;  %v6977_v36 = vld [vmem:[#allocation8 + $0x4e4] sm:$0xf0] }
 0x36a   : > { %3476 = vmatpush.bf16.msra.mxu1 %v6951_v14  ;;  %3557 = vmatpush.bf16.msra.mxu2 %v6961_v19  ;;  %v6236_v19 = vld [vmem:[#allocation8 + $0x2d8] sm:$0xf0] }
 0x36b   : > { %v3201_v41 = vadd.f32 %v7190_v21, %v3200_v32 }
 0x36d   : > { %v3205_v10 = vsel %vm3204_vm7, %v7190_v21, %v3201_v41  ;;  %v6979_v41 = vld [vmem:[#allocation8 + $0x4f4] sm:$0xf0] }
 0x36e   : > { %v3210_v3 = vsel %vm3207_vm8, %v3209_v45, %v3205_v10  ;;  %3477 = vmatpush.bf16.msra.mxu1 %v6950_v35  ;;  %3558 = vmatpush.bf16.msra.mxu2 %v6960_v61  ;;  %v6978_v45 = vld [vmem:[#allocation8 + $0x4f4] sm:$0xf]  ;;  %v6188_v10 = vld [vmem:[#allocation8 + $0x4f8] sm:$0xf0]  ;;  %v6146_v61 = vld [vmem:[#allocation8 + $0x4a0] sm:$0xf] }
 0x36f   : > { %v3213_v49 = vmul.f32 %v3210_v3, %v3172_v47  ;;  %v6187_v47 = vor.u32 %v6979_v41, %v6186_v38  ;;  %v6976_v3 = vld [vmem:[#allocation8 + $0x4e4] sm:$0xf] }
 0x371   : > { %v7795_v23 = vadd.f32 %v3213_v49, %v2509_v48  ;;  %v6191_v48 = vor.u32 %v6978_v45, %v6188_v10  ;;  %v6180_v49 = vld [vmem:[#allocation8 + $0x4e8] sm:$0xf0]  ;;  %3684 = vmatpush.bf16.msra.mxu3 %v6187_v47  ;;  %v6966_v45 = vld [vmem:[#allocation8 + $0x494] sm:$0xf]  ;;  %v6140_v47 = vld [vmem:[#allocation8 + $0x498] sm:$0xf0] }
 0x372   : > { %3478 = vmatpush.bf16.msra.mxu1 %v6949_v1  ;;  %3559 = vmatpush.bf16.msra.mxu2 %v6959_v22  ;;  %v6183_v53 = vor.u32 %v6976_v3, %v6180_v49  ;;  %v6156_v1 = vld [vmem:[#allocation8 + $0x4b8] sm:$0xf0]  ;;  %v6969_v22 = vld [vmem:[#allocation8 + $0x4a4] sm:$0xf0]  ;;  %v6964_v3 = vld [vmem:[#allocation8 + $0x484] sm:$0xf] }
 0x373   : > { %v3232_v40 = vpack.c.bf16 %v7795_v23, %v7793_v51  ;;  %3698 = vmatpush.bf16.msrb.mxu0 %v6191_v48  ;;  %v6965_v48 = vld [vmem:[#allocation8 + $0x484] sm:$0xf0]  ;;  %v6132_v49 = vld [vmem:[#allocation8 + $0x488] sm:$0xf0] }
 0x375   : > { %3293 = vmatmul.bf16.vlgmr.msrb.gmra.mxu3 %v3232_v40  ;;  %v6179_v40 = vor.u32 %v6977_v36, %v6178_v9  ;;  %v6143_v9 = vor.u32 %v6966_v45, %v6140_v47  ;;  %v6130_v36 = vld [vmem:[#allocation8 + $0x480] sm:$0xf]  ;;  %v6981_v45 = vld [vmem:[#allocation8 + $0x284] sm:$0xf0]  ;;  %v6980_v47 = vld [vmem:[#allocation8 + $0x284] sm:$0xf] }
 0x376   : > { %3479 = vmatpush.bf16.msra.mxu1 %v6948_v50  ;;  %3560 = vmatpush.bf16.msra.mxu2 %v6958_v33  ;;  %v6234_v50 = vld [vmem:[#allocation8 + $0x2d0] sm:$0xf] }
 0x377   : > { %3685 = vmatpush.bf16.msra.mxu3 %v6179_v40  ;;  %3699 = vmatpush.bf16.msrb.mxu0 %v6183_v53  ;;  %v6314_v40 = vld [vmem:[#allocation8 + $0x370] sm:$0xf]  ;;  %v7011_v53 = vld [vmem:[#allocation8 + $0x374] sm:$0xf0] }
 0x37a   : > { %3561 = vmatpush.bf16.msra.mxu2 %v6957_v30  ;;  %v6138_v30 = vld [vmem:[#allocation8 + $0x490] sm:$0xf] }
 0x37e   : > { %3562 = vmatpush.bf16.msra.mxu2 %v6956_v37  ;;  %v6967_v37 = vld [vmem:[#allocation8 + $0x494] sm:$0xf0] }
 0x37f   : > { %v6139_v10 = vor.u32 %v6967_v37, %v6138_v30  ;;  %v7002_v30 = vld [vmem:[#allocation8 + $0x334] sm:$0xf]  ;;  %v6284_v37 = vld [vmem:[#allocation8 + $0x338] sm:$0xf0] }
 0x3f8   : > { %v3294_v55 = vpop.f32.mrf.mxu3 }
 0x3f9   : > { %v3295_v57 = vadd.f32 %v7162_v52, %v3294_v55  ;;  %v6974_v55 = vld [vmem:[#allocation8 + $0x4d4] sm:$0xf] }
 0x400   : > { %v3296_v56 = vpop.f32.mrf.mxu3 }
 0x401   : > { %v3297_v34 = vadd.f32 %v7162_v52, %v3296_v56  ;;  %v6172_v52 = vld [vmem:[#allocation8 + $0x4d8] sm:$0xf0]  ;;  %v6171_v56 = vor.u32 %v6975_v54, %v6170_v46  ;;  %v7010_v46 = vld [vmem:[#allocation8 + $0x374] sm:$0xf] }
 0x402   : > { %v6316_v54 = vld [vmem:[#allocation8 + $0x378] sm:$0xf0] }
 0x403   : > { %v3315_v58 = vpack.c.bf16 %v3297_v34, %v3295_v57  ;;  %v6162_v57 = vld [vmem:[#allocation8 + $0x4c0] sm:$0xf]  ;;  %v6973_v34 = vld [vmem:[#allocation8 + $0x4c4] sm:$0xf0]  ;;  %3686 = vmatpush.bf16.msra.mxu3 %v6171_v56 }
 0x405   : > { %3372 = vmatmul.bf16.vlgmr.msra.gmra.mxu0 %v3315_v58  ;;  %v6175_v58 = vor.u32 %v6974_v55, %v6172_v52  ;;  %v6131_v55 = vor.u32 %v6965_v48, %v6130_v36  ;;  %v6135_v52 = vor.u32 %v6964_v3, %v6132_v49  ;;  %v6274_v36 = vld [vmem:[#allocation8 + $0x320] sm:$0xf]  ;;  %v7001_v48 = vld [vmem:[#allocation8 + $0x324] sm:$0xf0] }
 0x406   : > { %v6275_v49 = vor.u32 %v7001_v48, %v6274_v36  ;;  %v7014_v36 = vld [vmem:[#allocation8 + $0x394] sm:$0xf] }
 0x407   : > { %3700 = vmatpush.bf16.msrb.mxu0 %v6175_v58  ;;  %v6306_v58 = vld [vmem:[#allocation8 + $0x360] sm:$0xf] }
 0x482   : > { %v3373_v63 = vpop.f32.mrf.mxu0 }
 0x483   : > { %v3378_v2 = vsel %vm2512_vm9, %v3373_v63, -1e+30  ;;  %v6995_v63 = vld [vmem:[#allocation8 + $0x2f4] sm:$0xf0] }
 0x484   : > { %3380 = vmax.xlane.f32.xlu0 %v3378_v2  ;;  %v6251_v6 = vor.u32 %v6995_v63, %v6250_v59  ;;  %v7009_v63 = vld [vmem:[#allocation8 + $0x364] sm:$0xf0] }
 0x486   : > { %3812 = vmatpush.bf16.msrb.mxu1 %v6251_v6 }
 0x48a   : > { %v3375_v4 = vpop.f32.mrf.mxu0 }
 0x48b   : > { %v3379_v5 = vsel %vm2512_vm9, %v3375_v4, -1e+30  ;;  %v6972_v4 = vld [vmem:[#allocation8 + $0x4c4] sm:$0xf] }
 0x48c   : > { %3382 = vmax.xlane.f32.xlu0 %v3379_v5 }
 0x4f7   : > { %v3381_v60 = vpop.xlane.xlu0 %3380 }
 0x4f8   : > { %v3384_v42 = vsub.f32 %v3378_v2, %v3381_v60  ;;  %v6994_v2 = vld [vmem:[#allocation8 + $0x2f4] sm:$0xf] }
 0x4f9   : > { %v6255_v60 = vor.u32 %v6994_v2, %v6252_v7  ;;  %v7008_v2 = vld [vmem:[#allocation8 + $0x364] sm:$0xf]  ;;  %v6218_v7 = vld [vmem:[#allocation8 + $0x2b0] sm:$0xf] }
 0x4fa   : > { %v3386_v8 = vmul.f32 1.442695, %v3384_v42  ;;  %v6242_v42 = vld [vmem:[#allocation8 + $0x2e0] sm:$0xf] }
 0x4fb   : > { %3826 = vmatpush.bf16.msrb.mxu2 %v6255_v60  ;;  %v6987_v60 = vld [vmem:[#allocation8 + $0x2b4] sm:$0xf0] }
 0x4fc   : > { %7191 = vpow2.f32 %v3386_v8  ;;  %v6163_v8 = vor.u32 %v6973_v34, %v6162_v57  ;;  %v6315_v57 = vor.u32 %v7011_v53, %v6314_v40  ;;  %v6319_v34 = vor.u32 %v7010_v46, %v6316_v54  ;;  %v7000_v40 = vld [vmem:[#allocation8 + $0x324] sm:$0xf]  ;;  %v6276_v53 = vld [vmem:[#allocation8 + $0x328] sm:$0xf0]  ;;  %v6378_v46 = vld [vmem:[#allocation8 + $0x3f0] sm:$0xf] }
 0x4fd   : > { %v6279_v54 = vor.u32 %v7000_v40, %v6276_v53  ;;  %v7223_v53 = vld [vmem:[#allocation2 + $0x8] sm:$0xff] }
 0x4fe   : > { %3687 = vmatpush.bf16.msra.mxu3 %v6163_v8  ;;  %v6219_v8 = vor.u32 %v6987_v60, %v6218_v7 }
 0x4ff   : > { %v3383_v39 = vpop.xlane.xlu0 %3382 }
 0x500   : > { %v3385_v44 = vsub.f32 %v3379_v5, %v3383_v39  ;;  %v6164_v5 = vld [vmem:[#allocation8 + $0x4c8] sm:$0xf0]  ;;  %v6993_v39 = vld [vmem:[#allocation8 + $0x2e4] sm:$0xf0] }
 0x501   : > { %v6243_v14 = vor.u32 %v6993_v39, %v6242_v42  ;;  %v6986_v42 = vld [vmem:[#allocation8 + $0x2b4] sm:$0xf]  ;;  %v6220_v39 = vld [vmem:[#allocation8 + $0x2b8] sm:$0xf0] }
 0x502   : > { %v7192_v13 = vpop.eup %7191  ;;  %v3388_v15 = vmul.f32 1.442695, %v3385_v44  ;;  %v6992_v44 = vld [vmem:[#allocation8 + $0x2e4] sm:$0xf] }
 0x503   : > { %3390 = vadd.xlane.f32.xlu1 %v7192_v13  ;;  %3813 = vmatpush.bf16.msrb.mxu1 %v6243_v14 }
 0x504   : > { %7193 = vpow2.f32 %v3388_v15  ;;  %v6167_v15 = vor.u32 %v6972_v4, %v6164_v5  ;;  %v6308_v4 = vld [vmem:[#allocation8 + $0x368] sm:$0xf0]  ;;  %v6307_v5 = vor.u32 %v7009_v63, %v6306_v58  ;;  %v6266_v58 = vld [vmem:[#allocation8 + $0x310] sm:$0xf]  ;;  %v6998_v63 = vld [vmem:[#allocation8 + $0x314] sm:$0xf] }
 0x505   : > { %v6311_v6 = vor.u32 %v7008_v2, %v6308_v4  ;;  %v6268_v4 = vld [vmem:[#allocation8 + $0x318] sm:$0xf0] }
 0x506   : > { %3701 = vmatpush.bf16.msrb.mxu0 %v6167_v15  ;;  %v6223_v15 = vor.u32 %v6986_v42, %v6220_v39  ;;  %v6271_v7 = vor.u32 %v6998_v63, %v6268_v4  ;;  %v7024_v42 = vld [vmem:[#allocation8 + $0x3e4] sm:$0xf]  ;;  %v6442_v4 = vld [vmem:[#allocation8 + $0x470] sm:$0xf] }
 0x50a   : > { %v7194_v11 = vpop.eup %7193 }
 0x50b   : > { %3392 = vadd.xlane.f32.xlu1 %v7194_v11 }
 0x576   : > { %v3391_v21 = vpop.xlane.xlu1 %3390 }
 0x577   : > { %7195 = vrcp.f32 %v3391_v21 }
 0x57d   : > { %v7196_v25 = vpop.eup %7195 }
 0x57e   : > { %v3393_v24 = vpop.xlane.xlu1 %3392  ;;  %v3396_v26 = vmul.f32 %v7196_v25, %v7192_v13  ;;  %v6244_v13 = vld [vmem:[#allocation8 + $0x2e8] sm:$0xf0]  ;;  %v6159_v25 = vor.u32 %v6970_v17, %v6156_v1  ;;  %v6300_v17 = vld [vmem:[#allocation8 + $0x358] sm:$0xf0]  ;;  %v6985_v1 = vld [vmem:[#allocation8 + $0x2a4] sm:$0xf0] }
 0x57f   : > { %7197 = vrcp.f32 %v3393_v24  ;;  %v6247_v35 = vor.u32 %v6992_v44, %v6244_v13  ;;  %v6235_v24 = vor.u32 %v6991_v0, %v6234_v50  ;;  %v6298_v44 = vld [vmem:[#allocation8 + $0x350] sm:$0xf]  ;;  %v7007_v13 = vld [vmem:[#allocation8 + $0x354] sm:$0xf0]  ;;  %v6984_v50 = vld [vmem:[#allocation8 + $0x2a4] sm:$0xf] }
 0x580   : > { %v3398_v28 = vpack.c.bf16 %v3396_v26, %v3396_v26  ;;  %3702 = vmatpush.bf16.msrb.mxu0 %v6159_v25  ;;  %v6292_v25 = vld [vmem:[#allocation8 + $0x348] sm:$0xf0] }
 0x581   : > { %3827 = vmatpush.bf16.msrb.mxu2 %v6247_v35  ;;  %3814 = vmatpush.bf16.msrb.mxu1 %v6235_v24  ;;  %v6210_v35 = vld [vmem:[#allocation8 + $0x2a0] sm:$0xf]  ;;  %v7004_v24 = vld [vmem:[#allocation8 + $0x344] sm:$0xf] }
 0x582   : > { %v3420_v43 = vunpack.c.l.b16 %v3398_v28  ;;  %v6226_v28 = vld [vmem:[#allocation8 + $0x2c0] sm:$0xf]  ;;  %v6211_v0 = vor.u32 %v6985_v1, %v6210_v35 }
 0x585   : > { %v7198_v27 = vpop.eup %7197 }
 0x586   : > { %v3397_v20 = vmul.f32 %v7198_v27, %v7194_v11  ;;  %v6154_v11 = vld [vmem:[#allocation8 + $0x4b0] sm:$0xf]  ;;  %v6239_v27 = vor.u32 %v6990_v18, %v6236_v19  ;;  %v6212_v18 = vld [vmem:[#allocation8 + $0x2a8] sm:$0xf0]  ;;  %v6290_v19 = vld [vmem:[#allocation8 + $0x340] sm:$0xf] }
 0x587   : > { %v6155_v21 = vor.u32 %v6971_v16, %v6154_v11  ;;  %v6299_v11 = vor.u32 %v7007_v13, %v6298_v44  ;;  %v7006_v16 = vld [vmem:[#allocation8 + $0x354] sm:$0xf]  ;;  %v6258_v44 = vld [vmem:[#allocation8 + $0x300] sm:$0xf]  ;;  %v6997_v13 = vld [vmem:[#allocation8 + $0x304] sm:$0xf0] }
 0x588   : > { %v3399_v29 = vpack.c.bf16 %v3397_v20, %v3397_v20  ;;  %v7088_v12 = vpack.c.bf16 %v3397_v20, %v3396_v26  ;;  %v6968_v26 = vld [vmem:[#allocation8 + $0x4a4] sm:$0xf]  ;;  %v6989_v20 = vld [vmem:[#allocation8 + $0x2c4] sm:$0xf0]  ;;  %3828 = vmatpush.bf16.msrb.mxu2 %v6239_v27  ;;  %v6303_v14 = vor.u32 %v7006_v16, %v6300_v17  ;;  %v6202_v27 = vld [vmem:[#allocation8 + $0x290] sm:$0xf] }
 0x589   : > { %3688 = vmatpush.bf16.msra.mxu3 %v6155_v21  ;;  %v7005_v21 = vld [vmem:[#allocation8 + $0x344] sm:$0xf0]  ;;  %v6260_v16 = vld [vmem:[#allocation8 + $0x308] sm:$0xf0]  ;;  %v6362_v17 = vld [vmem:[#allocation8 + $0x3d0] sm:$0xf] }
 0x58a   : > { %7089 = vst [vmem:[%s7840_s2] sm:$0xff] %v7088_v12   ;;  %v3421_v31 = vunpack.c.l.b16 %v3399_v29  ;;  %v6148_v29 = vld [vmem:[#allocation8 + $0x4a8] sm:$0xf0]  ;;  %v6988_v12 = vld [vmem:[#allocation8 + $0x2c4] sm:$0xf] }
 0x58b   : > { %v6151_v33 = vor.u32 %v6968_v26, %v6148_v29  ;;  %v6295_v26 = vor.u32 %v7004_v24, %v6292_v25 }
 0x58c   : > { %v3422_v32 = vpack.c.b16 %v3421_v31, %v3420_v43  ;;  %v6228_v43 = vld [vmem:[#allocation8 + $0x2c8] sm:$0xf0]  ;;  %v6147_v31 = vor.u32 %v6969_v22, %v6146_v61  ;;  %v6215_v61 = vor.u32 %v6984_v50, %v6212_v18  ;;  %v6291_v22 = vor.u32 %v7005_v21, %v6290_v19  ;;  %v7022_v50 = vld [vmem:[#allocation8 + $0x3d4] sm:$0xf]  ;;  %v6354_v19 = vld [vmem:[#allocation8 + $0x3c0] sm:$0xf] }
 0x58d   : > { %v6231_v38 = vor.u32 %v6988_v12, %v6228_v43  ;;  %3703 = vmatpush.bf16.msrb.mxu0 %v6151_v33  ;;  %v6204_v12 = vld [vmem:[#allocation8 + $0x298] sm:$0xf0]  ;;  %v6282_v43 = vld [vmem:[#allocation8 + $0x330] sm:$0xf]  ;;  %v7021_v21 = vld [vmem:[#allocation8 + $0x3c4] sm:$0xf0] }
 0x58e   : > { %3480 = vmatmul.bf16.vlgmr.msra.gmra.mxu1 %v3422_v32  ;;  %v6227_v32 = vor.u32 %v6989_v20, %v6226_v28  ;;  %3689 = vmatpush.bf16.msra.mxu3 %v6147_v31  ;;  %v6983_v28 = vld [vmem:[#allocation8 + $0x294] sm:$0xf0]  ;;  %v6982_v20 = vld [vmem:[#allocation8 + $0x294] sm:$0xf]  ;;  %v6355_v24 = vor.u32 %v7021_v21, %v6354_v19 }
 0x58f   : > { %3829 = vmatpush.bf16.msrb.mxu2 %v6231_v38  ;;  %v6203_v29 = vor.u32 %v6983_v28, %v6202_v27  ;;  %v7003_v31 = vld [vmem:[#allocation8 + $0x334] sm:$0xf0]  ;;  %v6287_v38 = vor.u32 %v7002_v30, %v6284_v37  ;;  %v7018_v28 = vld [vmem:[#allocation8 + $0x3b4] sm:$0xf]  ;;  %v6340_v30 = vld [vmem:[#allocation8 + $0x3a8] sm:$0xf0] }
 0x590   : > { %3815 = vmatpush.bf16.msrb.mxu1 %v6227_v32  ;;  %v6207_v32 = vor.u32 %v6982_v20, %v6204_v12  ;;  %v6283_v33 = vor.u32 %v7003_v31, %v6282_v43  ;;  %v7019_v27 = vld [vmem:[#allocation8 + $0x3b4] sm:$0xf0]  ;;  %v7163_v20 = vld [vmem:[%s8037_s13] ss:$0 sm:$0xff]  ;;  %v6348_v12 = vld [vmem:[#allocation8 + $0x3b8] sm:$0xf0] }
 0x591   : > { %3704 = vmatpush.bf16.msrb.mxu0 %v6143_v9  ;;  %v6196_v9 = vld [vmem:[#allocation8 + $0x288] sm:$0xf0]  ;;  %v6351_v43 = vor.u32 %v7018_v28, %v6348_v12  ;;  %v6338_v31 = vld [vmem:[#allocation8 + $0x3a0] sm:$0xf]  ;;  %v7035_v12 = vld [vmem:[#allocation8 + $0x434] sm:$0xf0] }
 0x592   : > { %3690 = vmatpush.bf16.msra.mxu3 %v6139_v10  ;;  %v6199_v3 = vor.u32 %v6980_v47, %v6196_v9  ;;  %v7015_v9 = vld [vmem:[#allocation8 + $0x394] sm:$0xf0] }
 0x593   : > { %3830 = vmatpush.bf16.msrb.mxu2 %v6223_v15  ;;  %v6996_v15 = vld [vmem:[#allocation8 + $0x304] sm:$0xf] }
 0x594   : > { %3816 = vmatpush.bf16.msrb.mxu1 %v6219_v8  ;;  %v6372_v8 = vld [vmem:[#allocation8 + $0x3e8] sm:$0xf0]  ;;  %v6263_v35 = vor.u32 %v6996_v15, %v6260_v16  ;;  %v7041_v15 = vld [vmem:[#allocation8 + $0x464] sm:$0xf0] }
 0x595   : > { %3705 = vmatpush.bf16.msrb.mxu0 %v6135_v52  ;;  %v7026_v52 = vld [vmem:[#allocation8 + $0x3f4] sm:$0xf]  ;;  %v6375_v39 = vor.u32 %v7024_v42, %v6372_v8  ;;  %v6444_v42 = vld [vmem:[#allocation8 + $0x478] sm:$0xf0]  ;;  %v6436_v16 = vld [vmem:[#allocation8 + $0x468] sm:$0xf0] }
 0x596   : > { %3691 = vmatpush.bf16.msra.mxu3 %v6131_v55  ;;  %v7027_v55 = vld [vmem:[#allocation8 + $0x3f4] sm:$0xf0] }
 0x597   : > { %3831 = vmatpush.bf16.msrb.mxu2 %v6215_v61  ;;  %v7020_v61 = vld [vmem:[#allocation8 + $0x3c4] sm:$0xf] }
 0x598   : > { %3817 = vmatpush.bf16.msrb.mxu1 %v6211_v0  ;;  %v6364_v0 = vld [vmem:[#allocation8 + $0x3d8] sm:$0xf0] }
 0x599   : > { %3958 = vmatpush.bf16.msra.mxu0 %v6319_v34  ;;  %v6367_v18 = vor.u32 %v7022_v50, %v6364_v0  ;;  %v7038_v50 = vld [vmem:[#allocation8 + $0x454] sm:$0xf]  ;;  %v6428_v0 = vld [vmem:[#allocation8 + $0x458] sm:$0xf0] }
 0x59a   : > { %3944 = vmatpush.bf16.msrb.mxu3 %v6315_v57  ;;  %v6379_v57 = vor.u32 %v7027_v55, %v6378_v46  ;;  %v7013_v55 = vld [vmem:[#allocation8 + $0x384] sm:$0xf0] }
 0x59b   : > { %3832 = vmatpush.bf16.msrb.mxu2 %v6207_v32  ;;  %v7017_v32 = vld [vmem:[#allocation8 + $0x3a4] sm:$0xf0] }
 0x59c   : > { %3818 = vmatpush.bf16.msrb.mxu1 %v6203_v29 }
 0x59d   : > { %3959 = vmatpush.bf16.msra.mxu0 %v6311_v6  ;;  %v7025_v6 = vld [vmem:[#allocation8 + $0x3e4] sm:$0xf0] }
 0x59e   : > { %3945 = vmatpush.bf16.msrb.mxu3 %v6307_v5  ;;  %v6370_v5 = vld [vmem:[#allocation8 + $0x3e0] sm:$0xf] }
 0x59f   : > { %3833 = vmatpush.bf16.msrb.mxu2 %v6199_v3  ;;  %v6371_v60 = vor.u32 %v7025_v6, %v6370_v5  ;;  %v7224_v5 = vld [vmem:[#allocation2 + $0x10] sm:$0xff] }
 0x5a1   : > { %3960 = vmatpush.bf16.msra.mxu0 %v6303_v14  ;;  %v7023_v14 = vld [vmem:[#allocation8 + $0x3d4] sm:$0xf0] }
 0x5a2   : > { %3946 = vmatpush.bf16.msrb.mxu3 %v6299_v11  ;;  %v6259_v11 = vor.u32 %v6997_v13, %v6258_v44  ;;  %v6363_v1 = vor.u32 %v7023_v14, %v6362_v17  ;;  %v6434_v13 = vld [vmem:[#allocation8 + $0x460] sm:$0xf] }
 0x5a3   : > { %v6435_v17 = vor.u32 %v7041_v15, %v6434_v13  ;;  %v7050_v15 = vld [vmem:[%s8034_s10 + $0x70] sm:$0xff] }
 0x5a5   : > { %3961 = vmatpush.bf16.msra.mxu0 %v6295_v26  ;;  %v6346_v26 = vld [vmem:[#allocation8 + $0x3b0] sm:$0xf] }
 0x5a6   : > { %3947 = vmatpush.bf16.msrb.mxu3 %v6291_v22  ;;  %v6356_v22 = vld [vmem:[#allocation8 + $0x3c8] sm:$0xf0]  ;;  %v6347_v29 = vor.u32 %v7019_v27, %v6346_v26  ;;  %v7036_v26 = vld [vmem:[#allocation8 + $0x444] sm:$0xf] }
 0x5a7   : > { %v6359_v25 = vor.u32 %v7020_v61, %v6356_v22  ;;  %v6431_v61 = vor.u32 %v7038_v50, %v6428_v0  ;;  %v6418_v22 = vld [vmem:[#allocation8 + $0x440] sm:$0xf]  ;;  %v6420_v27 = vld [vmem:[#allocation8 + $0x448] sm:$0xf0] }
 0x5a9   : > { %3962 = vmatpush.bf16.msra.mxu0 %v6287_v38 }
 0x5aa   : > { %3948 = vmatpush.bf16.msrb.mxu3 %v6283_v33  ;;  %v7016_v33 = vld [vmem:[#allocation8 + $0x3a4] sm:$0xf] }
 0x5ad   : > { %3963 = vmatpush.bf16.msra.mxu0 %v6279_v54  ;;  %v6322_v54 = vld [vmem:[#allocation8 + $0x380] sm:$0xf] }
 0x5ae   : > { %3949 = vmatpush.bf16.msrb.mxu3 %v6275_v49  ;;  %v6332_v49 = vld [vmem:[#allocation8 + $0x398] sm:$0xf0] }
 0x5af   : > { %v6335_v40 = vor.u32 %v7014_v36, %v6332_v49  ;;  %v7030_v49 = vld [vmem:[#allocation8 + $0x414] sm:$0xf] }
 0x5b1   : > { %3964 = vmatpush.bf16.msra.mxu0 %v6271_v7  ;;  %v7043_v7 = vld [vmem:[#allocation8 + $0x474] sm:$0xf0] }
 0x5b5   : > { %3965 = vmatpush.bf16.msra.mxu0 %v6263_v35  ;;  %v6426_v35 = vld [vmem:[#allocation8 + $0x450] sm:$0xf] }
 0x60b   : > { %v3481_v41 = vpop.f32.mrf.mxu1 }
 0x613   : > { %v3483_v56 = vpop.f32.mrf.mxu1 }
 0x614   : > { %v3502_v59 = vpack.c.bf16 %v3483_v56, %v3481_v41  ;;  %v6194_v41 = vld [vmem:[#allocation8 + $0x280] sm:$0xf]  ;;  %v6380_v56 = vld [vmem:[#allocation8 + $0x3f8] sm:$0xf0] }
 0x615   : > { %v6195_v10 = vor.u32 %v6981_v45, %v6194_v41  ;;  %v6383_v34 = vor.u32 %v7026_v52, %v6380_v56  ;;  %v6339_v41 = vor.u32 %v7017_v32, %v6338_v31  ;;  %v6343_v45 = vor.u32 %v7016_v33, %v6340_v30  ;;  %v7012_v52 = vld [vmem:[#allocation8 + $0x384] sm:$0xf]  ;;  %v6412_v31 = vld [vmem:[#allocation8 + $0x438] sm:$0xf0] }
 0x616   : > { %3563 = vmatmul.bf16.vlgmr.msra.gmra.mxu2 %v3502_v59  ;;  %v6999_v59 = vld [vmem:[#allocation8 + $0x314] sm:$0xf0] }
 0x617   : > { %3819 = vmatpush.bf16.msrb.mxu1 %v6195_v10  ;;  %v6267_v2 = vor.u32 %v6999_v59, %v6266_v58  ;;  %4090 = vmatpush.bf16.msra.mxu2 %v6383_v34  ;;  %v6330_v10 = vld [vmem:[#allocation8 + $0x390] sm:$0xf] }
 0x618   : > { %v6331_v3 = vor.u32 %v7015_v9, %v6330_v10  ;;  %v6404_v10 = vld [vmem:[#allocation8 + $0x428] sm:$0xf0] }
 0x619   : > { %3950 = vmatpush.bf16.msrb.mxu3 %v6267_v2 }
 0x61b   : > { %4076 = vmatpush.bf16.msra.mxu1 %v6379_v57  ;;  %4091 = vmatpush.bf16.msra.mxu2 %v6375_v39  ;;  %v6324_v57 = vld [vmem:[#allocation8 + $0x388] sm:$0xf0]  ;;  %v6443_v39 = vor.u32 %v7043_v7, %v6442_v4 }
 0x61c   : > { %v6327_v59 = vor.u32 %v7012_v52, %v6324_v57  ;;  %v6386_v52 = vld [vmem:[#allocation8 + $0x400] sm:$0xf]  ;;  %v7029_v57 = vld [vmem:[#allocation8 + $0x404] sm:$0xf0] }
 0x61d   : > { %3951 = vmatpush.bf16.msrb.mxu3 %v6259_v11  ;;  %v7040_v11 = vld [vmem:[#allocation8 + $0x464] sm:$0xf] }
 0x61e   : > { %v6439_v14 = vor.u32 %v7040_v11, %v6436_v16  ;;  %v7049_v11 = vld [vmem:[%s8034_s10 + $0x68] sm:$0xff] }
 0x61f   : > { %4077 = vmatpush.bf16.msra.mxu1 %v6371_v60  ;;  %4092 = vmatpush.bf16.msra.mxu2 %v6367_v18  ;;  %v7042_v60 = vld [vmem:[#allocation8 + $0x474] sm:$0xf] }
 0x620   : > { %v6447_v44 = vor.u32 %v7042_v60, %v6444_v42  ;;  %v7051_v60 = vld [vmem:[%s8034_s10 + $0x78] sm:$0xff] }
 0x623   : > { %4078 = vmatpush.bf16.msra.mxu1 %v6363_v1  ;;  %4093 = vmatpush.bf16.msra.mxu2 %v6359_v25  ;;  %v7039_v1 = vld [vmem:[#allocation8 + $0x454] sm:$0xf0]  ;;  %v7037_v25 = vld [vmem:[#allocation8 + $0x444] sm:$0xf0] }
 0x624   : > { %v6427_v21 = vor.u32 %v7039_v1, %v6426_v35  ;;  %v6419_v28 = vor.u32 %v7037_v25, %v6418_v22  ;;  %v7048_v1 = vld [vmem:[%s8034_s10 + $0x60] sm:$0xff] }
 0x627   : > { %4079 = vmatpush.bf16.msra.mxu1 %v6355_v24  ;;  %4094 = vmatpush.bf16.msra.mxu2 %v6351_v43  ;;  %v7034_v43 = vld [vmem:[#allocation8 + $0x434] sm:$0xf] }
 0x62b   : > { %4080 = vmatpush.bf16.msra.mxu1 %v6347_v29  ;;  %4095 = vmatpush.bf16.msra.mxu2 %v6343_v45  ;;  %v6410_v29 = vld [vmem:[#allocation8 + $0x430] sm:$0xf]  ;;  %v7033_v45 = vld [vmem:[#allocation8 + $0x424] sm:$0xf0] }
 0x62c   : > { %v6411_v30 = vor.u32 %v7035_v12, %v6410_v29  ;;  %v7045_v12 = vld [vmem:[%s8034_s10 + $0x48] sm:$0xff] }
 0x62f   : > { %4081 = vmatpush.bf16.msra.mxu1 %v6339_v41  ;;  %4096 = vmatpush.bf16.msra.mxu2 %v6335_v40  ;;  %v6396_v40 = vld [vmem:[#allocation8 + $0x418] sm:$0xf0] }
 0x633   : > { %4082 = vmatpush.bf16.msra.mxu1 %v6331_v3  ;;  %4097 = vmatpush.bf16.msra.mxu2 %v6327_v59  ;;  %v7031_v3 = vld [vmem:[#allocation8 + $0x414] sm:$0xf0]  ;;  %v6387_v59 = vor.u32 %v7029_v57, %v6386_v52  ;;  %v7056_v52 = vld [vmem:[%s7588_s19 + $0x60] sm:$0xff] }
 0x699   : > { %v3564_v37 = vpop.f32.mrf.mxu2 }
 0x69a   : > { %v3565_v38 = vadd.f32 %v7163_v20, %v3564_v37  ;;  %v6415_v37 = vor.u32 %v7034_v43, %v6412_v31 }
 0x69c   : > { %v3569_v47 = vadd.f32 %v3565_v38, %v7793_v51  ;;  %v6323_v51 = vor.u32 %v7013_v55, %v6322_v54  ;;  %v6402_v38 = vld [vmem:[#allocation8 + $0x420] sm:$0xf]  ;;  %v6399_v55 = vor.u32 %v7030_v49, %v6396_v40 }
 0x69d   : > { %v6403_v9 = vor.u32 %v7033_v45, %v6402_v38 }
 0x69e   : > { %v3571_v48 = vmul.f32 0.70710677, %v3569_v47  ;;  %4083 = vmatpush.bf16.msra.mxu1 %v6323_v51  ;;  %v7032_v47 = vld [vmem:[#allocation8 + $0x424] sm:$0xf]  ;;  %v6388_v51 = vld [vmem:[#allocation8 + $0x408] sm:$0xf0] }
 0x69f   : > { %v6407_v36 = vor.u32 %v7032_v47, %v6404_v10  ;;  %v7059_v47 = vld [vmem:[%s7588_s19 + $0x78] sm:$0xff] }
 0x6a0   : > { %v3573_v46 = vadd.f32 %v7223_v53, %v3571_v48  ;;  %v6394_v48 = vld [vmem:[#allocation8 + $0x410] sm:$0xf] }
 0x6a1   : > { %v3566_v56 = vpop.f32.mrf.mxu2  ;;  %v6395_v54 = vor.u32 %v7031_v3, %v6394_v48  ;;  %v7057_v3 = vld [vmem:[%s7588_s19 + $0x68] sm:$0xff] }
 0x6a2   : > { %v7856_v34 = vmul.f32 0.70710677, %v3573_v46  ;;  %v3567_v58 = vadd.f32 %v7163_v20, %v3566_v56  ;;  %v6423_v20 = vor.u32 %v7036_v26, %v6420_v27  ;;  %v7046_v26 = vld [vmem:[%s8034_s10 + $0x50] sm:$0xff] }
 0x6a4   : > { %3577 = vst [vmem:[#allocation2 + $0x8] sm:$0xff] %v7856_v34  ;;  %v3570_v63 = vadd.f32 %v3567_v58, %v7795_v23  ;;  %v7028_v58 = vld [vmem:[#allocation8 + $0x404] sm:$0xf] }
 0x6a6   : > { %v3572_v2 = vmul.f32 0.70710677, %v3570_v63  ;;  %v6391_v63 = vor.u32 %v7028_v58, %v6388_v51 }
 0x6a8   : > { %v3574_v6 = vadd.f32 %v7224_v5, %v3572_v2 }
 0x6aa   : > { %v7860_v8 = vmul.f32 0.70710677, %v3574_v6 }
 0x6ab   : > { %v3712_v18 = vld [vmem:[#allocation2 + $0x4] sm:$0xff] }
 0x6ac   : > { %3578 = vst [vmem:[#allocation2 + $0x10] sm:$0xff] %v7860_v8  ;;  %v3596_v23 = vpack.c.bf16 %v7860_v8, %v7856_v34  ;;  %v3844_v33 = vld [vmem:[#allocation2 + $0x5] sm:$0xff] }
 0x6ad   : > { %v3976_v46 = vld [vmem:[#allocation2 + $0x6] sm:$0xff] }
 0x6ae   : > { %3692 = vmatmul.bf16.vlgmr.msra.gmra.mxu3 %v3596_v23  ;;  %3706 = vmatmul.bf16.vlgmr.msrb.gmra.mxu0 %v3596_v23  ;;  %v4108_v4 = vld [vmem:[#allocation2 + $0x7] sm:$0xff] }
 0x6af   : > { %4208 = vmatpush.bf16.msra.mxu3 %v6443_v39  ;;  %4222 = vmatpush.bf16.msrb.mxu0 %v6447_v44  ;;  %v7871_v39 = vld [vmem:[%s8033_s9 + $0x2] sm:$0x3] }
 0x6b0   : > { %v3601_v23 = vperm.slane %v7871_v39, 1 }
 0x6b3   : > { %4209 = vmatpush.bf16.msra.mxu3 %v6435_v17  ;;  %4223 = vmatpush.bf16.msrb.mxu0 %v6439_v14  ;;  %v3713_v19 = vld [vmem:[#allocation2 + $0xc] sm:$0xff] }
 0x6b4   : > { %v3731_v24 = vpack.c.bf16 %v3713_v19, %v3712_v18  ;;  %v3845_v32 = vld [vmem:[#allocation2 + $0xd] sm:$0xff]  ;;  %v7047_v18 = vld [vmem:[%s8034_s10 + $0x58] sm:$0xff] }
 0x6b5   : > { %v3863_v41 = vpack.c.bf16 %v3845_v32, %v3844_v33  ;;  %v3977_v53 = vld [vmem:[#allocation2 + $0xe] sm:$0xff] }
 0x6b6   : > { %3820 = vmatmul.bf16.vlgmr.msrb.gmra.mxu1 %v3731_v24  ;;  %3834 = vmatmul.bf16.vlgmr.msrb.gmra.mxu2 %v3731_v24  ;;  %v3995_v56 = vpack.c.bf16 %v3977_v53, %v3976_v46  ;;  %v4109_v2 = vld [vmem:[#allocation2 + $0xf] sm:$0xff] }
 0x6b7   : > { %4210 = vmatpush.bf16.msra.mxu3 %v6427_v21  ;;  %4224 = vmatpush.bf16.msrb.mxu0 %v6431_v61  ;;  %v4127_v5 = vpack.c.bf16 %v4109_v2, %v4108_v4 }
 0x6b8   : > { %4353 = vmatpush.bf16.msrb.mxu1 %v7051_v60  ;;  %4433 = vmatpush.bf16.msrb.mxu2 %v7059_v47 }
 0x6bb   : > { %4211 = vmatpush.bf16.msra.mxu3 %v6419_v28  ;;  %4225 = vmatpush.bf16.msrb.mxu0 %v6423_v20 }
 0x6bc   : > { %4354 = vmatpush.bf16.msrb.mxu1 %v7050_v15 }
 0x6be   : > { %3952 = vmatmul.bf16.vlgmr.msrb.gmra.mxu3 %v3863_v41  ;;  %3966 = vmatmul.bf16.vlgmr.msra.gmra.mxu0 %v3863_v41 }
 0x6bf   : > { %4212 = vmatpush.bf16.msra.mxu3 %v6411_v30  ;;  %4226 = vmatpush.bf16.msrb.mxu0 %v6415_v37  ;;  %v7044_v30 = vld [vmem:[%s8034_s10 + $0x40] sm:$0xff] }
 0x6c0   : > { %4355 = vmatpush.bf16.msrb.mxu1 %v7049_v11 }
 0x6c3   : > { %4213 = vmatpush.bf16.msra.mxu3 %v6403_v9  ;;  %4227 = vmatpush.bf16.msrb.mxu0 %v6407_v36  ;;  %v7058_v9 = vld [vmem:[%s7588_s19 + $0x70] sm:$0xff]  ;;  %v3600_v36 = vperm.slane %v7871_v39, 0 }
 0x6c4   : > { %4356 = vmatpush.bf16.msrb.mxu1 %v7048_v1  ;;  %4434 = vmatpush.bf16.msrb.mxu2 %v7058_v9  ;;  %v7067_v9 = vld [vmem:[%s7590_s22 + $0x78] sm:$0xff] }
 0x6c6   : > { %4084 = vmatmul.bf16.vlgmr.msra.gmra.mxu1 %v3995_v56  ;;  %4098 = vmatmul.bf16.vlgmr.msra.gmra.mxu2 %v3995_v56 }
 0x6c7   : > { %4214 = vmatpush.bf16.msra.mxu3 %v6395_v54  ;;  %4228 = vmatpush.bf16.msrb.mxu0 %v6399_v55 }
 0x6c8   : > { %4357 = vmatpush.bf16.msrb.mxu1 %v7047_v18  ;;  %4435 = vmatpush.bf16.msrb.mxu2 %v7057_v3 }
 0x6cb   : > { %4215 = vmatpush.bf16.msra.mxu3 %v6387_v59  ;;  %4229 = vmatpush.bf16.msrb.mxu0 %v6391_v63  ;;  %v7055_v63 = vld [vmem:[%s7588_s19 + $0x58] sm:$0xff] }
 0x6cc   : > { %4358 = vmatpush.bf16.msrb.mxu1 %v7046_v26  ;;  %4436 = vmatpush.bf16.msrb.mxu2 %v7056_v52  ;;  %v7064_v52 = vld [vmem:[%s7590_s22 + $0x60] sm:$0xff] }
 0x6ce   : > { %4216 = vmatmul.bf16.vlgmr.msra.gmra.mxu3 %v4127_v5  ;;  %4230 = vmatmul.bf16.vlgmr.msrb.gmra.mxu0 %v4127_v5 }
 0x6cf   : > { %4543 = vmatpush.bf16.msrb.mxu3 %v7067_v9 }
 0x6d0   : > { %4359 = vmatpush.bf16.msrb.mxu1 %v7045_v12  ;;  %4437 = vmatpush.bf16.msrb.mxu2 %v7055_v63  ;;  %v7053_v12 = vld [vmem:[%s7588_s19 + $0x48] sm:$0xff]  ;;  %v7074_v63 = vld [vmem:[%s8036_s12 + $0x70] sm:$0xff] }
 0x6d4   : > { %4360 = vmatpush.bf16.msrb.mxu1 %v7044_v30 }
 0x72b   : > { %v3707_v6 = vpop.f32.mrf.mxu0 }
 0x72c   : > { %v3708_v17 = vadd.f32 %v3707_v6, %v3601_v23 }
 0x731   : > { %v3693_v44 = vpop.f32.mrf.mxu3 }
 0x732   : > { %v3694_v46 = vadd.f32 %v3693_v44, %v3600_v36 }
 0x733   : > { %v3709_v7 = vpop.f32.mrf.mxu0  ;;  %v3821_v27 = vpop.f32.mrf.mxu1 }
 0x734   : > { %v3710_v21 = vadd.f32 %v3709_v7, %v3601_v23  ;;  %v3840_v51 = vadd.f32 %v3821_v27, %v3694_v46  ;;  %v7226_v27 = vld [vmem:[%s7789_s25 + $0x8] sm:$0xff] }
 0x739   : > { %v3835_v42 = vpop.f32.mrf.mxu2  ;;  %v3695_v50 = vpop.f32.mrf.mxu3 }
 0x73a   : > { %v3841_v35 = vadd.f32 %v3835_v42, %v3708_v17  ;;  %v3696_v57 = vadd.f32 %v3695_v50, %v3600_v36  ;;  %v7066_v36 = vld [vmem:[%s7590_s22 + $0x70] sm:$0xff] }
 0x73b   : > { %v3967_v13 = vpop.f32.mrf.mxu0  ;;  %v3823_v41 = vpop.f32.mrf.mxu1  ;;  %4544 = vmatpush.bf16.msrb.mxu3 %v7066_v36 }
 0x73c   : > { %v3973_v0 = vadd.f32 %v3967_v13, %v3841_v35  ;;  %v3842_v6 = vadd.f32 %v3823_v41, %v3696_v57  ;;  %v7062_v57 = vld [vmem:[%s7590_s22 + $0x50] sm:$0xff] }
 0x741   : > { %v3837_v16 = vpop.f32.mrf.mxu2  ;;  %v3953_v20 = vpop.f32.mrf.mxu3 }
 0x742   : > { %v3843_v24 = vadd.f32 %v3837_v16, %v3710_v21  ;;  %v3972_v4 = vadd.f32 %v3953_v20, %v3840_v51  ;;  %v7060_v51 = vld [vmem:[%s7590_s22 + $0x40] sm:$0xff] }
 0x743   : > { %v3969_v14 = vpop.f32.mrf.mxu0  ;;  %v4085_v54 = vpop.f32.mrf.mxu1 }
 0x744   : > { %v3975_v29 = vadd.f32 %v3969_v14, %v3843_v24  ;;  %v4104_v13 = vadd.f32 %v4085_v54, %v3972_v4 }
 0x749   : > { %v4099_v19 = vpop.f32.mrf.mxu2  ;;  %v3955_v10 = vpop.f32.mrf.mxu3 }
 0x74a   : > { %v4105_v61 = vadd.f32 %v4099_v19, %v3973_v0  ;;  %v3974_v42 = vadd.f32 %v3955_v10, %v3842_v6  ;;  %v7071_v6 = vld [vmem:[%s8036_s12 + $0x58] sm:$0xff] }
 0x74b   : > { %v4231_v22 = vpop.f32.mrf.mxu0  ;;  %v4087_v15 = vpop.f32.mrf.mxu1 }
 0x74c   : > { %v4237_v25 = vadd.f32 %v4231_v22, %v4105_v61  ;;  %v4106_v1 = vadd.f32 %v4087_v15, %v3974_v42 }
 0x74e   : > { %v6448_v28 = vmul.f32 -1.442695, %v4237_v25  ;;  %v7225_v25 = vld [vmem:[%s7789_s25] sm:$0xff] }
 0x750   : > { %7199 = vpow2.f32 %v6448_v28 }
 0x751   : > { %v4101_v43 = vpop.f32.mrf.mxu2  ;;  %v4217_v56 = vpop.f32.mrf.mxu3 }
 0x752   : > { %v4107_v31 = vadd.f32 %v4101_v43, %v3975_v29  ;;  %v4236_v50 = vadd.f32 %v4217_v56, %v4104_v13  ;;  %v7054_v29 = vld [vmem:[%s7588_s19 + $0x50] sm:$0xff]  ;;  %v7052_v43 = vld [vmem:[%s7588_s19 + $0x40] sm:$0xff]  ;;  %v7063_v56 = vld [vmem:[%s7590_s22 + $0x58] sm:$0xff]  ;;  %s996_s19 = scalar_lea.vmem [#allocation10], %s5006_s6 }
 0x753   : > { %v4233_v32 = vpop.f32.mrf.mxu0  ;;  %4438 = vmatpush.bf16.msrb.mxu2 %v7054_v29  ;;  %v7165_v29 = vld [vmem:[%s8037_s13 + $0x1] ss:$0 sm:$0xff]  ;;  %s4798_s25 = sshll.u32 %s996_s19, 4  ;;  %s4799_s25 = int_to_ptr.vmem [resolvable:$true] %s4798_s25 }
 0x754   : > { %v4239_v33 = vadd.f32 %v4233_v32, %v4107_v31  ;;  %v7164_v32 = vld [vmem:[%s8035_s11 + $0x1] ss:$0 sm:$0xff] }
 0x756   : > { %v7200_v37 = vpop.eup %7199  ;;  %v6449_v38 = vmul.f32 -1.442695, %v4239_v33 }
 0x757   : > { %v4246_v45 = vadd.f32 1.0, %v7200_v37  ;;  %4439 = vmatpush.bf16.msrb.mxu2 %v7053_v12 }
 0x758   : > { %7201 = vpow2.f32 %v6449_v38 }
 0x759   : > { %7203 = vrcp.f32 %v4246_v45  ;;  %v4259_v5 = vand.u32 2147483648, %v4246_v45  ;;  %vm4253_vm11 = vweird.f32 %v4246_v45  ;;  %v4257_v7 = vand.u32 2147483647, %v4246_v45  ;;  %v4219_v35 = vpop.f32.mrf.mxu3 }
 0x75a   : > { %v4238_v21 = vadd.f32 %v4219_v35, %v4106_v1  ;;  %v7069_v35 = vld [vmem:[%s8036_s12 + $0x48] sm:$0xff]  ;;  %v7068_v1 = vld [vmem:[%s8036_s12 + $0x40] sm:$0xff] }
 0x75b   : > { %v4260_v23 = vor.u32 1.1754944e-38, %v4259_v5  ;;  %vm4258_vm13 = vcmp.eq.f32.partialorder %v4257_v7, 8.507059e+37  ;;  %4440 = vmatpush.bf16.msrb.mxu2 %v7052_v43  ;;  %v7072_v5 = vld [vmem:[%s8036_s12 + $0x60] sm:$0xff] }
 0x75e   : > { %v7202_v48 = vpop.eup %7201 }
 0x75f   : > { %v7204_v49 = vpop.eup %7203  ;;  %v4247_v40 = vadd.f32 1.0, %v7202_v48 }
 0x760   : > { %v4249_v53 = vmul.f32 %v7204_v49, %v4246_v45  ;;  %vm4254_vm10 = vweird.f32 %v7204_v49 }
 0x761   : > { %7205 = vrcp.f32 %v4247_v40  ;;  %vm4255_vm12 = vmor %vm4253_vm11, %vm4254_vm10  ;;  %v4274_v11 = vand.u32 2147483648, %v4247_v40  ;;  %v4272_v17 = vand.u32 2147483647, %v4247_v40  ;;  %vm4268_vm15 = vweird.f32 %v4247_v40 }
 0x762   : > { %v4250_v55 = vsub.f32 1.0, %v4249_v53 }
 0x763   : > { %v4275_v18 = vor.u32 1.1754944e-38, %v4274_v11  ;;  %vm4273_vm1 = vcmp.eq.f32.partialorder %v4272_v17, 8.507059e+37 }
 0x764   : > { %v4251_v58 = vmul.f32 %v7204_v49, %v4250_v55  ;;  %v7065_v55 = vld [vmem:[%s7590_s22 + $0x68] sm:$0xff] }
 0x765   : > { %4545 = vmatpush.bf16.msrb.mxu3 %v7065_v55 }
 0x766   : > { %v4252_v59 = vadd.f32 %v7204_v49, %v4251_v58  ;;  %v7061_v58 = vld [vmem:[%s7590_s22 + $0x48] sm:$0xff] }
 0x767   : > { %v7206_v2 = vpop.eup %7205 }
 0x768   : > { %v4264_v60 = vmul.f32 %v7206_v2, %v4247_v40  ;;  %v4256_v39 = vsel %vm4255_vm12, %v7204_v49, %v4252_v59  ;;  %vm4269_vm14 = vweird.f32 %v7206_v2  ;;  %v7075_v59 = vld [vmem:[%s8036_s12 + $0x78] sm:$0xff] }
 0x769   : > { %v4261_v14 = vsel %vm4258_vm13, %v4260_v23, %v4256_v39  ;;  %vm4270_vm0 = vmor %vm4268_vm15, %vm4269_vm14  ;;  %4546 = vmatpush.bf16.msrb.mxu3 %v7064_v52  ;;  %4628 = vmatpush.bf16.msra.mxu0 %v7075_v59 }
 0x76a   : > { %v4265_v44 = vsub.f32 1.0, %v4264_v60  ;;  %v4278_v19 = vmul.f32 %v4261_v14, %v4236_v50  ;;  %v7070_v14 = vld [vmem:[%s8036_s12 + $0x50] sm:$0xff]  ;;  %v7083_v50 = vld [vmem:[%s8038_s14 + $0x38] sm:$0xff] }
 0x76b   : > { %4721 = vmatpush.bf16.msra.mxu1 %v7083_v50 }
 0x76c   : > { %v4266_v16 = vmul.f32 %v7206_v2, %v4265_v44  ;;  %v7902_v26 = vadd.f32 %v7225_v25, %v4278_v19  ;;  %v7078_v25 = vld [vmem:[%s8038_s14 + $0x10] sm:$0xff] }
 0x76d   : > { %4547 = vmatpush.bf16.msrb.mxu3 %v7063_v56  ;;  %4629 = vmatpush.bf16.msra.mxu0 %v7074_v63 }
 0x76e   : > { %v4267_v0 = vadd.f32 %v7206_v2, %v4266_v16 }
 0x770   : > { %v4271_v61 = vsel %vm4270_vm0, %v7206_v2, %v4267_v0  ;;  %v7073_v2 = vld [vmem:[%s8036_s12 + $0x68] sm:$0xff]  ;;  %v7082_v0 = vld [vmem:[%s8038_s14 + $0x30] sm:$0xff] }
 0x771   : > { %v4276_v22 = vsel %vm4273_vm1, %v4275_v18, %v4271_v61  ;;  %4548 = vmatpush.bf16.msrb.mxu3 %v7062_v57  ;;  %4630 = vmatpush.bf16.msra.mxu0 %v7073_v2  ;;  %v7081_v18 = vld [vmem:[%s8038_s14 + $0x28] sm:$0xff] }
 0x772   : > { %v4279_v24 = vmul.f32 %v4276_v22, %v4238_v21  ;;  %4722 = vmatpush.bf16.msra.mxu1 %v7082_v0  ;;  %v7080_v22 = vld [vmem:[%s8038_s14 + $0x20] sm:$0xff] }
 0x774   : > { %v7905_v28 = vadd.f32 %v7226_v27, %v4279_v24  ;;  %v7079_v24 = vld [vmem:[%s8038_s14 + $0x18] sm:$0xff]  ;;  %v7077_v27 = vld [vmem:[%s8038_s14 + $0x8] sm:$0xff] }
 0x775   : > { %4549 = vmatpush.bf16.msrb.mxu3 %v7061_v58  ;;  %4631 = vmatpush.bf16.msra.mxu0 %v7072_v5 }
 0x776   : > { %v4299_v20 = vpack.c.bf16 %v7905_v28, %v7902_v26  ;;  %4723 = vmatpush.bf16.msra.mxu1 %v7081_v18 }
 0x778   : > { %4361 = vmatmul.bf16.vlgmr.msrb.gmra.mxu1 %v4299_v20  ;;  %v7076_v20 = vld [vmem:[%s8038_s14] sm:$0xff] }
 0x779   : > { %4550 = vmatpush.bf16.msrb.mxu3 %v7060_v51  ;;  %4632 = vmatpush.bf16.msra.mxu0 %v7071_v6 }
 0x77a   : > { %4724 = vmatpush.bf16.msra.mxu1 %v7080_v22 }
 0x77d   : > { %4633 = vmatpush.bf16.msra.mxu0 %v7070_v14 }
 0x77e   : > { %4725 = vmatpush.bf16.msra.mxu1 %v7079_v24 }
 0x781   : > { %4634 = vmatpush.bf16.msra.mxu0 %v7069_v35 }
 0x782   : > { %4726 = vmatpush.bf16.msra.mxu1 %v7078_v25 }
 0x785   : > { %4635 = vmatpush.bf16.msra.mxu0 %v7068_v1 }
 0x786   : > { %4727 = vmatpush.bf16.msra.mxu1 %v7077_v27 }
 0x78a   : > { %4728 = vmatpush.bf16.msra.mxu1 %v7076_v20 }
 0x7f5   : > { %v4362_v31 = vpop.f32.mrf.mxu1 }
 0x7f6   : > { %v4363_v30 = vadd.f32 %v7164_v32, %v4362_v31 }
 0x7fd   : > { %v4364_v33 = vpop.f32.mrf.mxu1 }
 0x7fe   : > { %v4365_v37 = vadd.f32 %v7164_v32, %v4364_v33 }
 0x800   : > { %v4384_v38 = vpack.c.bf16 %v4365_v37, %v4363_v30 }
 0x802   : > { %4441 = vmatmul.bf16.vlgmr.msrb.gmra.mxu2 %v4384_v38 }
 0x885   : > { %v4442_v41 = vpop.f32.mrf.mxu2 }
 0x886   : > { %v4447_v45 = vsel %vm2512_vm9, %v4442_v41, -1e+30 }
 0x887   : > { %4449 = vmax.xlane.f32.xlu2 %v4447_v45 }
 0x88d   : > { %v4444_v47 = vpop.f32.mrf.mxu2 }
 0x88e   : > { %v4448_v10 = vsel %vm2512_vm9, %v4444_v47, -1e+30 }
 0x88f   : > { %4451 = vmax.xlane.f32.xlu2 %v4448_v10 }
 0x8fa   : > { %v4450_v48 = vpop.xlane.xlu2 %4449 }
 0x8fb   : > { %v4453_v3 = vsub.f32 %v4447_v45, %v4450_v48 }
 0x8fd   : > { %v4455_v49 = vmul.f32 1.442695, %v4453_v3 }
 0x8ff   : > { %7207 = vpow2.f32 %v4455_v49 }
 0x902   : > { %v4452_v40 = vpop.xlane.xlu2 %4451 }
 0x903   : > { %v4454_v53 = vsub.f32 %v4448_v10, %v4452_v40 }
 0x905   : > { %v7208_v46 = vpop.eup %7207  ;;  %v4457_v62 = vmul.f32 1.442695, %v4454_v53 }
 0x906   : > { %4459 = vadd.xlane.f32.xlu0 %v7208_v46 }
 0x907   : > { %7209 = vpow2.f32 %v4457_v62 }
 0x90d   : > { %v7210_v54 = vpop.eup %7209 }
 0x90e   : > { %4461 = vadd.xlane.f32.xlu1 %v7210_v54 }
 0x979   : > { %v4460_v4 = vpop.xlane.xlu0 %4459 }
 0x97a   : > { %7211 = vrcp.f32 %v4460_v4 }
 0x980   : > { %v7212_v60 = vpop.eup %7211 }
 0x981   : > { %v4462_v7 = vpop.xlane.xlu1 %4461  ;;  %v4465_v42 = vmul.f32 %v7212_v60, %v7208_v46 }
 0x982   : > { %7213 = vrcp.f32 %v4462_v7 }
 0x983   : > { %v4467_v44 = vpack.c.bf16 %v4465_v42, %v4465_v42 }
 0x985   : > { %v4491_v11 = vunpack.c.l.b16 %v4467_v44 }
 0x988   : > { %v7214_v39 = vpop.eup %7213 }
 0x989   : > { %v4466_v13 = vmul.f32 %v7214_v39, %v7210_v54 }
 0x98b   : > { %v4468_v15 = vpack.c.bf16 %v4466_v13, %v4466_v13  ;;  %v7093_v23 = vpack.c.bf16 %v4466_v13, %v4465_v42 }
 0x98d   : > { %7095 = vst [vmem:[%s7840_s2 + $0x8] sm:$0xff] %v7093_v23   ;;  %v4492_v16 = vunpack.c.l.b16 %v4468_v15  ;;  %s4797_s2 = scalar_lea.hbm %s8071_s1, %s7084_s16 }
 0x98e   : > { %s4800_s20 = sshll.u32 %s4797_s2, 4  ;;  %s4801_s20 = int_to_ptr.hbm [resolvable:$true] %s4800_s20 }
 0x98f   : > { %v4493_v17 = vpack.c.b16 %v4492_v16, %v4491_v11  ;;  %s7301_s22 = sshra.s32 %s4801_s20, 4  ;;  %s7302_s22 = int_to_ptr.hbm [resolvable:$true] %s7301_s22 }
 0x990   : > { %s7303_s15 = scalar_lea.hbm %s7302_s22, 16  ;;  %p7308_p8 = scmp.lt.s32.totalorder %s7302_s22, %s8071_s1 }
 0x991   : > { %4551 = vmatmul.bf16.vlgmr.msrb.gmra.mxu3 %v4493_v17  ;;  %p7304_p4 = scmp.ne.s32.totalorder %s7302_s22, %s7303_s15 }
 0x993   : > { %p7305_p5 = pnand %p7304_p4, %p7504_p6 }
 0x995   : > { %p7306_p7 = pneg %p7305_p5 }
 0xa14   : > { %v4552_v19 = vpop.f32.mrf.mxu3 }
 0xa1c   : > { %v4554_v21 = vpop.f32.mrf.mxu3 }
 0xa1d   : > { %v4574_v61 = vpack.c.bf16 %v4554_v21, %v4552_v19 }
 0xa1f   : > { %4636 = vmatmul.bf16.vlgmr.msra.gmra.mxu0 %v4574_v61 }
 0xa9c   : > { %v4637_v12 = vpop.f32.mrf.mxu0 }
 0xa9d   : > { %v4638_v43 = vadd.f32 %v7165_v29, %v4637_v12 }
 0xa9f   : > { %v4642_v31 = vadd.f32 %v4638_v43, %v7902_v26 }
 0xaa1   : > { %v4644_v32 = vmul.f32 0.70710677, %v4642_v31 }
 0xaa3   : > { %v4646_v33 = vadd.f32 %v4644_v32, %v7856_v34 }
 0xaa4   : > { %v4639_v30 = vpop.f32.mrf.mxu0 }
 0xaa5   : > { %v4648_v37 = vmul.f32 0.70710677, %v4646_v33  ;;  %v4640_v38 = vadd.f32 %v7165_v29, %v4639_v30 }
 0xaa7   : > { %4650 = vst [vmem:[%s996_s19] sm:$0xff] %v4648_v37  ;;  %v4643_v41 = vadd.f32 %v4640_v38, %v7905_v28 }
 0xaa9   : > { %v4645_v45 = vmul.f32 0.70710677, %v4643_v41 }
 0xaab   : > { %v4647_v47 = vadd.f32 %v4645_v45, %v7860_v8 }
 0xaad   : > { %v4649_v10 = vmul.f32 0.70710677, %v4647_v47 }
 0xaaf   : > { %4651 = vst [vmem:[%s996_s19 + $0x8] sm:$0xff] %v4649_v10  ;;  %v4668_v26 = vpack.c.bf16 %v4649_v10, %v4648_v37  ;;  %s7307_s19 = scalar_lea.hbm %s8071_s1, 32 }
 0xab0   : > { %p7309_p9 = scmp.lt.s32.totalorder %s7307_s19, %s7303_s15 }
 0xab1   : > { %4729 = vmatmul.bf16.vlgmr.msra.gmra.mxu1 %v4668_v26 }
 0xab2   : > { %p7310_p11 = por %p7309_p9, %p7308_p8 }
 0xab4   : > { %p7311_p12 = pnand %p7310_p11, %p7306_p7 }
 0xab6   : > { %7314 = shalt.err (!%p7311_p12)
}
 0xab7   : > { %s7364_s24 = smov 128   ;;  %s7365_s16 = smov 8  }
 0xab8   : > { %7104 = dma.vmem_to_hbm [thread:$0]  (%p7504_p6), %s4799_s25, 256, %s4801_s20, %s4776_s21, %s7364_s24, %s7364_s24, %s7365_s16  }
 0xab9   : > { %s8072_s2 = sld [smem:[#allocation24_spill]] }
 0xaba   : > { %s8073_s23 = sld [smem:[#allocation26_spill]] }
 0xabf   : > { %v7166_v34 = vld [vmem:[%s8072_s2] ss:$0 sm:$0xff] }
 0xac0   : > { %s1028_s25 = scalar_lea.vmem %s8073_s23, %s7607_s17 }
 0xb2e   : > { %v4730_v8 = vpop.f32.mrf.mxu1 }
 0xb2f   : > { %v4731_v28 = vadd.f32 %v7166_v34, %v4730_v8 }
 0xb31   : > { %v6678_v9 = vmul.f32 -1.442695, %v4731_v28 }
 0xb33   : > { %7215 = vpow2.f32 %v6678_v9 }
 0xb36   : > { %v4732_v36 = vpop.f32.mrf.mxu1 }
 0xb37   : > { %v4733_v48 = vadd.f32 %v7166_v34, %v4732_v36 }
 0xb39   : > { %v7216_v3 = vpop.eup %7215  ;;  %v6679_v49 = vmul.f32 -1.442695, %v4733_v48 }
 0xb3a   : > { %v4741_v40 = vadd.f32 1.0, %v7216_v3 }
 0xb3b   : > { %7217 = vpow2.f32 %v6679_v49 }
 0xb3c   : > { %7219 = vrcp.f32 %v4741_v40  ;;  %v4754_v52 = vand.u32 2147483648, %v4741_v40  ;;  %v4752_v57 = vand.u32 2147483647, %v4741_v40  ;;  %vm4748_vm3 = vweird.f32 %v4741_v40 }
 0xb3e   : > { %v4755_v59 = vor.u32 1.1754944e-38, %v4754_v52  ;;  %vm4753_vm5 = vcmp.eq.f32.partialorder %v4752_v57, 8.507059e+37 }
 0xb41   : > { %v7218_v53 = vpop.eup %7217 }
 0xb42   : > { %v7220_v46 = vpop.eup %7219  ;;  %v4742_v62 = vadd.f32 1.0, %v7218_v53 }
 0xb43   : > { %v4744_v54 = vmul.f32 %v7220_v46, %v4741_v40  ;;  %vm4749_vm2 = vweird.f32 %v7220_v46 }
 0xb44   : > { %7221 = vrcp.f32 %v4742_v62  ;;  %vm4750_vm4 = vmor %vm4748_vm3, %vm4749_vm2  ;;  %v4769_v6 = vand.u32 2147483648, %v4742_v62  ;;  %v4767_v60 = vand.u32 2147483647, %v4742_v62  ;;  %vm4763_vm7 = vweird.f32 %v4742_v62 }
 0xb45   : > { %v4745_v55 = vsub.f32 1.0, %v4744_v54 }
 0xb46   : > { %v4770_v39 = vor.u32 1.1754944e-38, %v4769_v6  ;;  %vm4768_vm9 = vcmp.eq.f32.partialorder %v4767_v60, 8.507059e+37 }
 0xb47   : > { %v4746_v56 = vmul.f32 %v7220_v46, %v4745_v55 }
 0xb49   : > { %v4747_v58 = vadd.f32 %v7220_v46, %v4746_v56 }
 0xb4a   : > { %v7222_v51 = vpop.eup %7221 }
 0xb4b   : > { %v4751_v63 = vsel %vm4750_vm4, %v7220_v46, %v4747_v58  ;;  %v4759_v2 = vmul.f32 %v7222_v51, %v4742_v62  ;;  %vm4764_vm6 = vweird.f32 %v7222_v51 }
 0xb4c   : > { %v4756_v4 = vsel %vm4753_vm5, %v4755_v59, %v4751_v63  ;;  %vm4765_vm8 = vmor %vm4763_vm7, %vm4764_vm6 }
 0xb4d   : > { %4773 = vst [vmem:[%s1028_s25] sm:$0xff] %v4756_v4  ;;  %v4760_v5 = vsub.f32 1.0, %v4759_v2 }
 0xb4f   : > { %v4761_v7 = vmul.f32 %v7222_v51, %v4760_v5 }
 0xb51   : > { %v4762_v42 = vadd.f32 %v7222_v51, %v4761_v7 }
 0xb53   : > { %v4766_v44 = vsel %vm4765_vm8, %v7222_v51, %v4762_v42 }
 0xb54   : > { %v4771_v13 = vsel %vm4768_vm9, %v4770_v39, %v4766_v44 }
 0xb55   : > { %4774 = vst [vmem:[%s1028_s25 + $0x8] sm:$0xff] %v4771_v13 }
 0xb56 PF: > { %s8074_s17 = sld [smem:[#allocation14_spill]]  ;;  %p7114_p6 = pnand %p4994_p1, %p7510_p10 }
 0xb58   : > { %p7115_p13 = pneg %p7114_p6 }
 0xb5c   : > { %s4822_s21 = sand.u32 1, %s8074_s17  }
 0xb5d   : > { %s4823_s22 = scalar_lea.sflag [#allocation7], %s4822_s21 }
 0xb5e   : > { %7340 = dma.done.wait (%p7115_p13), %s4823_s22, 256  }
 0xb5f   : > { %7342 = vsyncadd (%p7115_p13), %s4823_s22, 4294967040  ;;  %s8076_s30 = sld [smem:[#allocation15_spill]]  ;;  %s8078_s27 = smov %s7349_s28 }
 0xb60   : > { %s8077_s15 = sld [smem:[#allocation16_spill]]  ;;  %s8079_s28 = smov %s7353_s29 }
 0xb65   : > { %p31_p0 = scmp.ge.s32.totalorder %s8076_s30, 4  }
 0xb66   : > { %s8080_s29 = smov %s8077_s15 }
 0xb67   :  { %33 = sbr.rel (!%p31_p0) target bundleno = 15 (0xf), region = 280 }
 0xb6c   :  { %4845 = vsyncpa [#allocation6], 1 }
 0xb6d   :  { %4847 = vsyncpa [#allocation6 + $0x1], 1 }
 0xb6e   :  { %4848 = vsyncpa [#allocation9], 1 }
 0xb6f   :  { %4849 = vsyncpa [#allocation7], 1 }
 0xb70   :  { %4851 = vsyncpa [#allocation7 + $0x1], 1 }

</bundles_post_ra>
